<compile_context>
chip_gen: v5e
topology: v5e:2x2
jax: 0.10.0
libtpu: 0.0.40
codegen_flags: <defaults>
</compile_context>

<pallas_src>
from collections import defaultdict
from math import floor

import numpy as np
import jax
import jax.numpy as jnp
from jax import lax
from jax.experimental import pallas as pl
from jax.experimental.pallas import tpu as pltpu

NAME_TO_ID = {'horse': 0, 'bird': 1, 'boat': 2, 'pottedplant': 3, 'bicycle': 4,
              'cow': 5, 'bus': 6, 'car': 7, 'cat': 8, 'train': 9, 'chair': 10,
              'motorbike': 11, 'tvmonitor': 12, 'person': 13, 'aeroplane': 14,
              'sofa': 15, 'dog': 16, 'sheep': 17, 'diningtable': 18, 'bottle': 19}
ID_TO_NAME = {v: k for k, v in NAME_TO_ID.items()}

S = 7                       # n_features (grid size)
B = 2                       # n_bboxes per cell
C = 20                      # n_classes
D = 5 * B + C               # 30
N_PER_IMG = 8               # max objects per image (padded)
IMGS_PER_STEP = 8           # images packed per grid step (keeps >=2 steps on v7x)
N_TOT = IMGS_PER_STEP * N_PER_IMG      # 64 objects per step
NF = 8                      # packed feature columns: [cx,cy,bw,bh,label,valid,img,0]
CELLS = S * S               # 49 (no per-image cell padding -> no de-pad slice)
ROWS_PER_STEP = IMGS_PER_STEP * CELLS  # 392 output rows per step (mult. of 8)
D_PAD = D                   # 30: exact feature width -> no de-pad slice


def voc_target_kernel(obj_ref, out_ref):
    rows = obj_ref[...]                                  # (N_TOT, NF) f32

    cx = rows[:, 0:1]
    cy = rows[:, 1:2]
    bw = rows[:, 2:3]
    bh = rows[:, 3:4]
    lab_i = rows[:, 4:5].astype(jnp.int32)
    val = rows[:, 5:6]
    img_i = rows[:, 6:7].astype(jnp.int32)

    cell_size = 1.0 / S
    # Match the reference arithmetic: i = floor(center / cell_size).
    # (Reference runs in float64 on host; f32 here can differ only for centers
    # exactly on a cell boundary.)
    ci_f = jnp.floor(cx / cell_size)
    cj_f = jnp.floor(cy / cell_size)
    ci = ci_f.astype(jnp.int32)
    cj = cj_f.astype(jnp.int32)

    in_range = (ci >= 0) & (ci < S) & (cj >= 0) & (cj < S)
    valid = (val > 0.5) & in_range                       # (N, 1) bool
    # Flat target-row key: img*CELLS + i*S + j; -1 for padded / dropped objs.
    key_col = jnp.where(valid, img_i * CELLS + ci * S + cj, -1)      # (N,1) i32

    # ---- key as a lane row (eye-mask + sublane reduce; iotas shared below) ----
    a_iota = lax.broadcasted_iota(jnp.int32, (N_TOT, N_TOT), 0)   # sublane = obj a
    b_iota = lax.broadcasted_iota(jnp.int32, (N_TOT, N_TOT), 1)   # lane    = obj b
    eye = a_iota == b_iota
    # (Key values <= IMGS_PER_STEP*CELLS are exactly representable in f32.)
    key_row = jnp.sum(jnp.where(eye, key_col.astype(jnp.float32), 0.0),
                      axis=0, keepdims=True).astype(jnp.int32)    # (1, N)

    # ---- per-object rank within its cell, on the VPU ----
    # rank[a] = #{b < a : same image & same cell}.  Invalid objects carry
    # key == -1 and never match a valid key.
    same = key_col == key_row                                     # (N, N)
    earlier = b_iota < a_iota
    rank = jnp.sum(jnp.where(same & earlier, 1.0, 0.0),
                   axis=1, keepdims=True).astype(jnp.int32)       # (N, 1)

    # ---- per-object contribution over the D feature lanes (N, 30) ----
    d_iota = lax.broadcasted_iota(jnp.int32, (N_TOT, D_PAD), 1)   # (N, 30)
    slot = jnp.where(d_iota < 5, 0, 1)          # box slot for lanes < 10
    box_pos = d_iota - slot * 5                 # position within the 5-tuple
    x_off = cx - ci_f * cell_size
    y_off = cy - cj_f * cell_size
    box_val = jnp.where(box_pos == 0, x_off,
              jnp.where(box_pos == 1, y_off,
              jnp.where(box_pos == 2, bw,
              jnp.where(box_pos == 3, bh, 1.0))))                 # (N, 30)
    box_part = jnp.where((d_iota < 5 * B) & (rank == slot), box_val, 0.0)
    cls_part = jnp.where((d_iota >= 5 * B)
                         & (lab_i == d_iota - 5 * B) & (rank < B), 1.0, 0.0)
    contrib = jnp.where(valid, box_part + cls_part, 0.0)          # (N, 30)

    # ---- one-hot row scatter, single fused MXU matmul (exact f32 selection) ----
    r_iota = lax.broadcasted_iota(jnp.int32, (ROWS_PER_STEP, N_TOT), 0)
    scat = jnp.where(r_iota == key_row, 1.0, 0.0)                 # (392, N)
    out = lax.dot_general(scat, contrib, (((1,), (0,)), ((), ())),
                          precision=lax.Precision.HIGHEST,
                          preferred_element_type=jnp.float32)     # (392, 30)
    # Duplicate (cell, label) pairs among the first B objects sum to 2; the
    # reference just sets the class bit to 1.  All legitimate values are <= 1,
    # so a global clamp is exact.
    out_ref[...] = jnp.minimum(out, 1.0)


@jax.jit
def _voc_targets_pallas(obj_rows):
    """obj_rows: (num_steps * N_TOT, NF) f32 -> (num_steps*IMGS_PER_STEP, S, S, D)."""
    num_steps = obj_rows.shape[0] // N_TOT
    out = pl.pallas_call(
        voc_target_kernel,
        out_shape=jax.ShapeDtypeStruct((num_steps * ROWS_PER_STEP, D_PAD),
                                       jnp.float32),
        grid=(num_steps,),
        in_specs=[pl.BlockSpec((N_TOT, NF), lambda g: (g, 0))],
        out_specs=pl.BlockSpec((ROWS_PER_STEP, D_PAD), lambda g: (g, 0)),
        compiler_params=pltpu.CompilerParams(
            dimension_semantics=("parallel",)),
    )(obj_rows)
    # Output is already exact (49 cells x 30 features): only a reshape, no
    # de-pad slice / extra HBM pass.
    return out.reshape(num_steps * IMGS_PER_STEP, S, S, D)


def _pack_annotations(annotations):
    """Host glue: parse the annotation dicts and pack objects into rows."""
    # TODO(synk): XML/dict annotation parsing has no Pallas equivalent; it stays host-side.
    n_imgs = len(annotations)
    num_steps = max(1, -(-n_imgs // IMGS_PER_STEP))
    packed = np.zeros((num_steps * N_TOT, NF), dtype=np.float32)
    for b, ann in enumerate(annotations):
        step, local = divmod(b, IMGS_PER_STEP)
        size = ann['annotation']['size']
        w, h = float(size['width']), float(size['height'])
        objects = ann['annotation']['object']
        assert len(objects) <= N_PER_IMG, "increase N_PER_IMG"
        base = step * N_TOT + local * N_PER_IMG
        for n, obj in enumerate(objects):
            label = float(NAME_TO_ID[obj['name']])
            bb = obj['bndbox']
            xmin, xmax = float(bb['xmin']), float(bb['xmax'])
            ymin, ymax = float(bb['ymin']), float(bb['ymax'])
            cx = (xmax + xmin) / (2 * w)
            cy = (ymax + ymin) / (2 * h)
            bw = (xmax - xmin) / (2 * w)
            bh = (ymax - ymin) / (2 * h)
            packed[base + n, :7] = [cx, cy, bw, bh, label, 1.0, float(local)]
    return packed, n_imgs


def voc_target_transform_batch(annotations):
    """Batched transform: list of annotation dicts -> (n_images, S, S, 30)."""
    packed, n_imgs = _pack_annotations(annotations)
    out = _voc_targets_pallas(jnp.asarray(packed))
    return out[:n_imgs]


def voc_target_transform(x):
    """Single-image transform (same semantics as the torch module)."""
    return voc_target_transform_batch([x])[0]


def reference_voc_target(x):
    """Direct numpy port of the torch forward (for verification)."""
    size = x['annotation']['size']
    w, h = float(size['width']), float(size['height'])
    objects = x['annotation']['object']
    cell_size = 1.0 / S
    data = defaultdict(list)
    target = np.zeros((S, S, D), dtype=np.float32)
    for obj in objects:
        label = int(NAME_TO_ID[obj['name']])
        bb = obj['bndbox']
        box_w = (float(bb['xmax']) - float(bb['xmin'])) / (2 * w)
        box_h = (float(bb['ymax']) - float(bb['ymin'])) / (2 * h)
        cx = (float(bb['xmax']) + float(bb['xmin'])) / (2 * w)
        cy = (float(bb['ymax']) + float(bb['ymin'])) / (2 * h)
        i = floor(cx / cell_size)
        j = floor(cy / cell_size)
        data[(i, j)].append(
            (label, np.array([cx - i * cell_size, cy - j * cell_size,
                              box_w, box_h, 1.0], dtype=np.float32)))
    for (i, j), elements in data.items():
        for box_idx, (label, element) in zip(range(B), elements):
            target[i, j, 5 * box_idx:5 * box_idx + 5] = element
            target[i, j, 5 * B + label] = 1.0
    return target


if __name__ == "__main__":
    key = jax.random.PRNGKey(0)
    w_img, h_img = 500.0, 375.0
    n_images = 18                       # spans 3 grid steps (8 images/step)

    annotations = []
    for b in range(n_images):
        key, kn, kx, ky, kl = jax.random.split(key, 5)
        n_obj = int(jax.random.randint(kn, (), 1, 7))
        xs = np.asarray(jax.random.uniform(kx, (n_obj, 2), minval=1.0,
                                           maxval=w_img - 2.0))
        ys = np.asarray(jax.random.uniform(ky, (n_obj, 2), minval=1.0,
                                           maxval=h_img - 2.0))
        labels = np.asarray(jax.random.randint(kl, (n_obj,), 0, C))
        objects = []
        for n in range(n_obj):
            xmin, xmax = float(np.min(xs[n])), float(np.max(xs[n]) + 1.0)
            ymin, ymax = float(np.min(ys[n])), float(np.max(ys[n]) + 1.0)
            objects.append({'name': ID_TO_NAME[int(labels[n])],
                            'bndbox': {'xmin': xmin, 'ymin': ymin,
                                       'xmax': xmax, 'ymax': ymax}})
        if b % 3 == 0 and len(objects) < N_PER_IMG:
            # second object in the same cell, different class -> box slot 1 path
            objects.append({'name': ID_TO_NAME[(int(labels[0]) + 1) % C],
                            'bndbox': dict(objects[0]['bndbox'])})
        if b % 5 == 0 and len(objects) < N_PER_IMG:
            # same cell, same class -> exercises the class-bit clamp
            objects.append({'name': ID_TO_NAME[int(labels[0])],
                            'bndbox': dict(objects[0]['bndbox'])})
        annotations.append({'annotation': {'size': {'width': w_img,
                                                    'height': h_img},
                                           'object': objects}})

    targets = jax.block_until_ready(voc_target_transform_batch(annotations))
    assert targets.shape == (n_images, S, S, D)
    for b, ann in enumerate(annotations):
        np.testing.assert_allclose(np.asarray(targets[b]),
                                   reference_voc_target(ann), atol=1e-5)

    single = jax.block_until_ready(voc_target_transform(annotations[0]))
    np.testing.assert_allclose(np.asarray(single),
                               reference_voc_target(annotations[0]), atol=1e-5)

    print("KERNEL_OK")
</pallas_src>

<mosaic_0001>
module attributes {stable_mosaic.version = 11 : i64} {
  func.func @voc_target_kernel(%arg0: i32, %arg1: memref<64x8xf32, #tpu.memory_space<vmem>>, %arg2: memref<392x30xf32, #tpu.memory_space<vmem>>) attributes {dimension_semantics = [#tpu.dimension_semantics<parallel>], iteration_bounds = array<i64: 3>, scalar_prefetch = 0 : i64, scratch_operands = 0 : i64, tpu.core_type = #tpu.core_type<tc>, window_params = [{transform_indices = @transform_0, window_bounds = array<i64: 64, 8>}, {transform_indices = @transform_1, window_bounds = array<i64: 392, 30>}]} {
    %c0 = arith.constant 0 : index
    %c0_0 = arith.constant 0 : index
    %0 = vector.load %arg1[%c0, %c0_0] : memref<64x8xf32, #tpu.memory_space<vmem>>, vector<64x8xf32>
    %1 = vector.extract_strided_slice %0 {offsets = [0, 0], sizes = [64, 1], strides = [1, 1]} : vector<64x8xf32> to vector<64x1xf32>
    %2 = vector.extract_strided_slice %0 {offsets = [0, 1], sizes = [64, 1], strides = [1, 1]} : vector<64x8xf32> to vector<64x1xf32>
    %3 = vector.extract_strided_slice %0 {offsets = [0, 2], sizes = [64, 1], strides = [1, 1]} : vector<64x8xf32> to vector<64x1xf32>
    %4 = vector.extract_strided_slice %0 {offsets = [0, 3], sizes = [64, 1], strides = [1, 1]} : vector<64x8xf32> to vector<64x1xf32>
    %5 = vector.extract_strided_slice %0 {offsets = [0, 4], sizes = [64, 1], strides = [1, 1]} : vector<64x8xf32> to vector<64x1xf32>
    %6 = arith.fptosi %5 : vector<64x1xf32> to vector<64x1xi32>
    %7 = vector.extract_strided_slice %0 {offsets = [0, 5], sizes = [64, 1], strides = [1, 1]} : vector<64x8xf32> to vector<64x1xf32>
    %8 = vector.extract_strided_slice %0 {offsets = [0, 6], sizes = [64, 1], strides = [1, 1]} : vector<64x8xf32> to vector<64x1xf32>
    %9 = arith.fptosi %8 : vector<64x1xf32> to vector<64x1xi32>
    %cst = arith.constant 0.142857149 : f32
    %10 = vector.broadcast %cst : f32 to vector<64x1xf32>
    %11 = arith.divf %1, %10 : vector<64x1xf32>
    %12 = math.floor %11 : vector<64x1xf32>
    %cst_1 = arith.constant 0.142857149 : f32
    %13 = vector.broadcast %cst_1 : f32 to vector<64x1xf32>
    %14 = arith.divf %2, %13 : vector<64x1xf32>
    %15 = math.floor %14 : vector<64x1xf32>
    %16 = arith.fptosi %12 : vector<64x1xf32> to vector<64x1xi32>
    %17 = arith.fptosi %15 : vector<64x1xf32> to vector<64x1xi32>
    %c0_i32 = arith.constant 0 : i32
    %18 = vector.broadcast %c0_i32 : i32 to vector<64x1xi32>
    %19 = arith.cmpi sge, %16, %18 : vector<64x1xi32>
    %c7_i32 = arith.constant 7 : i32
    %20 = vector.broadcast %c7_i32 : i32 to vector<64x1xi32>
    %21 = arith.cmpi slt, %16, %20 : vector<64x1xi32>
    %22 = arith.andi %19, %21 : vector<64x1xi1>
    %c0_i32_2 = arith.constant 0 : i32
    %23 = vector.broadcast %c0_i32_2 : i32 to vector<64x1xi32>
    %24 = arith.cmpi sge, %17, %23 : vector<64x1xi32>
    %25 = arith.andi %22, %24 : vector<64x1xi1>
    %c7_i32_3 = arith.constant 7 : i32
    %26 = vector.broadcast %c7_i32_3 : i32 to vector<64x1xi32>
    %27 = arith.cmpi slt, %17, %26 : vector<64x1xi32>
    %28 = arith.andi %25, %27 : vector<64x1xi1>
    %cst_4 = arith.constant 5.000000e-01 : f32
    %29 = vector.broadcast %cst_4 : f32 to vector<64x1xf32>
    %30 = arith.cmpf ogt, %7, %29 : vector<64x1xf32>
    %31 = arith.andi %30, %28 : vector<64x1xi1>
    %c49_i32 = arith.constant 49 : i32
    %32 = vector.broadcast %c49_i32 : i32 to vector<64x1xi32>
    %33 = arith.muli %9, %32 : vector<64x1xi32>
    %c7_i32_5 = arith.constant 7 : i32
    %34 = vector.broadcast %c7_i32_5 : i32 to vector<64x1xi32>
    %35 = arith.muli %16, %34 : vector<64x1xi32>
    %36 = arith.addi %33, %35 : vector<64x1xi32>
    %37 = arith.addi %36, %17 : vector<64x1xi32>
    %c-1_i32 = arith.constant -1 : i32
    %38 = vector.broadcast %c-1_i32 : i32 to vector<64x1xi32>
    %39 = arith.select %31, %37, %38 : vector<64x1xi1>, vector<64x1xi32>
    %40 = tpu.iota {dimensions = array<i32: 0>} : vector<64x64xi32>
    %41 = tpu.iota {dimensions = array<i32: 1>} : vector<64x64xi32>
    %42 = arith.cmpi eq, %40, %41 : vector<64x64xi32>
    %43 = arith.sitofp %39 : vector<64x1xi32> to vector<64x1xf32>
    %cst_6 = arith.constant 0.000000e+00 : f32
    %44 = vector.shape_cast %43 : vector<64x1xf32> to vector<64x1xf32>
    %45 = vector.broadcast %44 : vector<64x1xf32> to vector<64x64xf32>
    %46 = vector.broadcast %cst_6 : f32 to vector<64x64xf32>
    %47 = arith.select %42, %45, %46 : vector<64x64xi1>, vector<64x64xf32>
    %cst_7 = arith.constant dense<0.000000e+00> : vector<64xf32>
    %48 = vector.multi_reduction <add>, %47, %cst_7 [0] : vector<64x64xf32> to vector<64xf32>
    %49 = vector.shape_cast %48 : vector<64xf32> to vector<1x64xf32>
    %50 = arith.fptosi %49 : vector<1x64xf32> to vector<1x64xi32>
    %51 = vector.broadcast %39 : vector<64x1xi32> to vector<64x64xi32>
    %52 = vector.broadcast %50 : vector<1x64xi32> to vector<64x64xi32>
    %53 = arith.cmpi eq, %51, %52 : vector<64x64xi32>
    %54 = arith.cmpi slt, %41, %40 : vector<64x64xi32>
    %55 = arith.andi %53, %54 : vector<64x64xi1>
    %cst_8 = arith.constant 1.000000e+00 : f32
    %cst_9 = arith.constant 0.000000e+00 : f32
    %56 = vector.broadcast %cst_8 : f32 to vector<64x64xf32>
    %57 = vector.broadcast %cst_9 : f32 to vector<64x64xf32>
    %58 = arith.select %55, %56, %57 : vector<64x64xi1>, vector<64x64xf32>
    %cst_10 = arith.constant dense<0.000000e+00> : vector<64xf32>
    %59 = vector.multi_reduction <add>, %58, %cst_10 [1] : vector<64x64xf32> to vector<64xf32>
    %60 = vector.shape_cast %59 : vector<64xf32> to vector<64x1xf32>
    %61 = arith.fptosi %60 : vector<64x1xf32> to vector<64x1xi32>
    %62 = tpu.iota {dimensions = array<i32: 1>} : vector<64x30xi32>
    %c5_i32 = arith.constant 5 : i32
    %63 = vector.broadcast %c5_i32 : i32 to vector<64x30xi32>
    %64 = arith.cmpi slt, %62, %63 : vector<64x30xi32>
    %c0_i32_11 = arith.constant 0 : i32
    %c1_i32 = arith.constant 1 : i32
    %65 = vector.broadcast %c0_i32_11 : i32 to vector<64x30xi32>
    %66 = vector.broadcast %c1_i32 : i32 to vector<64x30xi32>
    %67 = arith.select %64, %65, %66 : vector<64x30xi1>, vector<64x30xi32>
    %c5_i32_12 = arith.constant 5 : i32
    %68 = vector.broadcast %c5_i32_12 : i32 to vector<64x30xi32>
    %69 = arith.muli %67, %68 : vector<64x30xi32>
    %70 = arith.subi %62, %69 : vector<64x30xi32>
    %cst_13 = arith.constant 0.142857149 : f32
    %71 = vector.broadcast %cst_13 : f32 to vector<64x1xf32>
    %72 = arith.mulf %12, %71 : vector<64x1xf32>
    %73 = arith.subf %1, %72 : vector<64x1xf32>
    %cst_14 = arith.constant 0.142857149 : f32
    %74 = vector.broadcast %cst_14 : f32 to vector<64x1xf32>
    %75 = arith.mulf %15, %74 : vector<64x1xf32>
    %76 = arith.subf %2, %75 : vector<64x1xf32>
    %c0_i32_15 = arith.constant 0 : i32
    %77 = vector.broadcast %c0_i32_15 : i32 to vector<64x30xi32>
    %78 = arith.cmpi eq, %70, %77 : vector<64x30xi32>
    %c1_i32_16 = arith.constant 1 : i32
    %79 = vector.broadcast %c1_i32_16 : i32 to vector<64x30xi32>
    %80 = arith.cmpi eq, %70, %79 : vector<64x30xi32>
    %c2_i32 = arith.constant 2 : i32
    %81 = vector.broadcast %c2_i32 : i32 to vector<64x30xi32>
    %82 = arith.cmpi eq, %70, %81 : vector<64x30xi32>
    %c3_i32 = arith.constant 3 : i32
    %83 = vector.broadcast %c3_i32 : i32 to vector<64x30xi32>
    %84 = arith.cmpi eq, %70, %83 : vector<64x30xi32>
    %cst_17 = arith.constant 1.000000e+00 : f32
    %85 = vector.shape_cast %4 : vector<64x1xf32> to vector<64x1xf32>
    %86 = vector.broadcast %85 : vector<64x1xf32> to vector<64x30xf32>
    %87 = vector.broadcast %cst_17 : f32 to vector<64x30xf32>
    %88 = arith.select %84, %86, %87 : vector<64x30xi1>, vector<64x30xf32>
    %89 = vector.shape_cast %3 : vector<64x1xf32> to vector<64x1xf32>
    %90 = vector.broadcast %89 : vector<64x1xf32> to vector<64x30xf32>
    %91 = arith.select %82, %90, %88 : vector<64x30xi1>, vector<64x30xf32>
    %92 = vector.shape_cast %76 : vector<64x1xf32> to vector<64x1xf32>
    %93 = vector.broadcast %92 : vector<64x1xf32> to vector<64x30xf32>
    %94 = arith.select %80, %93, %91 : vector<64x30xi1>, vector<64x30xf32>
    %95 = vector.shape_cast %73 : vector<64x1xf32> to vector<64x1xf32>
    %96 = vector.broadcast %95 : vector<64x1xf32> to vector<64x30xf32>
    %97 = arith.select %78, %96, %94 : vector<64x30xi1>, vector<64x30xf32>
    %c10_i32 = arith.constant 10 : i32
    %98 = vector.broadcast %c10_i32 : i32 to vector<64x30xi32>
    %99 = arith.cmpi slt, %62, %98 : vector<64x30xi32>
    %100 = vector.broadcast %61 : vector<64x1xi32> to vector<64x30xi32>
    %101 = arith.cmpi eq, %100, %67 : vector<64x30xi32>
    %102 = arith.andi %99, %101 : vector<64x30xi1>
    %cst_18 = arith.constant 0.000000e+00 : f32
    %103 = vector.broadcast %cst_18 : f32 to vector<64x30xf32>
    %104 = arith.select %102, %97, %103 : vector<64x30xi1>, vector<64x30xf32>
    %c10_i32_19 = arith.constant 10 : i32
    %105 = vector.broadcast %c10_i32_19 : i32 to vector<64x30xi32>
    %106 = arith.cmpi sge, %62, %105 : vector<64x30xi32>
    %c10_i32_20 = arith.constant 10 : i32
    %107 = vector.broadcast %c10_i32_20 : i32 to vector<64x30xi32>
    %108 = arith.subi %62, %107 : vector<64x30xi32>
    %109 = vector.broadcast %6 : vector<64x1xi32> to vector<64x30xi32>
    %110 = arith.cmpi eq, %109, %108 : vector<64x30xi32>
    %111 = arith.andi %106, %110 : vector<64x30xi1>
    %c2_i32_21 = arith.constant 2 : i32
    %112 = vector.broadcast %c2_i32_21 : i32 to vector<64x1xi32>
    %113 = arith.cmpi slt, %61, %112 : vector<64x1xi32>
    %114 = vector.broadcast %113 : vector<64x1xi1> to vector<64x30xi1>
    %115 = arith.andi %111, %114 : vector<64x30xi1>
    %cst_22 = arith.constant 1.000000e+00 : f32
    %cst_23 = arith.constant 0.000000e+00 : f32
    %116 = vector.broadcast %cst_22 : f32 to vector<64x30xf32>
    %117 = vector.broadcast %cst_23 : f32 to vector<64x30xf32>
    %118 = arith.select %115, %116, %117 : vector<64x30xi1>, vector<64x30xf32>
    %119 = arith.addf %104, %118 : vector<64x30xf32>
    %cst_24 = arith.constant 0.000000e+00 : f32
    %120 = vector.shape_cast %31 : vector<64x1xi1> to vector<64x1xi1>
    %121 = vector.broadcast %120 : vector<64x1xi1> to vector<64x30xi1>
    %122 = vector.broadcast %cst_24 : f32 to vector<64x30xf32>
    %123 = arith.select %121, %119, %122 : vector<64x30xi1>, vector<64x30xf32>
    %124 = tpu.iota {dimensions = array<i32: 0>} : vector<392x64xi32>
    %125 = vector.broadcast %50 : vector<1x64xi32> to vector<392x64xi32>
    %126 = arith.cmpi eq, %124, %125 : vector<392x64xi32>
    %cst_25 = arith.constant 1.000000e+00 : f32
    %cst_26 = arith.constant 0.000000e+00 : f32
    %127 = vector.broadcast %cst_25 : f32 to vector<392x64xf32>
    %128 = vector.broadcast %cst_26 : f32 to vector<392x64xf32>
    %129 = arith.select %126, %127, %128 : vector<392x64xi1>, vector<392x64xf32>
    %cst_27 = arith.constant dense<0.000000e+00> : vector<392x30xf32>
    %130 = tpu.matmul %129, %123, %cst_27 {dimension_numbers = #tpu.dot_dimension_numbers<[1], [0], [0], [1], [0, 0, 1, 1], [], []>, precision = #tpu.contract_precision<fp32>} : vector<392x64xf32>, vector<64x30xf32>, vector<392x30xf32> -> vector<392x30xf32>
    %cst_28 = arith.constant 1.000000e+00 : f32
    %131 = vector.broadcast %cst_28 : f32 to vector<392x30xf32>
    %132 = arith.minimumf %130, %131 : vector<392x30xf32>
    %c0_29 = arith.constant 0 : index
    %c0_30 = arith.constant 0 : index
    %133 = vector.load %arg2[%c0_29, %c0_30] : memref<392x30xf32, #tpu.memory_space<vmem>>, vector<392x30xf32>
    tpu.vector_store %arg2[%c0_29, %c0_30], %132 {strides = array<i32>} : memref<392x30xf32, #tpu.memory_space<vmem>>, vector<392x30xf32>,
    return
  }
  func.func @transform_0(%arg0: i32) -> (i32, i32) {
    %c0_i32 = arith.constant 0 : i32
    %c0_i32_0 = arith.constant 0 : i32
    return %arg0, %c0_i32 : i32, i32
  }
  func.func @transform_1(%arg0: i32) -> (i32, i32) {
    %c0_i32 = arith.constant 0 : i32
    %c0_i32_0 = arith.constant 0 : i32
    return %arg0, %c0_i32 : i32, i32
  }
}

</mosaic_0001>

<bundles_post_ra>
// kernel: _voc_targets_pallas.1
= control target key start
LH: loop header
LB: loop body
LE: loop exit
PB: predicated region body
PF: predicated region fallthrough
CT: control target
= control target key end

     0   :  { %s3487_s6 = smov 0   ;;  %s5967_s0 = inlined_call_operand.vmem [shape: f32[192,8], index: 0, kind: input, shape index: {}]   ;;  %s5968_s1 = inlined_call_operand.vmem [shape: f32[1176,30], index: 1, kind: output, shape index: {}]  }
   0x1 LB: > { %s3122_s7 = sadd.s32 4294967295, %s3464_s6   ;;  %p3126_p0 = scmp.ge.s32.totalorder %s3464_s6, 1  ;;  %s3464_s6 = sphi %s3487_s6, %s11_s6  }
   0x2   : > { %p88_p1 = scmp.lt.s32.totalorder %s3464_s6, 4 }
   0x4   : > { %p89_p2 = pnand %p3126_p0, %p88_p1 }
   0x6   : > { %92 = sbr.rel (%p89_p2) target bundleno = 1492 (0x5d4), region = 24 }
   0xb   : > { %s3127_s8 = sshll.u32 %s3122_s7, 3  ;;  %v3466_v0 = vmov 0.14285715   ;;  %s3467_s13 = smov 5   ;;  %v5982_v19 = vmov 0  }
   0xc   : > { %p109_p3 = scmp.lt.s32.totalorder %s3127_s8, 23  ;;  %3453 = vrcp.f32 %v3466_v0  ;;  %s3469_s14 = smov 127   ;;  %v3471_v0 = vmov 3  }
   0xd   : > { %s3470_s15 = smov 6   ;;  %3416 = vset.pattern.permute.xlu2 %v3471_v0  ;;  %s114_s16 = smul.u32 49, %s3122_s7 }
   0xe   : > { %s6650_s8 = smov (!%p109_p3, %s3127_s8), 23 }
   0xf   : > { %s3128_s9 = sshll.u32 %s6650_s8, 3  ;;  %p115_p4 = scmp.lt.s32.totalorder %s114_s16, 146 }
  0x10   : > { %s3500_s12 = scalar_lea.vmem %s5967_s0, %s3128_s9 }
  0x11   : > { %v3503_v5 = vld [vmem:[%s3500_s12] sm:$0xff]  ;;  %v3506_v7 = vld [vmem:[%s3500_s12 + $0x8] sm:$0xff]  ;;  %v3509_v8 = vld [vmem:[%s3500_s12 + $0x10] sm:$0xff]  ;;  %s6652_s16 = smov (!%p115_p4, %s114_s16), 146 }
  0x12   : > { %v3454_v1 = vpop.eup %3453  ;;  %v3559_v23 = vld [vmem:[%s3500_s12 + $0x18] sm:$0xff]  ;;  %v3573_v26 = vld [vmem:[%s3500_s12 + $0x20] sm:$0xff]  ;;  %v3602_v36 = vld [vmem:[%s3500_s12 + $0x28] sm:$0xff]  ;;  %s3129_s17 = sshll.u32 %s6652_s16, 3 }
  0x13   : > { %v137_v2 = vmul.f32 0.14285715, %v3454_v1  ;;  %vm141_vm0 = vweird.f32 %v3454_v1  ;;  %v3639_v46 = vld [vmem:[%s3500_s12 + $0x30] sm:$0xff]  ;;  %v3654_v49 = vld [vmem:[%s3500_s12 + $0x38] sm:$0xff]  ;;  %s5576_s20 = scalar_lea.vmem %s5968_s1, %s3129_s17 }
  0x15   : > { %v138_v3 = vsub.f32 1.0, %v137_v2 }
  0x17   : > { %v139_v4 = vmul.f32 %v3454_v1, %v138_v3  ;;  %v3297_v3 = vceil.f32 %v3503_v5 }
  0x19   : > { %v140_v6 = vadd.f32 %v3454_v1, %v139_v4  ;;  %v3298_v4 = vfloor.f32 %v3503_v5 }
  0x1b   : > { %v3511_v9 = vsel %vm141_vm0, %v3454_v1, %v140_v6 }
  0x1c   : > { %v3515_v10 = vmul.f32 %v3511_v9, %v3503_v5  ;;  %v3519_v11 = vmul.f32 %v3511_v9, %v3506_v7  ;;  %v3523_v12 = vmul.f32 %v3511_v9, %v3509_v8  ;;  %v3568_v25 = vmul.f32 %v3511_v9, %v3559_v23 }
  0x1d   : > { %v3583_v31 = vmul.f32 %v3511_v9, %v3573_v26  ;;  %v3613_v39 = vmul.f32 %v3511_v9, %v3602_v36  ;;  %v3647_v48 = vmul.f32 %v3511_v9, %v3639_v46  ;;  %v3663_v53 = vmul.f32 %v3511_v9, %v3654_v49 }
  0x1e   : > { %v5975_v13 = vfloor.f32 %v3515_v10  ;;  %v5978_v14 = vfloor.f32 %v3519_v11  ;;  %v153_v15 = vfloor.f32 %v3523_v12  ;;  %v154_v27 = vfloor.f32 %v3568_v25 }
  0x1f   : > { %v155_v33 = vfloor.f32 %v3583_v31  ;;  %v156_v41 = vfloor.f32 %v3613_v39  ;;  %v157_v50 = vfloor.f32 %v3647_v48  ;;  %v158_v55 = vfloor.f32 %v3663_v53 }
  0x20   : > { %v3530_v16 = vcvt.f32.s32 %v5975_v13  ;;  %v3534_v17 = vcvt.f32.s32 %v5978_v14  ;;  %v3543_v18 = vcvt.f32.s32 %v153_v15  ;;  %v3588_v32 = vcvt.f32.s32 %v154_v27 }
  0x21   : > { %v3607_v38 = vcvt.f32.s32 %v155_v33  ;;  %v3630_v44 = vcvt.f32.s32 %v156_v41  ;;  %v3669_v54 = vcvt.f32.s32 %v157_v50  ;;  %v3678_v57 = vcvt.f32.s32 %v158_v55 }
  0x22   : > { %359 = vrot.lane.b32.xlu1 %v3530_v16, %s3467_s13  ;;  %vm167_vm1 = vcmp.ge.s32.totalorder %v3530_v16, 0  ;;  %361 = vrot.lane.b32.xlu2 %v3534_v17, %s3467_s13  ;;  %vm175_vm2 = vcmp.lt.s32.totalorder %v3530_v16, 7  ;;  %vm169_vm3 = vcmp.ge.s32.totalorder %v3543_v18, 0  ;;  %vm168_vm4 = vcmp.ge.s32.totalorder %v3534_v17, 0 }
  0x23   : > { %v191_v20 = vsel %vm167_vm1, 1, %v5982_v19  ;;  %v231_v21 = vsel %vm175_vm2, 1, %v5982_v19  ;;  %v193_v22 = vsel %vm169_vm3, 1, %v5982_v19  ;;  %v192_v24 = vsel %vm168_vm4, 1, %v5982_v19 }
  0x24   : > { %199 = vrot.lane.b32.xlu0 %v191_v20, %s3469_s14  ;;  %vm176_vm5 = vcmp.lt.s32.totalorder %v3534_v17, 7  ;;  %v327_v28 = vmul.u32 7, %v3530_v16  ;;  %v328_v30 = vmul.u32 7, %v3534_v17  ;;  %vm177_vm6 = vcmp.lt.s32.totalorder %v3543_v18, 7 }
  0x25   : > { %v232_v29 = vsel %vm176_vm5, 1, %v5982_v19  ;;  %vm170_vm7 = vcmp.ge.s32.totalorder %v3588_v32, 0  ;;  %v233_v34 = vsel %vm177_vm6, 1, %v5982_v19  ;;  %v329_v37 = vmul.u32 7, %v3543_v18 }
  0x26   : > { %v194_v35 = vsel %vm170_vm7, 1, %v5982_v19  ;;  %vm171_vm8 = vcmp.ge.s32.totalorder %v3607_v38, 0  ;;  %vm178_vm9 = vcmp.lt.s32.totalorder %v3588_v32, 7  ;;  %v330_v40 = vmul.u32 7, %v3588_v32 }
  0x27   : > { %v195_v42 = vsel %vm171_vm8, 1, %v5982_v19  ;;  %v234_v43 = vsel %vm178_vm9, 1, %v5982_v19  ;;  %vm179_vm10 = vcmp.lt.s32.totalorder %v3607_v38, 7  ;;  %vm5973_vm11 = vcmp.ge.s32.totalorder %v3630_v44, 0 }
  0x28   : > { %v235_v45 = vsel %vm179_vm10, 1, %v5982_v19  ;;  %v196_v47 = vsel %vm5973_vm11, 1, %v5982_v19  ;;  %vm5974_vm12 = vcmp.lt.s32.totalorder %v3630_v44, 7  ;;  %v331_v52 = vmul.u32 7, %v3607_v38 }
  0x29   : > { %v236_v51 = vsel %vm5974_vm12, 1, %v5982_v19  ;;  %v332_v56 = vmul.u32 7, %v3630_v44  ;;  %vm5971_vm13 = vcmp.ge.s32.totalorder %v3669_v54, 0  ;;  %vm5969_vm14 = vcmp.ge.s32.totalorder %v3678_v57, 0 }
  0x2a   : > { %239 = vrot.lane.b32.xlu1 %v231_v21, %s3469_s14  ;;  %203 = vrot.lane.b32.xlu2 %v193_v22, %s3469_s14  ;;  %v197_v58 = vsel %vm5971_vm13, 1, %v5982_v19  ;;  %vm5972_vm15 = vcmp.lt.s32.totalorder %v3669_v54, 7  ;;  %v333_v59 = vmul.u32 7, %v3669_v54  ;;  %v198_v60 = vsel %vm5969_vm14, 1, %v5982_v19 }
  0x2b   : > { %v237_v61 = vsel %vm5972_vm15, 1, %v5982_v19  ;;  %vm5970_vm0 = vcmp.lt.s32.totalorder %v3678_v57, 7  ;;  %v334_v62 = vmul.u32 7, %v3678_v57  ;;  %vm3296_vm14 = vcmp.lt.s32.totalorder %v3503_v5, 0 }
  0x2c   : > { %201 = vrot.lane.b32.xlu0 %v192_v24, %s3469_s14  ;;  %v238_v63 = vsel %vm5970_vm0, 1, %v5982_v19  ;;  %v3717_v20 = vsel %vm3296_vm14, %v3297_v3, %v3298_v4  ;;  %vm183_vm0 = vmand %vm167_vm1, %vm175_vm2  ;;  %v3302_v24 = vceil.f32 %v3506_v7  ;;  %vm3301_vm14 = vcmp.lt.s32.totalorder %v3506_v7, 0 }
  0x2d   : > { %v3300_v22 = vcvt.f32.s32 %v3717_v20  ;;  %vm184_vm1 = vmand %vm168_vm4, %vm176_vm5  ;;  %v5984_v39 = vmov 5   ;;  %v6186_v20 = vfloor.f32 %v3519_v11  ;;  %v6189_v11 = vfloor.f32 %v3515_v10 }
  0x32   : > { %241 = vrot.lane.b32.xlu1 %v232_v29, %s3469_s14  ;;  %335 = vrot.lane.b32.xlu2 %v327_v28, %s3470_s15  ;;  %v3303_v28 = vfloor.f32 %v3506_v7 }
  0x34   : > { %337 = vrot.lane.b32.xlu0 %v328_v30, %s3470_s15  ;;  %v319_v30 = vmul.u32 49, %v3300_v22  ;;  %v3730_v16 = vsel %vm3301_vm14, %v3302_v24, %v3303_v28  ;;  %v3318_v24 = vfloor.f32 %v3573_v26 }
  0x3a   : > { %243 = vrot.lane.b32.xlu1 %v233_v34, %s3469_s14  ;;  %205 = vrot.lane.b32.xlu2 %v194_v35, %s3469_s14 }
  0x3c   : > { %339 = vrot.lane.b32.xlu0 %v329_v37, %s3470_s15 }
  0x42   : > { %207 = vrot.lane.b32.xlu1 %v195_v42, %s3469_s14  ;;  %341 = vrot.lane.b32.xlu2 %v330_v40, %s3470_s15  ;;  %v5979_v42 = vcvt.f32.s32 %v3730_v16 }
  0x44   : > { %245 = vrot.lane.b32.xlu0 %v234_v43, %s3469_s14 }
  0x4a   : > { %247 = vrot.lane.b32.xlu1 %v235_v45, %s3469_s14  ;;  %209 = vrot.lane.b32.xlu2 %v196_v47, %s3469_s14  ;;  %v320_v47 = vmul.u32 49, %v5979_v42 }
  0x4c   : > { %363 = vrot.lane.b32.xlu0 %v3543_v18, %s3467_s13 }
  0x52   : > { %365 = vrot.lane.b32.xlu1 %v3588_v32, %s3467_s13  ;;  %249 = vrot.lane.b32.xlu2 %v236_v51, %s3469_s14  ;;  %v3317_v32 = vceil.f32 %v3573_v26 }
  0x54   : > { %343 = vrot.lane.b32.xlu0 %v331_v52, %s3470_s15 }
  0x5a   : > { %345 = vrot.lane.b32.xlu1 %v332_v56, %s3470_s15  ;;  %367 = vrot.lane.b32.xlu2 %v3607_v38, %s3467_s13 }
  0x5c   : > { %211 = vrot.lane.b32.xlu0 %v197_v58, %s3469_s14 }
  0x62   : > { %213 = vrot.lane.b32.xlu1 %v198_v60, %s3469_s14  ;;  %347 = vrot.lane.b32.xlu2 %v333_v59, %s3470_s15  ;;  %v3307_v60 = vceil.f32 %v3509_v8 }
  0x64   : > { %251 = vrot.lane.b32.xlu0 %v237_v61, %s3469_s14  ;;  %v3308_v61 = vfloor.f32 %v3509_v8 }
  0x6a   : > { %253 = vrot.lane.b32.xlu1 %v238_v63, %s3469_s14  ;;  %349 = vrot.lane.b32.xlu2 %v334_v62, %s3470_s15 }
  0x6c   : > { %369 = vrot.lane.b32.xlu0 %v3630_v44, %s3467_s13 }
  0x72   : > { %373 = vrot.lane.b32.xlu1 %v3678_v57, %s3467_s13  ;;  %654 = vperm.xlu2 %3416, %v3654_v49  }
  0x74   : > { %371 = vrot.lane.b32.xlu0 %v3669_v54, %s3467_s13 }
  0x7c   : > { %v362_v1 = vpop.permute.xlu2 %361 }
  0x84   : > { %v204_v2 = vpop.permute.xlu2 %203 }
  0x85   : > { %vm217_vm4 = vcmp.ne.s32.totalorder %v204_v2, 0  ;;  %v3313_v2 = vfloor.f32 %v3559_v23 }
  0x8c   : > { %v336_v9 = vpop.permute.xlu2 %335 }
  0x8d   : > { %v351_v40 = vadd.s32 %v336_v9, %v319_v30 }
  0x94   : > { %v360_v6 = vpop.permute.xlu1 %359  ;;  %v206_v35 = vpop.permute.xlu2 %205 }
  0x95   : > { %v375_v43 = vadd.s32 %v360_v6, %v351_v40 }
  0x96   : > { %v200_v21 = vpop.permute.xlu0 %199 }
  0x97   : > { %vm215_vm13 = vcmp.ne.s32.totalorder %v200_v21, 0 }
  0x98   : > { %vm223_vm15 = vmand %vm183_vm0, %vm215_vm13 }
  0x9c   : > { %v240_v29 = vpop.permute.xlu1 %239  ;;  %v342_v17 = vpop.permute.xlu2 %341 }
  0x9d   : > { %vm255_vm11 = vcmp.ne.s32.totalorder %v240_v29, 0 }
  0x9e   : > { %vm263_vm12 = vmand %vm223_vm15, %vm255_vm11  ;;  %v202_v34 = vpop.permute.xlu0 %201 }
  0x9f   : > { %v279_v37 = vsel %vm263_vm12, 1, %v5982_v19  ;;  %vm216_vm2 = vcmp.ne.s32.totalorder %v202_v34, 0  ;;  %vm185_vm12 = vmand %vm169_vm3, %vm177_vm6  ;;  %vm218_vm6 = vcmp.ne.s32.totalorder %v206_v35, 0 }
  0xa0   : > { %287 = vrot.lane.b32.xlu2 %v279_v37, %s3467_s13  ;;  %vm224_vm11 = vmand %vm184_vm1, %vm216_vm2  ;;  %vm3306_vm1 = vcmp.lt.s32.totalorder %v3509_v8, 0  ;;  %vm3311_vm2 = vcmp.lt.s32.totalorder %v3559_v23, 0 }
  0xa1   : > { %vm225_vm5 = vmand %vm185_vm12, %vm217_vm4  ;;  %v3757_v63 = vsel %vm3306_vm1, %v3307_v60, %v3308_v61  ;;  %vm3316_vm12 = vcmp.lt.s32.totalorder %v3573_v26, 0 }
  0xa2   : > { %vm186_vm3 = vmand %vm170_vm7, %vm178_vm9  ;;  %v3310_v6 = vcvt.f32.s32 %v3757_v63  ;;  %v3777_v35 = vsel %vm3316_vm12, %v3317_v32, %v3318_v24  ;;  %v3332_v24 = vceil.f32 %v3654_v49 }
  0xa3   : > { %vm187_vm7 = vmand %vm171_vm8, %vm179_vm10  ;;  %vm6152_vm8 = vcmp.lt.s32.totalorder %v3630_v44, 7  ;;  %vm6153_vm10 = vcmp.ge.s32.totalorder %v3630_v44, 0 }
  0xa4   : > { %v242_v45 = vpop.permute.xlu1 %241  ;;  %v210_v3 = vpop.permute.xlu2 %209  ;;  %v321_v28 = vmul.u32 49, %v3310_v6 }
  0xa5   : > { %vm256_vm13 = vcmp.ne.s32.totalorder %v242_v45, 0 }
  0xa6   : > { %vm264_vm15 = vmand %vm224_vm11, %vm256_vm13  ;;  %v338_v51 = vpop.permute.xlu0 %337 }
  0xa7   : > { %v280_v52 = vsel %vm264_vm15, 1, %v5982_v19  ;;  %v352_v56 = vadd.s32 %v338_v51, %v320_v47  ;;  %vm226_vm11 = vmand %vm186_vm3, %vm218_vm6  ;;  %v3320_v51 = vcvt.f32.s32 %v3777_v35 }
  0xa8   : > { %289 = vrot.lane.b32.xlu0 %v280_v52, %s3467_s13  ;;  %383 = vrot.lane.b32.xlu2 %v375_v43, %s3469_s14 }
  0xa9   : > { %v376_v59 = vadd.s32 %v362_v1, %v352_v56  ;;  %v3312_v1 = vceil.f32 %v3559_v23  ;;  %v323_v44 = vmul.u32 49, %v3320_v51 }
  0xab   : > { %v3763_v9 = vsel %vm3311_vm2, %v3312_v1, %v3313_v2  ;;  %v3322_v2 = vceil.f32 %v3602_v36 }
  0xac   : > { %v244_v58 = vpop.permute.xlu1 %243  ;;  %v3315_v29 = vcvt.f32.s32 %v3763_v9  ;;  %v250_v34 = vpop.permute.xlu2 %249 }
  0xad   : > { %vm257_vm0 = vcmp.ne.s32.totalorder %v244_v58, 0  ;;  %vm260_vm6 = vcmp.ne.s32.totalorder %v250_v34, 0  ;;  %v3327_v34 = vceil.f32 %v3639_v46 }
  0xae   : > { %vm265_vm14 = vmand %vm225_vm5, %vm257_vm0  ;;  %v340_v62 = vpop.permute.xlu0 %339  ;;  %v322_v40 = vmul.u32 49, %v3315_v29  ;;  %vm220_vm0 = vcmp.ne.s32.totalorder %v210_v3, 0  ;;  %v3323_v3 = vfloor.f32 %v3602_v36 }
  0xaf   : > { %v281_v18 = vsel %vm265_vm14, 1, %v5982_v19  ;;  %v353_v37 = vadd.s32 %v340_v62, %v321_v28  ;;  %vm188_vm5 = vmand %vm6153_vm10, %vm6152_vm8  ;;  %v3333_v28 = vfloor.f32 %v3654_v49  ;;  %vm6156_vm8 = vcmp.lt.s32.totalorder %v3678_v57, 7 }
  0xb0   : > { %291 = vrot.lane.b32.xlu1 %v281_v18, %s3467_s13  ;;  %385 = vrot.lane.b32.xlu0 %v376_v59, %s3469_s14  ;;  %vm228_vm3 = vmand %vm188_vm5, %vm220_vm0  ;;  %v354_v52 = vadd.s32 %v342_v17, %v322_v40  ;;  %v5980_v18 = vmov 2   ;;  %v3473_v17 = vmov 4   ;;  %vm6157_vm10 = vcmp.ge.s32.totalorder %v3678_v57, 0 }
  0xb1   : > { %vm268_vm2 = vmand %vm228_vm3, %vm260_vm6  ;;  %3417 = vset.pattern.permute.xlu0 %v5980_v18  ;;  %3418 = vset.pattern.permute.xlu1 %v3473_v17 }
  0xb2   : > { %v284_v61 = vsel %vm268_vm2, 1, %v5982_v19  ;;  %vm190_vm5 = vmand %vm6157_vm10, %vm6156_vm8  ;;  %vm273_vm8 = vcmp.gt.f32.partialorder %v3509_v8, 0.5 }
  0xb4   : > { %v208_v4 = vpop.permute.xlu1 %207  ;;  %v368_v60 = vpop.permute.xlu2 %367 }
  0xb5   : > { %vm219_vm13 = vcmp.ne.s32.totalorder %v208_v4, 0 }
  0xb6   : > { %v246_v21 = vpop.permute.xlu0 %245  ;;  %vm227_vm4 = vmand %vm187_vm7, %vm219_vm13  ;;  %vm3331_vm7 = vcmp.lt.s32.totalorder %v3654_v49, 0  ;;  %vm6155_vm13 = vcmp.ge.s32.totalorder %v3669_v54, 0 }
  0xb7   : > { %vm258_vm9 = vcmp.ne.s32.totalorder %v246_v21, 0 }
  0xb8   : > { %vm266_vm15 = vmand %vm226_vm11, %vm258_vm9  ;;  %vm3321_vm11 = vcmp.lt.s32.totalorder %v3602_v36, 0  ;;  %vm6154_vm9 = vcmp.lt.s32.totalorder %v3669_v54, 7 }
  0xb9   : > { %v282_v30 = vsel %vm266_vm15, 1, %v5982_v19  ;;  %v3800_v32 = vsel %vm3321_vm11, %v3322_v2, %v3323_v3  ;;  %vm189_vm15 = vmand %vm6155_vm13, %vm6154_vm9  ;;  %vm271_vm9 = vcmp.gt.f32.partialorder %v3503_v5, 0.5  ;;  %v602_v5 = vmul.f32 0.14285715, %v156_v41 }
  0xba   : > { %293 = vrot.lane.b32.xlu1 %v282_v30, %s3467_s13  ;;  %v3325_v30 = vcvt.f32.s32 %v3800_v32  ;;  %v601_v41 = vmul.f32 0.14285715, %v155_v33 }
  0xbc   : > { %v248_v38 = vpop.permute.xlu1 %247  ;;  %v348_v40 = vpop.permute.xlu2 %347  ;;  %v324_v54 = vmul.u32 49, %v3325_v30 }
  0xbd   : > { %vm259_vm14 = vcmp.ne.s32.totalorder %v248_v38, 0 }
  0xbe   : > { %vm267_vm1 = vmand %vm227_vm4, %vm259_vm14  ;;  %v364_v43 = vpop.permute.xlu0 %363  ;;  %vm3326_vm4 = vcmp.lt.s32.totalorder %v3639_v46, 0 }
  0xbf   : > { %v377_v45 = vadd.s32 %v364_v43, %v353_v37  ;;  %v283_v47 = vsel %vm267_vm1, 1, %v5982_v19  ;;  %v3328_v37 = vfloor.f32 %v3639_v46 }
  0xc0   : > { %295 = vrot.lane.b32.xlu0 %v283_v47, %s3467_s13 }
  0xc1   : > { %387 = vrot.lane.b32.xlu2 %v377_v45, %s3469_s14  ;;  %v3334_v45 = vsel %vm3331_vm7, %v3332_v24, %v3333_v28  ;;  %v3819_v47 = vsel %vm3326_vm4, %v3327_v34, %v3328_v37  ;;  %v603_v37 = vmul.f32 0.14285715, %v157_v50  ;;  %v5976_v50 = vmov 1  }
  0xc2   : > { %v3330_v57 = vcvt.f32.s32 %v3819_v47  ;;  %v6184_v47 = vmov 2  }
  0xc4   : > { %v366_v56 = vpop.permute.xlu1 %365 }
  0xc5   : > { %v378_v58 = vadd.s32 %v366_v56, %v354_v52 }
  0xc6   : > { %v344_v59 = vpop.permute.xlu0 %343 }
  0xc7   : > { %v355_v62 = vadd.s32 %v344_v59, %v323_v44  ;;  %389 = vrot.lane.b32.xlu1 %v378_v58, %s3469_s14  ;;  %v3335_v44 = vcvt.f32.s32 %v3334_v45  ;;  %v604_v45 = vmul.f32 0.14285715, %v158_v55  ;;  %v3863_v55 = vsub.f32 %v3602_v36, %v602_v5 }
  0xc9   : > { %v379_v1 = vadd.s32 %v368_v60, %v355_v62  ;;  %297 = vrot.lane.b32.xlu2 %v284_v61, %s3467_s13  ;;  %v326_v59 = vmul.u32 49, %v3335_v44  ;;  %v350_v61 = vpop.permute.xlu2 %349  ;;  %v325_v62 = vmul.u32 49, %v3330_v57  ;;  %v612_v48 = vsub.f32 %v3654_v49, %v604_v45 }
  0xcb   : > { %391 = vrot.lane.b32.xlu0 %v379_v1, %s3469_s14  ;;  %v358_v3 = vadd.s32 %v350_v61, %v326_v59  ;;  %v6162_v61 = vmov 0 }
  0xcc   : > { %v346_v4 = vpop.permute.xlu1 %345 }
  0xcd   : > { %v356_v56 = vadd.s32 %v346_v4, %v324_v54  ;;  %v357_v4 = vadd.s32 %v348_v40, %v325_v62  ;;  %v611_v40 = vsub.f32 %v3639_v46, %v603_v37  ;;  %v597_v54 = vmul.f32 0.14285715, %v6189_v11 }
  0xce   : > { %v212_v21 = vpop.permute.xlu0 %211 }
  0xcf   : > { %vm221_vm12 = vcmp.ne.s32.totalorder %v212_v21, 0 }
  0xd0   : > { %vm229_vm0 = vmand %vm189_vm15, %vm221_vm12  ;;  %vm276_vm12 = vcmp.gt.f32.partialorder %v3602_v36, 0.5 }
  0xd1   : > { %v3833_v34 = vpop.permute.xlu2 %654 }
  0xd4   : > { %v214_v38 = vpop.permute.xlu1 %213 }
  0xd5   : > { %vm222_vm1 = vcmp.ne.s32.totalorder %v214_v38, 0 }
  0xd6   : > { %v252_v43 = vpop.permute.xlu0 %251  ;;  %vm230_vm6 = vmand %vm190_vm5, %vm222_vm1  ;;  %vm275_vm1 = vcmp.gt.f32.partialorder %v3573_v26, 0.5 }
  0xd7   : > { %vm261_vm14 = vcmp.ne.s32.totalorder %v252_v43, 0 }
  0xd8   : > { %vm269_vm3 = vmand %vm229_vm0, %vm261_vm14 }
  0xd9   : > { %v285_v52 = vsel %vm269_vm3, 1, %v5982_v19 }
  0xda   : > { %299 = vrot.lane.b32.xlu1 %v285_v52, %s3467_s13 }
  0xdc   : > { %v254_v58 = vpop.permute.xlu1 %253 }
  0xdd   : > { %vm262_vm2 = vcmp.ne.s32.totalorder %v254_v58, 0 }
  0xde   : > { %vm270_vm11 = vmand %vm230_vm6, %vm262_vm2  ;;  %v370_v60 = vpop.permute.xlu0 %369  ;;  %vm278_vm6 = vcmp.gt.f32.partialorder %v3654_v49, 0.5 }
  0xdf   : > { %v380_v1 = vadd.s32 %v370_v60, %v356_v56  ;;  %v286_v2 = vsel %vm270_vm11, 1, %v5982_v19  ;;  %v407_v60 = vlaneseq }
  0xe0   : > { %301 = vrot.lane.b32.xlu0 %v286_v2, %s3467_s13 }
  0xe1   : > { %393 = vrot.lane.b32.xlu2 %v380_v1, %s3469_s14  ;;  %v3906_v2 = vand.u32 127, %v407_v60 }
  0xe3   : > { %vm593_vm0 = vcmp.lt.s32.totalorder %v3906_v2, 5 }
  0xe4   : > { %v374_v21 = vpop.permute.xlu1 %373 }
  0xe5   : > { %v382_v24 = vadd.s32 %v374_v21, %v358_v3 }
  0xe6   : > { %v372_v28 = vpop.permute.xlu0 %371 }
  0xe7   : > { %v381_v38 = vadd.s32 %v372_v28, %v357_v4 }
  0xe8   : > { %694 = vperm.xlu0 %3417, %v3654_v49  }
  0xe9   : > { %395 = vrot.lane.b32.xlu1 %v381_v38, %s3469_s14  ;;  %397 = vrot.lane.b32.xlu2 %v382_v24, %s3469_s14  ;;  %v3911_v24 = vsel %vm593_vm0, 0, %v5976_v50  ;;  %vm274_vm0 = vcmp.gt.f32.partialorder %v3559_v23, 0.5 }
  0xea   : > { %v595_v37 = vmul.u32 5, %v3911_v24 }
  0xec   : > { %v3922_v45 = vsub.s32 %v3906_v2, %v595_v37  ;;  %v6172_v37 = vmov 0 }
  0xf0   : > { %690 = vperm.xlu0 %3417, %v3639_v46  }
  0xf1   : > { %842 = vperm.xlu1 %3418, %v3335_v44   ;;  %644 = vperm.xlu2 %3416, %v3602_v36  }
  0xf8   : > { %686 = vperm.xlu0 %3417, %v3602_v36  }
  0xf9   : > { %3419 = vset.pattern.permute.xlu1 %v3471_v0  ;;  %3423 = vset.pattern.permute.xlu2 %v5982_v19 }
  0xfa   : > { %649 = vperm.xlu1 %3419, %v3639_v46   ;;  %v288_v43 = vpop.permute.xlu2 %287  ;;  %778 = vperm.xlu2 %3423, %v611_v40  }
  0xfb   : > { %vm303_vm7 = vcmp.ne.s32.totalorder %v288_v43, 0 }
  0xfc   : > { %vm3849_vm13 = vmand %vm271_vm9, %vm303_vm7  ;;  %vm5989_vm7 = vcmp.eq.s32.totalorder %v3922_v45, 3 }
 0x100   : > { %3422 = vset.pattern.permute.xlu0 %v5976_v50 }
 0x101   : > { %737 = vperm.xlu0 %3422, %v611_v40  }
 0x102   : > { %3420 = vset.pattern.permute.xlu1 %v5976_v50  ;;  %v384_v52 = vpop.permute.xlu2 %383  ;;  %3424 = vset.pattern.permute.xlu2 %v3473_v17 }
 0x103   : > { %v3856_v53 = vsel %vm3849_vm13, %v384_v52, 4294967295  ;;  %742 = vperm.xlu1 %3420, %v612_v48   ;;  %836 = vperm.xlu2 %3424, %v3325_v30   ;;  %v3880_v30 = vsub.f32 %v3573_v26, %v601_v41 }
 0x109   : > { %727 = vperm.xlu0 %3422, %v3880_v30  }
 0x10b   : > { %3421 = vset.pattern.permute.xlu1 %v5982_v19  ;;  %3425 = vset.pattern.permute.xlu2 %v5976_v50 }
 0x10c   : > { %782 = vperm.xlu1 %3421, %v612_v48   ;;  %732 = vperm.xlu2 %3425, %v3863_v55  }
 0x111   : > { %3429 = vset.pattern.permute.xlu0 %v5984_v39 }
 0x114   : > { %3426 = vset.pattern.permute.xlu2 %v5980_v18  ;;  %3428 = vset.pattern.permute.xlu1 %v3471_v0 }
 0x115   : > { %682 = vperm.xlu2 %3426, %v3573_v26   ;;  %634 = vperm.xlu1 %3428, %v3559_v23  }
 0x11a   : > { %v3883_v44 = vpop.permute.xlu0 %289 }
 0x11b   : > { %v388_v32 = vpop.permute.xlu2 %387 }
 0x11d   : > { %3427 = vset.pattern.permute.xlu2 %v3473_v17  ;;  %3430 = vset.pattern.permute.xlu1 %v5984_v39 }
 0x11e   : > { %833 = vperm.xlu2 %3427, %v3320_v51  }
 0x122   : > { %v3886_v58 = vpop.permute.xlu0 %385  ;;  %v292_v35 = vpop.permute.xlu1 %291 }
 0x123   : > { %v298_v56 = vpop.permute.xlu2 %297  ;;  %vm305_vm10 = vcmp.ne.s32.totalorder %v292_v35, 0 }
 0x124   : > { %vm308_vm15 = vcmp.ne.s32.totalorder %v298_v56, 0  ;;  %vm3899_vm5 = vmand %vm273_vm8, %vm305_vm10  ;;  %v664_v56 = vsel %vm5989_vm7, %v3833_v34, 1.0 }
 0x125   : > { %vm3889_vm4 = vmand %vm276_vm12, %vm308_vm15  ;;  %v6163_v61 = vsel %vm3899_vm5, 4294967295, %v6162_v61  ;;  %v401_v1 = vsel %vm3899_vm5, %v388_v32, 4294967295  ;;  %vm5988_vm15 = vcmp.eq.s32.totalorder %v3922_v45, 2  ;;  %vm277_vm12 = vcmp.gt.f32.partialorder %v3639_v46, 0.5 }
 0x126   : > { %3431 = vset.pattern.permute.xlu2 %v5984_v39  ;;  %v428_v21 = vcvt.s32.f32 %v401_v1  ;;  %vm6174_vm5 = vcmask 523264  }
 0x12c   : > { %v294_v36 = vpop.permute.xlu1 %293 }
 0x12d   : > { %vm306_vm10 = vcmp.ne.s32.totalorder %v294_v36, 0 }
 0x132   : > { %v296_v59 = vpop.permute.xlu0 %295 }
 0x133   : > { %vm307_vm14 = vcmp.ne.s32.totalorder %v296_v59, 0 }
 0x134   : > { %vm3913_vm3 = vmand %vm275_vm1, %vm307_vm14  ;;  %vm304_vm14 = vcmp.ne.s32.totalorder %v3883_v44, 0  ;;  %vm272_vm1 = vcmp.gt.f32.partialorder %v3506_v7, 0.5 }
 0x139   : > { %v390_v4 = vpop.permute.xlu1 %389 }
 0x13b   : > { %v394_v33 = vpop.permute.xlu2 %393 }
 0x13c   : > { %v3895_v51 = vsel %vm3889_vm4, %v394_v33, 4294967295 }
 0x13d   : > { %521 = vperm.xlu2 %3431, %v3895_v51   ;;  %v392_v3 = vpop.permute.xlu0 %391  ;;  %v431_v25 = vcvt.s32.f32 %v3895_v51 }
 0x13e   : > { %v403_v40 = vsel %vm3913_vm3, %v392_v3, 4294967295  ;;  %v6170_v3 = vmov 0 }
 0x13f   : > { %v430_v48 = vcvt.s32.f32 %v403_v40 }
 0x143   : > { %v398_v62 = vpop.permute.xlu2 %397 }
 0x145   : > { %512 = vperm.xlu2 %3431, %v401_v1  }
 0x14b   : > { %v645_v38 = vpop.permute.xlu2 %644 }
 0x14c   : > { %v300_v52 = vpop.permute.xlu1 %299 }
 0x14d   : > { %446 = vperm.xlu2 %3431, %v428_v21   ;;  %vm309_vm9 = vcmp.ne.s32.totalorder %v300_v52, 0  ;;  %v426_v52 = vcvt.s32.f32 %v3856_v53 }
 0x14e   : > { %vm3940_vm8 = vmand %vm277_vm12, %vm309_vm9  ;;  %vm5987_vm9 = vcmp.eq.s32.totalorder %v3922_v45, 1  ;;  %vm5986_vm12 = vcmp.eq.s32.totalorder %v3922_v45, 0 }
 0x14f   : > { %v914_v63 = vsel %vm3940_vm8, 1, %v5982_v19 }
 0x152   : > { %v302_v43 = vpop.permute.xlu0 %301 }
 0x153   : > { %vm310_vm2 = vcmp.ne.s32.totalorder %v302_v43, 0 }
 0x154   : > { %vm3924_vm11 = vmand %vm278_vm6, %vm310_vm2  ;;  %v3930_v32 = vpop.permute.xlu2 %778 }
 0x155   : > { %456 = vperm.xlu2 %3431, %v430_v48   ;;  %v406_v41 = vsel %vm3924_vm11, %v398_v62, 4294967295  ;;  %vm3951_vm6 = vmand %vm274_vm0, %vm306_vm10  ;;  %vm5990_vm10 = vcmask 523264  }
 0x156   : > { %527 = vperm.xlu0 %3429, %v406_v41   ;;  %v433_v49 = vcvt.s32.f32 %v406_v41  ;;  %v6171_v3 = vsel %vm3951_vm6, 4294967295, %v6170_v3  ;;  %vm3957_vm2 = vmand %vm272_vm1, %vm304_vm14  ;;  %v402_v36 = vsel %vm3951_vm6, %v390_v4, 4294967295  ;;  %v600_v4 = vmul.f32 0.14285715, %v154_v27 }
 0x157   : > { %v6173_v37 = vsel %vm3957_vm2, 4294967295, %v6172_v37  ;;  %v400_v44 = vsel %vm3957_vm2, %v3886_v58, 4294967295  ;;  %v915_v27 = vsel %vm3924_vm11, 1, %v5982_v19  ;;  %v429_v5 = vcvt.s32.f32 %v402_v36 }
 0x15a   : > { %v695_v35 = vpop.permute.xlu0 %694 }
 0x15b   : > { %v704_v33 = vsel %vm5988_vm15, %v695_v35, %v664_v56  ;;  %v396_v62 = vpop.permute.xlu1 %395 }
 0x15c   : > { %v405_v1 = vsel %vm3940_vm8, %v396_v62, 4294967295 }
 0x15d   : > { %524 = vperm.xlu1 %3430, %v405_v1   ;;  %471 = vperm.xlu2 %3431, %v433_v49   ;;  %v3946_v46 = vpop.permute.xlu2 %836 }
 0x15e   : > { %518 = vperm.xlu0 %3429, %v403_v40   ;;  %v662_v40 = vsel %vm5989_vm7, %v645_v38, 1.0  ;;  %v608_v38 = vsub.f32 %v3559_v23, %v600_v4  ;;  %v4051_v4 = vshrl.u32 %v407_v60, 7 }
 0x160   : > { %v4067_v60 = vadd.s32 24, %v4051_v4  ;;  %vm418_vm8 = vcmp.eq.s32.totalorder %v4051_v4, %v3906_v2 }
 0x162   : > { %v691_v34 = vpop.permute.xlu0 %690  ;;  %vm421_vm14 = vcmp.eq.s32.totalorder %v4067_v60, %v3906_v2 }
 0x163   : > { %v3955_v21 = vpop.permute.xlu1 %842 }
 0x165   : > { %515 = vperm.xlu1 %3430, %v402_v36   ;;  %3435 = vset.pattern.permute.xlu2 %v5976_v50 }
 0x166   : > { %509 = vperm.xlu0 %3429, %v400_v44   ;;  %v733_v7 = vpop.permute.xlu2 %732  ;;  %722 = vperm.xlu2 %3435, %v608_v38  }
 0x16a   : > { %v687_v43 = vpop.permute.xlu0 %686 }
 0x16b   : > { %v702_v48 = vsel %vm5988_vm15, %v687_v43, %v662_v40 }
 0x16c   : > { %v3977_v58 = vsel %vm5987_vm9, %v733_v7, %v702_v48  ;;  %v650_v41 = vpop.permute.xlu1 %649 }
 0x16d   : > { %v663_v49 = vsel %vm5989_vm7, %v650_v41, 1.0  ;;  %506 = vperm.xlu1 %3430, %v3856_v53   ;;  %v427_v53 = vcvt.s32.f32 %v400_v44 }
 0x16e   : > { %v703_v56 = vsel %vm5988_vm15, %v691_v34, %v663_v49  ;;  %436 = vperm.xlu0 %3429, %v426_v52   ;;  %3436 = vset.pattern.permute.xlu2 %v5980_v18  ;;  %v4054_v52 = vadd.s32 8, %v4051_v4 }
 0x16f   : > { %674 = vperm.xlu2 %3436, %v3509_v8  }
 0x170   : > { %vm419_vm11 = vcmp.eq.s32.totalorder %v4054_v52, %v3906_v2 }
 0x175   : > { %v743_v35 = vpop.permute.xlu1 %742  ;;  %938 = vperm.xlu1 %3430, %v915_v27  }
 0x176   : > { %v752_v62 = vsel %vm5987_vm9, %v743_v35, %v704_v33  ;;  %461 = vperm.xlu0 %3429, %v431_v25   ;;  %v738_v33 = vpop.permute.xlu0 %737 }
 0x177   : > { %3438 = vset.pattern.permute.xlu2 %v3473_v17  ;;  %v751_v44 = vsel %vm5987_vm9, %v738_v33, %v703_v56  ;;  %v4064_v56 = vadd.s32 16, %v4051_v4 }
 0x178   : > { %827 = vperm.xlu2 %3438, %v3310_v6   ;;  %v4010_v7 = vsel %vm5986_vm12, %v3930_v32, %v751_v44  ;;  %v432_v6 = vcvt.s32.f32 %v405_v1 }
 0x179   : > { %vm420_vm0 = vcmp.eq.s32.totalorder %v4064_v56, %v3906_v2 }
 0x17d   : > { %441 = vperm.xlu1 %3430, %v427_v53   ;;  %v4077_v53 = vadd.s32 32, %v4051_v4 }
 0x17e   : > { %v783_v34 = vpop.permute.xlu1 %782  ;;  %3432 = vset.pattern.permute.xlu0 %v5982_v19 }
 0x17f   : > { %v3997_v51 = vsel %vm5986_vm12, %v783_v34, %v752_v62  ;;  %774 = vperm.xlu0 %3432, %v3863_v55   ;;  %v4024_v55 = vpop.permute.xlu0 %727  ;;  %vm422_vm1 = vcmp.eq.s32.totalorder %v4077_v53, %v3906_v2  ;;  %vm541_vm6 = vcmp.lt.s32.totalorder %v3906_v2, %v4077_v53 }
 0x180   : > { %3440 = vset.pattern.permute.xlu2 %v5976_v50 }
 0x185   : > { %451 = vperm.xlu1 %3430, %v429_v5  }
 0x187   : > { %770 = vperm.xlu0 %3432, %v3880_v30   ;;  %v4026_v30 = vpop.permute.xlu1 %634 }
 0x18d   : > { %935 = vperm.xlu1 %3430, %v914_v63   ;;  %v4081_v63 = vadd.s32 40, %v4051_v4 }
 0x18f   : > { %766 = vperm.xlu0 %3432, %v608_v38  }
 0x195   : > { %466 = vperm.xlu1 %3430, %v432_v6  }
 0x197   : > { %3437 = vset.pattern.permute.xlu0 %v3471_v0 }
 0x198   : > { %639 = vperm.xlu0 %3437, %v3573_v26   ;;  %v4030_v26 = vpop.permute.xlu2 %682 }
 0x19d   : > { %3433 = vset.pattern.permute.xlu1 %v5980_v18  ;;  %v660_v18 = vsel %vm5989_vm7, %v4026_v30, 1.0 }
 0x19e   : > { %678 = vperm.xlu1 %3433, %v3559_v23  }
 0x1a0   : > { %629 = vperm.xlu0 %3437, %v3509_v8   ;;  %v4036_v8 = vpop.permute.xlu2 %833 }
 0x1a6   : > { %3434 = vset.pattern.permute.xlu1 %v3473_v17 }
 0x1a7   : > { %830 = vperm.xlu1 %3434, %v3315_v29  }
 0x1a8   : > { %v4042_v29 = vpop.permute.xlu2 %521 }
 0x1af   : > { %3439 = vset.pattern.permute.xlu1 %v3471_v0 }
 0x1b0   : > { %v4048_v48 = vpop.permute.xlu2 %512 }
 0x1b8   : > { %v447_v25 = vpop.permute.xlu2 %446 }
 0x1b9   : > { %v476_v5 = vsel %vm420_vm0, %v447_v25, 0.0  ;;  %v4090_v25 = vadd.s32 56, %v4051_v4 }
 0x1ba   : > { %v486_v6 = vsel %vm5990_vm10, %v476_v5, 0.0 }
 0x1c8   : > { %v4028_v32 = vpop.permute.xlu0 %527 }
 0x1cf   : > { %v4032_v59 = vpop.permute.xlu1 %524 }
 0x1d0   : > { %v4034_v23 = vpop.permute.xlu0 %518 }
 0x1d7   : > { %v4038_v1 = vpop.permute.xlu1 %515 }
 0x1d8   : > { %v4040_v9 = vpop.permute.xlu0 %509 }
 0x1df   : > { %v4044_v0 = vpop.permute.xlu1 %506 }
 0x1e0   : > { %v437_v36 = vpop.permute.xlu0 %436 }
 0x1e1   : > { %v474_v35 = vsel %vm418_vm8, %v437_v36, 0.0  ;;  %v457_v36 = vpop.permute.xlu2 %456  ;;  %vm425_vm8 = vcmp.eq.s32.totalorder %v4090_v25, %v3906_v2 }
 0x1e2   : > { %v483_v34 = vsel %vm5990_vm10, %v474_v35, 0.0  ;;  %v478_v13 = vsel %vm422_vm1, %v457_v36, 0.0  ;;  %v4093_v35 = vadd.s32 48, %v4051_v4  ;;  %vm542_vm1 = vcmp.lt.s32.totalorder %v3906_v2, %v4081_v63 }
 0x1e4   : > { %vm424_vm0 = vcmp.eq.s32.totalorder %v4093_v35, %v3906_v2 }
 0x1e7   : > { %v4046_v40 = vpop.permute.xlu1 %938 }
 0x1e8   : > { %v462_v43 = vpop.permute.xlu0 %461 }
 0x1e9   : > { %v472_v5 = vpop.permute.xlu2 %471 }
 0x1ef   : > { %v442_v41 = vpop.permute.xlu1 %441 }
 0x1f0   : > { %v475_v27 = vsel %vm419_vm11, %v442_v41, 0.0  ;;  %vm423_vm11 = vcmp.eq.s32.totalorder %v4081_v63, %v3906_v2 }
 0x1f1   : > { %v775_v49 = vpop.permute.xlu0 %774  ;;  %v484_v62 = vsel %vm5990_vm10, %v475_v27, 0.0  ;;  %v723_v42 = vpop.permute.xlu2 %722 }
 0x1f2   : > { %v4061_v38 = vsel %vm5986_vm12, %v775_v49, %v3977_v58  ;;  %v485_v33 = vadd.f32 %v484_v62, %v483_v34  ;;  %v490_v62 = vsel %vm5990_vm10, %v478_v13, 0.0 }
 0x1f4   : > { %v487_v49 = vadd.f32 %v486_v6, %v485_v33  ;;  %v481_v6 = vsel %vm425_vm8, %v472_v5, 0.0  ;;  %vm543_vm8 = vcmp.lt.s32.totalorder %v3906_v2, %v4093_v35 }
 0x1f7   : > { %v452_v58 = vpop.permute.xlu1 %451 }
 0x1f8   : > { %v477_v44 = vsel %vm421_vm14, %v452_v58, 0.0  ;;  %v479_v58 = vsel %vm423_vm11, %v462_v43, 0.0 }
 0x1f9   : > { %v488_v41 = vsel %vm5990_vm10, %v477_v44, 0.0  ;;  %v492_v33 = vsel %vm5990_vm10, %v479_v58, 0.0  ;;  %v4103_v36 = vpop.permute.xlu0 %770  ;;  %v4213_v10 = vpop.permute.xlu2 %674 }
 0x1fa   : > { %v489_v50 = vadd.f32 %v488_v41, %v487_v49 }
 0x1fc   : > { %v491_v34 = vadd.f32 %v490_v62, %v489_v50  ;;  %v496_v50 = vsel %vm5990_vm10, %v481_v6, 0.0 }
 0x1fe   : > { %v493_v49 = vadd.f32 %v492_v33, %v491_v34 }
 0x1ff   : > { %v4087_v27 = vpop.permute.xlu1 %935 }
 0x201   : > { %v767_v39 = vpop.permute.xlu0 %766 }
 0x207   : > { %v467_v44 = vpop.permute.xlu1 %466 }
 0x208   : > { %v480_v41 = vsel %vm424_vm0, %v467_v44, 0.0 }
 0x209   : > { %v494_v14 = vsel %vm5990_vm10, %v480_v41, 0.0 }
 0x20a   : > { %v495_v13 = vadd.f32 %v494_v14, %v493_v49 }
 0x20c   : > { %v497_v43 = vadd.f32 %v496_v50, %v495_v13 }
 0x20e   : > { %v498_v62 = vrot.slane %v497_v43, 4 }
 0x210   : > { %v499_v19 = vadd.f32 %v498_v62, %v497_v43  ;;  %v679_v58 = vpop.permute.xlu1 %678 }
 0x211   : > { %v700_v5 = vsel %vm5988_vm15, %v679_v58, %v660_v18  ;;  %vm540_vm15 = vcmp.lt.s32.totalorder %v3906_v2, %v4067_v60 }
 0x212   : > { %v500_v44 = vrot.slane %v499_v19, 2  ;;  %v748_v34 = vsel %vm5987_vm9, %v723_v42, %v700_v5 }
 0x213   : > { %v4116_v14 = vsel %vm5986_vm12, %v767_v39, %v748_v34  ;;  %vm544_vm12 = vcmp.lt.s32.totalorder %v3906_v2, %v4090_v25  ;;  %v3455_v34 = vld [vmem:[%s3500_s12] sm:$0xff] }
 0x214   : > { %v501_v33 = vadd.f32 %v500_v44, %v499_v19  ;;  %v6054_v19 = vmov 0.0   ;;  %v605_v28 = vsub.f32 %v3455_v34, %v597_v54 }
 0x216   : > { %v502_v6 = vrot.slane %v501_v33, 1 }
 0x218   : > { %v503_v41 = vadd.f32 %v502_v6, %v501_v33  ;;  %v3456_v6 = vld [vmem:[%s3500_s12 + $0x10] sm:$0xff] }
 0x21a   : > { %vm3352_vm14 = vcmp.lt.s32.totalorder %v503_v41, 0  ;;  %v3353_v49 = vceil.f32 %v503_v41  ;;  %v3354_v30 = vfloor.f32 %v503_v41 }
 0x21c   : > { %v3355_v13 = vsel %vm3352_vm14, %v3353_v49, %v3354_v30  ;;  %v6182_v49 = vmov 5   ;;  %v6183_v30 = vmov 0  }
 0x21d   : > { %v4118_v50 = vcvt.f32.s32 %v3355_v13  ;;  %v913_v13 = vsel %vm3889_vm4, 1, %v6183_v30  ;;  %v912_v12 = vsel %vm3913_vm3, 1, %v6183_v30  ;;  %vm6187_vm4 = vnez %v6171_v3 }
 0x21e   : > { %vm6191_vm3 = vnez %v6173_v37 }
 0x21f   : > { %vm534_vm11 = vcmp.eq.s32.totalorder %v4042_v29, %v4118_v50  ;;  %vm535_vm0 = vcmp.eq.s32.totalorder %v4032_v59, %v4118_v50  ;;  %vm536_vm14 = vcmp.eq.s32.totalorder %v4028_v32, %v4118_v50  ;;  %vm532_vm7 = vcmp.eq.s32.totalorder %v4038_v1, %v4118_v50 }
 0x220   : > { %vm550_vm9 = vmand %vm534_vm11, %vm542_vm1  ;;  %vm533_vm1 = vcmp.eq.s32.totalorder %v4034_v23, %v4118_v50 }
 0x221   : > { %vm551_vm10 = vmand %vm535_vm0, %vm543_vm8  ;;  %v558_v42 = vsel %vm550_vm9, 1.0, %v6054_v19 }
 0x222   : > { %vm552_vm2 = vmand %vm536_vm14, %vm544_vm12  ;;  %v559_v18 = vsel %vm551_vm10, 1.0, %v6054_v19  ;;  %v576_v39 = vsel %vm6174_vm5, %v558_v42, 0.0  ;;  %vm531_vm12 = vcmp.eq.s32.totalorder %v4048_v48, %v4118_v50  ;;  %v3457_v42 = vld [vmem:[%s3500_s12 + $0x8] sm:$0xff] }
 0x223   : > { %v560_v32 = vsel %vm552_vm2, 1.0, %v6054_v19  ;;  %vm6175_vm11 = vmmov %vm6174_vm5  ;;  %577 = vadd.xlane.f32.xlu1 %v576_v39  ;;  %v4215_v39 = vpop.permute.xlu1 %830 }
 0x224   : > { %v579_v59 = vsel %vm6175_vm11, %v559_v18, 0.0  ;;  %vm548_vm8 = vmand %vm532_vm7, %vm540_vm15  ;;  %vm538_vm7 = vcmp.lt.s32.totalorder %v3906_v2, %v4054_v52  ;;  %vm530_vm15 = vcmp.eq.s32.totalorder %v4040_v9, %v4118_v50  ;;  %vm529_vm11 = vcmp.eq.s32.totalorder %v4044_v0, %v4118_v50 }
 0x225   : > { %vm6176_vm0 = vmmov %vm6174_vm5  ;;  %580 = vadd.xlane.f32.xlu0 %v579_v59  ;;  %v556_v29 = vsel %vm548_vm8, 1.0, %v6054_v19  ;;  %vm539_vm5 = vcmp.lt.s32.totalorder %v3906_v2, %v4064_v56  ;;  %v599_v0 = vmul.f32 0.14285715, %v153_v15  ;;  %v6185_v15 = vcvt.f32.s32 %v3730_v16 }
 0x226   : > { %v582_v1 = vsel %vm6176_vm0, %v560_v32, 0.0  ;;  %vm549_vm9 = vmand %vm533_vm1, %vm541_vm6  ;;  %vm537_vm1 = vcmp.lt.s32.totalorder %v3906_v2, %v4051_v4  ;;  %v6188_v16 = vmov 1   ;;  %v909_v18 = vsel %vm6191_vm3, 1, %v6183_v30  ;;  %v4217_v32 = vpop.permute.xlu2 %827 }
 0x227   : > { %583 = vadd.xlane.f32.xlu2 %v582_v1  ;;  %v557_v23 = vsel %vm549_vm9, 1.0, %v6054_v19  ;;  %vm6177_vm2 = vmmov %vm6176_vm0  ;;  %v607_v41 = vsub.f32 %v3456_v6, %v599_v0  ;;  %v4220_v59 = vadd.s32 4294967286, %v3906_v2 }
 0x228   : > { %v570_v43 = vsel %vm6177_vm2, %v556_v29, 0.0  ;;  %vm547_vm6 = vmand %vm531_vm12, %vm539_vm5 }
 0x229   : > { %vm6178_vm10 = vmmov %vm6176_vm0  ;;  %v555_v58 = vsel %vm547_vm6, 1.0, %v6054_v19  ;;  %vm818_vm6 = vcmp.ge.s32.totalorder %v3906_v2, 10 }
 0x22a   : > { %v573_v62 = vsel %vm6178_vm10, %v557_v23, 0.0  ;;  %vm546_vm14 = vmand %vm530_vm15, %vm538_vm7  ;;  %vm793_vm15 = vcmp.lt.s32.totalorder %v3906_v2, 10  ;;  %vm851_vm10 = vcmp.eq.s32.totalorder %v3955_v21, %v4220_v59 }
 0x22b   : > { %571 = vadd.xlane.f32.xlu1 %v570_v43  ;;  %v554_v48 = vsel %vm546_vm14, 1.0, %v6054_v19  ;;  %vm6179_vm8 = vmmov %vm6176_vm0 }
 0x22c   : > { %v567_v9 = vsel %vm6179_vm8, %v555_v58, 0.0  ;;  %vm545_vm0 = vmand %vm529_vm11, %vm537_vm1 }
 0x22d   : > { %vm6180_vm9 = vmmov %vm6177_vm2  ;;  %v553_v44 = vsel %vm545_vm0, 1.0, %v6054_v19 }
 0x22e   : > { %v564_v5 = vsel %vm6180_vm9, %v554_v48, 0.0  ;;  %vm6181_vm5 = vmmov %vm6177_vm2  ;;  %vm849_vm2 = vcmp.eq.s32.totalorder %v3946_v46, %v4220_v59 }
 0x22f   : > { %574 = vadd.xlane.f32.xlu2 %v573_v62  ;;  %v561_v33 = vsel %vm6181_vm5, %v553_v44, 0.0  ;;  %vm4232_vm14 = vmand %vm818_vm6, %vm849_vm2 }
 0x230   : > { %vm859_vm8 = vmand %vm818_vm6, %vm851_vm10  ;;  %vm6197_vm10 = vcmp.eq.s32.totalorder %v3922_v45, 2 }
 0x233   : > { %568 = vadd.xlane.f32.xlu1 %v567_v9 }
 0x237   : > { %565 = vadd.xlane.f32.xlu2 %v564_v5 }
 0x239   : > { %619 = vperm.xlu0 %3437, %v3455_v34  }
 0x23b   : > { %562 = vadd.xlane.f32.xlu1 %v561_v33 }
 0x241   : > { %3444 = vset.pattern.permute.xlu0 %v3473_v17 }
 0x242   : > { %839 = vperm.xlu0 %3444, %v3330_v57   ;;  %v908_v57 = vsel %vm3849_vm13, 1, %v6183_v30  ;;  %vm6190_vm13 = vnez %v6163_v61  ;;  %v640_v61 = vpop.permute.xlu0 %639 }
 0x243   : > { %v910_v3 = vsel %vm6190_vm13, 1, %v6183_v30  ;;  %vm6196_vm13 = vcmp.eq.s32.totalorder %v3922_v45, 3 }
 0x244   : > { %v661_v21 = vsel %vm6196_vm13, %v640_v61, 1.0 }
 0x24a   : > { %821 = vperm.xlu0 %3444, %v3300_v22   ;;  %v598_v22 = vmul.f32 0.14285715, %v6186_v20  ;;  %v4224_v48 = vpop.permute.xlu0 %629 }
 0x24c   : > { %v606_v31 = vsub.f32 %v3457_v42, %v598_v22 }
 0x24f   : > { %717 = vperm.xlu2 %3440, %v607_v41  }
 0x252   : > { %3449 = vset.pattern.permute.xlu0 %v6182_v49 }
 0x253   : > { %932 = vperm.xlu0 %3449, %v913_v13  }
 0x254   : > { %624 = vperm.xlu1 %3439, %v3457_v42  }
 0x257   : > { %3441 = vset.pattern.permute.xlu2 %v6184_v47 }
 0x258   : > { %670 = vperm.xlu2 %3441, %v3457_v42  }
 0x25b   : > { %929 = vperm.xlu0 %3449, %v912_v12  }
 0x25c   : > { %3443 = vset.pattern.permute.xlu1 %v3473_v17  ;;  %v911_v17 = vsel %vm6187_vm4, 1, %v6183_v30 }
 0x25d   : > { %824 = vperm.xlu1 %3443, %v6185_v15  }
 0x260   : > { %3442 = vset.pattern.permute.xlu2 %v6183_v30 }
 0x261   : > { %762 = vperm.xlu2 %3442, %v607_v41  }
 0x263   : > { %917 = vperm.xlu0 %3449, %v908_v57  }
 0x265   : > { %3446 = vset.pattern.permute.xlu1 %v6182_v49 }
 0x266   : > { %926 = vperm.xlu1 %3446, %v911_v17  }
 0x269   : > { %3445 = vset.pattern.permute.xlu2 %v6188_v16 }
 0x26a   : > { %712 = vperm.xlu2 %3445, %v606_v31  }
 0x26e   : > { %3448 = vset.pattern.permute.xlu1 %v6183_v30 }
 0x26f   : > { %758 = vperm.xlu1 %3448, %v606_v31  }
 0x272   : > { %3447 = vset.pattern.permute.xlu2 %v6184_v47 }
 0x273   : > { %666 = vperm.xlu2 %3447, %v3455_v34  }
 0x277   : > { %3451 = vset.pattern.permute.xlu1 %v6182_v49 }
 0x278   : > { %923 = vperm.xlu1 %3451, %v910_v3  }
 0x27b   : > { %3450 = vset.pattern.permute.xlu2 %v6188_v16 }
 0x27c   : > { %707 = vperm.xlu2 %3450, %v605_v28  }
 0x280   : > { %920 = vperm.xlu1 %3451, %v909_v18  }
 0x284   : > { %3452 = vset.pattern.permute.xlu2 %v6183_v30 }
 0x285   : > { %754 = vperm.xlu2 %3452, %v605_v28  }
 0x296   : > { %v578_v1 = vpop.xlane.xlu1 %577 }
 0x297   : > { %vm3382_vm12 = vcmp.lt.s32.totalorder %v578_v1, 0  ;;  %v3383_v29 = vceil.f32 %v578_v1  ;;  %v3384_v23 = vfloor.f32 %v578_v1 }
 0x298   : > { %v581_v30 = vpop.xlane.xlu0 %580 }
 0x299   : > { %v3385_v43 = vsel %vm3382_vm12, %v3383_v29, %v3384_v23  ;;  %v3388_v31 = vceil.f32 %v581_v30 }
 0x29a   : > { %v584_v37 = vpop.xlane.xlu2 %583  ;;  %v3386_v9 = vcvt.f32.s32 %v3385_v43 }
 0x29b   : > { %vm3392_vm7 = vcmp.lt.s32.totalorder %v584_v37, 0  ;;  %v3393_v62 = vceil.f32 %v584_v37  ;;  %v3394_v58 = vfloor.f32 %v584_v37 }
 0x29c   : > { %vm799_vm1 = vcmp.eq.s32.totalorder %v3386_v9, %v3911_v24  ;;  %vm865_vm5 = vcmp.lt.s32.totalorder %v3386_v9, 2 }
 0x29d   : > { %v3395_v5 = vsel %vm3392_vm7, %v3393_v62, %v3394_v58  ;;  %vm4239_vm11 = vmand %vm793_vm15, %vm799_vm1  ;;  %vm947_vm7 = vcmp.eq.s32.totalorder %v4046_v40, 1  ;;  %vm848_vm1 = vcmp.eq.s32.totalorder %v4036_v8, %v4220_v59  ;;  %v3389_v40 = vfloor.f32 %v581_v30 }
 0x29e   : > { %v3396_v44 = vcvt.f32.s32 %v3395_v5  ;;  %v815_v6 = vsel %vm4239_vm11, %v4061_v38, 0.0  ;;  %vm889_vm2 = vmand %vm4232_vm14, %vm865_vm5  ;;  %vm6198_vm14 = vcmp.eq.s32.totalorder %v3922_v45, 1  ;;  %v4271_v17 = vpop.xlane.xlu1 %571  ;;  %vm3387_vm11 = vcmp.lt.s32.totalorder %v581_v30, 0 }
 0x29f   : > { %v897_v47 = vsel %vm889_vm2, 1.0, %v6054_v19  ;;  %vm6199_vm5 = vcmp.eq.s32.totalorder %v3922_v45, 0  ;;  %v3390_v54 = vsel %vm3387_vm11, %v3388_v31, %v3389_v40  ;;  %vm946_vm11 = vcmp.eq.s32.totalorder %v4087_v27, 1 }
 0x2a0   : > { %vm801_vm0 = vcmp.eq.s32.totalorder %v3396_v44, %v3911_v24  ;;  %vm867_vm9 = vcmp.lt.s32.totalorder %v3396_v44, 2  ;;  %v4262_v12 = vadd.f32 %v897_v47, %v815_v6  ;;  %v3391_v1 = vcvt.f32.s32 %v3390_v54 }
 0x2a1   : > { %vm809_vm4 = vmand %vm793_vm15, %vm801_vm0 }
 0x2a2   : > { %v817_v33 = vsel %vm809_vm4, %v3997_v51, 0.0  ;;  %vm891_vm3 = vmand %vm859_vm8, %vm867_vm9  ;;  %v575_v0 = vpop.xlane.xlu2 %574  ;;  %v701_v51 = vsel %vm6197_vm10, %v4030_v26, %v661_v21  ;;  %vm866_vm10 = vcmp.lt.s32.totalorder %v3391_v1, 2 }
 0x2a3   : > { %v899_v41 = vsel %vm891_vm3, 1.0, %v6054_v19  ;;  %vm3377_vm12 = vcmp.lt.s32.totalorder %v575_v0, 0  ;;  %v3378_v49 = vceil.f32 %v575_v0  ;;  %v3379_v42 = vfloor.f32 %v575_v0  ;;  %vm856_vm8 = vmand %vm818_vm6, %vm848_vm1 }
 0x2a4   : > { %v907_v13 = vadd.f32 %v899_v41, %v817_v33  ;;  %v749_v57 = vsel %vm6198_vm14, %v4024_v55, %v701_v51  ;;  %vm800_vm3 = vcmp.eq.s32.totalorder %v3391_v1, %v3911_v24  ;;  %v3373_v51 = vceil.f32 %v4271_v17 }
 0x2a5   : > { %v3380_v38 = vsel %vm3377_vm12, %v3378_v49, %v3379_v42  ;;  %v789_v55 = vsel %vm6199_vm5, %v4103_v36, %v749_v57  ;;  %vm808_vm2 = vmand %vm793_vm15, %vm800_vm3  ;;  %vm6202_vm5 = vcmp.eq.s32.totalorder %v3922_v45, 1  ;;  %vm3372_vm3 = vcmp.lt.s32.totalorder %v4271_v17, 0 }
 0x2a6   : > { %v955_v15 = vsel %vm947_vm7, %v907_v13, 0.0  ;;  %v3381_v20 = vcvt.f32.s32 %v3380_v38  ;;  %v569_v29 = vpop.xlane.xlu1 %568  ;;  %v816_v9 = vsel %vm808_vm2, %v4010_v7, 0.0  ;;  %v3374_v38 = vfloor.f32 %v4271_v17 }
 0x2a7   : > { %v4266_v22 = vand.u32 4294901760, %v955_v15  ;;  %v3368_v37 = vceil.f32 %v569_v29  ;;  %v3369_v43 = vfloor.f32 %v569_v29  ;;  %vm3367_vm12 = vcmp.lt.s32.totalorder %v569_v29, 0 }
 0x2a8   : > { %vm798_vm0 = vcmp.eq.s32.totalorder %v3381_v20, %v3911_v24  ;;  %vm864_vm9 = vcmp.lt.s32.totalorder %v3381_v20, 2  ;;  %v3375_v40 = vsel %vm3372_vm3, %v3373_v51, %v3374_v38  ;;  %vm847_vm2 = vcmp.eq.s32.totalorder %v4215_v39, %v4220_v59 }
 0x2a9   : > { %1251 = vmatpush.msra.mxu0 %v4266_v22  ;;  %3280 = vmatpush.msra.mxu2 %v4266_v22  ;;  %v4276_v26 = vsub.f32 %v955_v15, %v4266_v22  ;;  %vm806_vm4 = vmand %vm793_vm15, %vm798_vm0  ;;  %v4303_v58 = vsel %vm3367_vm12, %v3368_v37, %v3369_v43  ;;  %v3376_v17 = vcvt.f32.s32 %v3375_v40 }
 0x2aa   : > { %v4280_v8 = vpop.xlane.xlu2 %565  ;;  %v814_v28 = vsel %vm806_vm4, %v789_v55, 0.0  ;;  %vm888_vm13 = vmand %vm856_vm8, %vm864_vm9  ;;  %v3371_v34 = vcvt.f32.s32 %v4303_v58  ;;  %vm6200_vm8 = vcmp.eq.s32.totalorder %v3922_v45, 3  ;;  %vm6201_vm9 = vcmp.eq.s32.totalorder %v3922_v45, 2 }
 0x2ab   : > { %v4288_v16 = vpop.permute.xlu0 %619  ;;  %v1669_v11 = vand.u32 4294901760, %v4276_v26  ;;  %v896_v3 = vsel %vm888_vm13, 1.0, %v6054_v19  ;;  %v659_v6 = vsel %vm6200_vm8, %v4224_v48, 1.0  ;;  %vm6205_vm13 = vcmp.eq.s32.totalorder %v3922_v45, 0 }
 0x2ac   : > { %v4295_v61 = vadd.f32 %v896_v3, %v814_v28  ;;  %vm796_vm0 = vcmp.eq.s32.totalorder %v3371_v34, %v3911_v24  ;;  %v699_v27 = vsel %vm6201_vm9, %v4213_v10, %v659_v6 }
 0x2ad   : > { %v1670_v18 = vsub.f32 %v4276_v26, %v1669_v11  ;;  %vm4334_vm4 = vmand %vm793_vm15, %vm796_vm0 }
 0x2ae   : > { %v563_v41 = vpop.xlane.xlu1 %562 }
 0x2af   : > { %v1671_v36 = vand.u32 4294901760, %v1670_v18  ;;  %v3359_v43 = vfloor.f32 %v563_v41  ;;  %vm3357_vm0 = vcmp.lt.s32.totalorder %v563_v41, 0 }
 0x2b1   : > { %1672 = vmatpush.msra.mxu1 %v1671_v36  ;;  %3288 = vmatpush.msra.mxu3 %v1671_v36 }
 0x2b2   : > { %v718_v23 = vpop.permute.xlu2 %717 }
 0x2b3   : > { %v747_v48 = vsel %vm6202_vm5, %v718_v23, %v699_v27  ;;  %vm6206_vm5 = vcmp.eq.s32.totalorder %v3922_v45, 3 }
 0x2b4   : > { %v840_v62 = vpop.permute.xlu0 %839 }
 0x2b5   : > { %vm850_vm7 = vcmp.eq.s32.totalorder %v840_v62, %v4220_v59 }
 0x2b6   : > { %vm858_vm1 = vmand %vm818_vm6, %vm850_vm7 }
 0x2b7   : > { %vm890_vm14 = vmand %vm858_vm1, %vm866_vm10  ;;  %vm797_vm10 = vcmp.eq.s32.totalorder %v3376_v17, %v3911_v24  ;;  %vm863_vm1 = vcmp.lt.s32.totalorder %v3376_v17, 2 }
 0x2b8   : > { %v898_v5 = vsel %vm890_vm14, 1.0, %v6054_v19  ;;  %vm855_vm14 = vmand %vm818_vm6, %vm847_vm2  ;;  %vm3362_vm2 = vcmp.lt.s32.totalorder %v4280_v8, 0 }
 0x2b9   : > { %v906_v46 = vadd.f32 %v898_v5, %v816_v9  ;;  %vm887_vm8 = vmand %vm855_vm14, %vm863_vm1  ;;  %vm6211_vm14 = vcmp.eq.s32.totalorder %v3922_v45, 0 }
 0x2ba   : > { %v4307_v44 = vpop.permute.xlu2 %670  ;;  %v895_v9 = vsel %vm887_vm8, 1.0, %v6054_v19 }
 0x2bb   : > { %v954_v21 = vsel %vm946_vm11, %v906_v46, 0.0  ;;  %vm805_vm11 = vmand %vm793_vm15, %vm797_vm10  ;;  %vm846_vm10 = vcmp.eq.s32.totalorder %v4217_v32, %v4220_v59 }
 0x2bc   : > { %v4311_v33 = vand.u32 4294901760, %v954_v21  ;;  %v4313_v0 = vpop.permute.xlu0 %821  ;;  %v813_v5 = vsel %vm805_vm11, %v4116_v14, 0.0  ;;  %v3363_v14 = vceil.f32 %v4280_v8  ;;  %vm997_vm11 = vcmp.eq.s32.totalorder %v4051_v4, %v4118_v50 }
 0x2bd   : > { %vm844_vm3 = vcmp.eq.s32.totalorder %v4313_v0, %v4220_v59 }
 0x2be   : > { %1253 = vmatpush.msra.mxu0 %v4311_v33  ;;  %3281 = vmatpush.msra.mxu2 %v4311_v33  ;;  %v4321_v7 = vsub.f32 %v954_v21, %v4311_v33  ;;  %vm4429_vm8 = vmand %vm818_vm6, %vm844_vm3 }
 0x2c0   : > { %v1675_v49 = vand.u32 4294901760, %v4321_v7 }
 0x2c2   : > { %v763_v30 = vpop.permute.xlu2 %762  ;;  %v1676_v10 = vsub.f32 %v4321_v7, %v1675_v49 }
 0x2c3   : > { %v4340_v42 = vsel %vm6205_vm13, %v763_v30, %v747_v48  ;;  %v903_v30 = vadd.f32 %v895_v9, %v813_v5  ;;  %v4449_v5 = vsel %vm997_vm11, 1.0, %v6054_v19  ;;  %vm998_vm11 = vcmp.eq.s32.totalorder %v4054_v52, %v4118_v50 }
 0x2c4   : > { %v812_v47 = vsel %vm4334_vm4, %v4340_v42, 0.0  ;;  %v1677_v15 = vand.u32 4294901760, %v1676_v10 }
 0x2c5   : > { %v933_v20 = vpop.permute.xlu0 %932 }
 0x2c6   : > { %vm945_vm12 = vcmp.eq.s32.totalorder %v933_v20, 1  ;;  %1678 = vmatpush.msra.mxu1 %v1677_v15  ;;  %3289 = vmatpush.msra.mxu3 %v1677_v15  ;;  %v4352_v31 = vpop.permute.xlu1 %624  ;;  %v657_v15 = vsel %vm6206_vm5, %v4288_v16, 1.0  ;;  %v973_v20 = vadd.s32 200, %v4051_v4  ;;  %vm4444_vm5 = vmand %vm818_vm6, %vm846_vm10  ;;  %vm6221_vm10 = vcmp.eq.s32.totalorder %v3922_v45, 2 }
 0x2c7   : > { %v953_v57 = vsel %vm945_vm12, %v4262_v12, 0.0  ;;  %vm6207_vm12 = vcmp.eq.s32.totalorder %v3922_v45, 2 }
 0x2c8   : > { %v4354_v55 = vand.u32 4294901760, %v953_v57 }
 0x2ca   : > { %v4356_v54 = vpop.permute.xlu2 %712  ;;  %v4359_v28 = vsub.f32 %v953_v57, %v4354_v55  ;;  %1255 = vmatpush.msra.mxu0 %v4354_v55  ;;  %3282 = vmatpush.msra.mxu2 %v4354_v55  ;;  %v3364_v57 = vfloor.f32 %v4280_v8 }
 0x2cc   : > { %v1681_v3 = vand.u32 4294901760, %v4359_v28 }
 0x2cd   : > { %v930_v18 = vpop.permute.xlu0 %929 }
 0x2ce   : > { %vm944_vm7 = vcmp.eq.s32.totalorder %v930_v18, 1  ;;  %v1682_v12 = vsub.f32 %v4359_v28, %v1681_v3 }
 0x2cf   : > { %v952_v1 = vsel %vm944_vm7, %v4295_v61, 0.0  ;;  %v4373_v29 = vpop.permute.xlu1 %824  ;;  %v3358_v61 = vceil.f32 %v563_v41  ;;  %vm6208_vm7 = vcmp.eq.s32.totalorder %v3922_v45, 1 }
 0x2d0   : > { %v4371_v36 = vand.u32 4294901760, %v952_v1  ;;  %v1683_v23 = vand.u32 4294901760, %v1682_v12 }
 0x2d1   : > { %v3360_v21 = vsel %vm3357_vm0, %v3358_v61, %v3359_v43  ;;  %vm1022_vm0 = vcmp.eq.s32.totalorder %v973_v20, %v4118_v50 }
 0x2d2   : > { %v667_v37 = vpop.permute.xlu2 %666  ;;  %v4378_v39 = vsub.f32 %v952_v1, %v4371_v36  ;;  %1257 = vmatpush.msra.mxu0 %v4371_v36  ;;  %3283 = vmatpush.msra.mxu2 %v4371_v36  ;;  %v3361_v10 = vcvt.f32.s32 %v3360_v21 }
 0x2d3   : > { %1684 = vmatpush.msra.mxu1 %v1683_v23  ;;  %3290 = vmatpush.msra.mxu3 %v1683_v23  ;;  %v697_v40 = vsel %vm6207_vm12, %v667_v37, %v657_v15  ;;  %v3365_v37 = vsel %vm3362_vm2, %v3363_v14, %v3364_v57  ;;  %vm6218_vm12 = vcmp.eq.s32.totalorder %v3922_v45, 3 }
 0x2d4   : > { %v1687_v62 = vand.u32 4294901760, %v4378_v39  ;;  %vm794_vm13 = vcmp.eq.s32.totalorder %v3361_v10, %v3911_v24  ;;  %v658_v58 = vsel %vm6218_vm12, %v4352_v31, 1.0 }
 0x2d5   : > { %vm4416_vm1 = vmand %vm793_vm15, %vm794_vm13  ;;  %vm860_vm13 = vcmp.lt.s32.totalorder %v3361_v10, 2  ;;  %v698_v31 = vsel %vm6221_vm10, %v4307_v44, %v658_v58  ;;  %vm999_vm10 = vcmp.eq.s32.totalorder %v4064_v56, %v4118_v50 }
 0x2d6   : > { %v1688_v46 = vsub.f32 %v4378_v39, %v1687_v62  ;;  %vm884_vm3 = vmand %vm4429_vm8, %vm860_vm13 }
 0x2d8   : > { %v1689_v6 = vand.u32 4294901760, %v1688_v46  ;;  %v927_v48 = vpop.permute.xlu1 %926  ;;  %v3366_v46 = vcvt.f32.s32 %v3365_v37 }
 0x2d9   : > { %vm943_vm9 = vcmp.eq.s32.totalorder %v927_v48, 1 }
 0x2da   : > { %v708_v27 = vpop.permute.xlu2 %707  ;;  %1690 = vmatpush.msra.mxu1 %v1689_v6  ;;  %3291 = vmatpush.msra.mxu3 %v1689_v6  ;;  %v951_v51 = vsel %vm943_vm9, %v903_v30, 0.0  ;;  %vm4438_vm9 = vcmp.lt.s32.totalorder %v3371_v34, 2  ;;  %v4457_v34 = vsel %vm1022_vm0, 1.0, %v6054_v19  ;;  %v974_v6 = vadd.s32 208, %v4051_v4  ;;  %v918_v30 = vpop.permute.xlu0 %917 }
 0x2db   : > { %v4390_v38 = vand.u32 4294901760, %v951_v51  ;;  %v745_v18 = vsel %vm6208_vm7, %v708_v27, %v697_v40  ;;  %6219 = vst [vmem:[#allocation2_spill] sm:$0xff] %v4457_v34  ;;  %vm886_vm2 = vmand %vm4444_vm5, %vm4438_vm9  ;;  %vm6220_vm7 = vcmask 523264   ;;  %v892_v27 = vsel %vm884_vm3, 1.0, %v6054_v19 }
 0x2dc   : > { %v1096_v21 = vsel %vm6220_vm7, %v4449_v5, 0  ;;  %vm795_vm8 = vcmp.eq.s32.totalorder %v3366_v46, %v3911_v24  ;;  %vm6223_vm0 = vcmp.eq.s32.totalorder %v3922_v45, 1  ;;  %vm940_vm13 = vcmp.eq.s32.totalorder %v918_v30, 1 }
 0x2dd   : > { %v4393_v41 = vsub.f32 %v951_v51, %v4390_v38  ;;  %1259 = vmatpush.msra.mxu0 %v4390_v38  ;;  %3284 = vmatpush.msra.mxu2 %v4390_v38  ;;  %v894_v51 = vsel %vm886_vm2, 1.0, %v6054_v19  ;;  %v4491_v15 = vsub.f32 %v1096_v21, %v1096_v21  ;;  %vm6227_vm3 = vcmp.eq.s32.totalorder %v3922_v45, 0 }
 0x2de   : > { %v902_v44 = vadd.f32 %v894_v51, %v812_v47  ;;  %vm1023_vm4 = vcmp.eq.s32.totalorder %v974_v6, %v4118_v50  ;;  %vm861_vm12 = vcmp.lt.s32.totalorder %v3366_v46, 2  ;;  %v4513_v45 = vsel %vm998_vm11, 1.0, %v6054_v19  ;;  %vm6232_vm11 = vmmov %vm6220_vm7 }
 0x2df   : > { %v1693_v17 = vand.u32 4294901760, %v4393_v41  ;;  %v4516_v2 = vsel %vm1023_vm4, 1.0, %v6054_v19  ;;  %v4560_v51 = vsel %vm999_vm10, 1.0, %v6054_v19 }
 0x2e0   : > { %6228 = vst [vmem:[#allocation4_spill] sm:$0xff] %v4516_v2  ;;  %v1174_v32 = vsel %vm6220_vm7, %v4516_v2, 0 }
 0x2e1   : > { %v759_v1 = vpop.permute.xlu1 %758  ;;  %v1694_v8 = vsub.f32 %v4393_v41, %v1693_v17 }
 0x2e2   : > { %v755_v16 = vpop.permute.xlu2 %754 }
 0x2e3   : > { %v785_v0 = vsel %vm6211_vm14, %v755_v16, %v745_v18  ;;  %v1695_v61 = vand.u32 4294901760, %v1694_v8  ;;  %vm6222_vm14 = vmmov %vm6220_vm7  ;;  %v6015_v18 = vand.u32 4294901760, %v4491_v15 }
 0x2e4   : > { %v810_v23 = vsel %vm4416_vm1, %v785_v0, 0.0  ;;  %vm845_vm1 = vcmp.eq.s32.totalorder %v4373_v29, %v4220_v59  ;;  %v1171_v48 = vsel %vm6222_vm14, %v4457_v34, 0  ;;  %v746_v59 = vsel %vm6223_vm0, %v4356_v54, %v698_v31 }
 0x2e5   : > { %1696 = vmatpush.msra.mxu1 %v1695_v61  ;;  %3292 = vmatpush.msra.mxu3 %v1695_v61  ;;  %v900_v10 = vadd.f32 %v892_v27, %v810_v23  ;;  %vm4487_vm9 = vmand %vm818_vm6, %vm845_vm1  ;;  %v4493_v24 = vsub.f32 %v1171_v48, %v1171_v48  ;;  %v786_v13 = vsel %vm6227_vm3, %v759_v1, %v746_v59  ;;  %v975_v23 = vadd.s32 216, %v4051_v4 }
 0x2e6   : > { %vm803_vm6 = vmand %vm793_vm15, %vm795_vm8  ;;  %v1269_v43 = vsub.f32 %v4491_v15, %v6015_v18  ;;  %v4547_v27 = vsub.f32 %v1174_v32, %v1174_v32  ;;  %vm1000_vm0 = vcmp.eq.s32.totalorder %v4067_v60, %v4118_v50 }
 0x2e7   : > { %6226 = vst [vmem:[#allocation3_spill] sm:$0xff] %v4493_v24  ;;  %v948_v47 = vsel %vm940_vm13, %v900_v10, 0.0  ;;  %vm885_vm2 = vmand %vm4487_vm9, %vm861_vm12  ;;  %v811_v20 = vsel %vm803_vm6, %v786_v13, 0.0  ;;  %v6001_v16 = vand.u32 4294901760, %v4493_v24  ;;  %vm1024_vm14 = vcmp.eq.s32.totalorder %v975_v23, %v4118_v50 }
 0x2e8   : > { %v4518_v40 = vand.u32 4294901760, %v948_v47  ;;  %v893_v12 = vsel %vm885_vm2, 1.0, %v6054_v19  ;;  %vm6229_vm15 = vmmov %vm6220_vm7  ;;  %6230 = vst [vmem:[#allocation5_spill] sm:$0xff] %v4547_v27  ;;  %v1270_v48 = vand.u32 4294901760, %v1269_v43  ;;  %v6000_v59 = vand.u32 4294901760, %v4547_v27 }
 0x2e9   : > { %v901_v8 = vadd.f32 %v893_v12, %v811_v20  ;;  %v1099_v52 = vsel %vm6229_vm15, %v4513_v45, 0  ;;  %v1469_v9 = vsub.f32 %v4493_v24, %v6001_v16  ;;  %v4568_v29 = vsel %vm1024_vm14, 1.0, %v6054_v19  ;;  %vm6233_vm8 = vmmov %vm6220_vm7 }
 0x2ea   : > { %v924_v14 = vpop.permute.xlu1 %923  ;;  %v4541_v58 = vsub.f32 %v948_v47, %v4518_v40  ;;  %v4545_v6 = vsub.f32 %v1099_v52, %v1099_v52  ;;  %6231 = vst [vmem:[#allocation6_spill] sm:$0xff] %v4568_v29  ;;  %v976_v13 = vadd.s32 224, %v4051_v4  ;;  %v1102_v47 = vsel %vm6232_vm11, %v4560_v51, 0 }
 0x2eb   : > { %vm942_vm5 = vcmp.eq.s32.totalorder %v924_v14, 1  ;;  %v1470_v30 = vand.u32 4294901760, %v1469_v9  ;;  %v1177_v20 = vsel %vm6233_vm8, %v4568_v29, 0  ;;  %v1477_v12 = vsub.f32 %v4547_v27, %v6000_v59 }
 0x2ec   : > { %v950_v42 = vsel %vm942_vm5, %v902_v44, 0.0  ;;  %v1711_v10 = vand.u32 4294901760, %v4541_v58  ;;  %v6013_v44 = vand.u32 4294901760, %v4545_v6  ;;  %vm1025_vm9 = vcmp.eq.s32.totalorder %v976_v13, %v4118_v50  ;;  %vm6236_vm5 = vmmov %vm6220_vm7 }
 0x2ed   : > { %v4500_v54 = vand.u32 4294901760, %v950_v42  ;;  %v977_v23 = vadd.s32 232, %v4051_v4  ;;  %vm6237_vm13 = vmmov %vm6236_vm5  ;;  %vm1001_vm12 = vcmp.eq.s32.totalorder %v4077_v53, %v4118_v50  ;;  %v978_v43 = vadd.s32 240, %v4051_v4 }
 0x2ee   : > { %vm6238_vm3 = vmmov %vm6236_vm5 }
 0x2ef   : > { %v4505_v57 = vsub.f32 %v950_v42, %v4500_v54  ;;  %1261 = vmatpush.msra.mxu0 %v4500_v54  ;;  %3285 = vmatpush.msra.mxu2 %v4500_v54  ;;  %v1712_v42 = vsub.f32 %v4541_v58, %v1711_v10  ;;  %vm6239_vm4 = vmmov %vm6238_vm3  ;;  %vm1026_vm6 = vcmp.eq.s32.totalorder %v977_v23, %v4118_v50 }
 0x2f0   : > { %vm6242_vm2 = vmmov %vm6238_vm3  ;;  %vm1027_vm14 = vcmp.eq.s32.totalorder %v978_v43, %v4118_v50 }
 0x2f1   : > { %v1699_v0 = vand.u32 4294901760, %v4505_v57  ;;  %vm6243_vm15 = vmmov %vm6242_vm2 }
 0x2f2   : > { %v921_v1 = vpop.permute.xlu1 %920  ;;  %vm6244_vm7 = vmmov %vm6242_vm2 }
 0x2f3   : > { %vm941_vm1 = vcmp.eq.s32.totalorder %v921_v1, 1  ;;  %v1700_v37 = vsub.f32 %v4505_v57, %v1699_v0  ;;  %v4596_v1 = vsub.f32 %v1102_v47, %v1102_v47  ;;  %vm6245_vm10 = vmmov %vm6242_vm2 }
 0x2f4   : > { %v949_v61 = vsel %vm941_vm1, %v901_v8, 0.0  ;;  %v1478_v8 = vand.u32 4294901760, %v1477_v12  ;;  %vm1002_vm1 = vcmp.eq.s32.totalorder %v4081_v63, %v4118_v50  ;;  %vm6248_vm11 = vmmov %vm6242_vm2 }
 0x2f5   : > { %v4543_v46 = vand.u32 4294901760, %v949_v61  ;;  %v1701_v21 = vand.u32 4294901760, %v1700_v37  ;;  %v6011_v52 = vand.u32 4294901760, %v4596_v1  ;;  %v4690_v63 = vsel %vm1002_vm1, 1.0, %v6054_v19  ;;  %vm6249_vm8 = vmmov %vm6242_vm2 }
 0x2f6   : > { %vm6260_vm1 = vmmov %vm6242_vm2 }
 0x2f7   : > { %v4551_v31 = vsub.f32 %v949_v61, %v4543_v46  ;;  %1263 = vmatpush.msra.mxu0 %v4543_v46  ;;  %3286 = vmatpush.msra.mxu2 %v4543_v46  ;;  %v1285_v37 = vsub.f32 %v4596_v1, %v6011_v52 }
 0x2f8   : > { %1702 = vmatpush.msra.mxu1 %v1701_v21  ;;  %3293 = vmatpush.msra.mxu3 %v1701_v21 }
 0x2f9   : > { %1265 = vmatpush.msra.mxu0 %v4518_v40  ;;  %3287 = vmatpush.msra.mxu2 %v4518_v40  ;;  %v1705_v14 = vand.u32 4294901760, %v4551_v31 }
 0x2fa   : > { %1271 = vmatmul.f32.vlgmr.msra.gmra.mxu0 %v1270_v48  ;;  %1471 = vmatmul.f32.vlgmr.msra.gmra.mxu2 %v1470_v30  ;;  %v979_v30 = vadd.s32 248, %v4051_v4 }
 0x2fb   : > { %1922 = vmatpush.msrb.mxu2 %v4276_v26  ;;  %2520 = vmatpush.msrb.mxu0 %v1669_v11  ;;  %v1706_v56 = vsub.f32 %v4551_v31, %v1705_v14  ;;  %v1277_v11 = vsub.f32 %v4545_v6, %v6013_v44 }
 0x2fd   : > { %1925 = vmatpush.msrb.mxu2 %v4321_v7  ;;  %2524 = vmatpush.msrb.mxu0 %v1675_v49  ;;  %v1707_v26 = vand.u32 4294901760, %v1706_v56  ;;  %v4598_v7 = vsub.f32 %v1177_v20, %v1177_v20  ;;  %v1713_v49 = vand.u32 4294901760, %v1712_v42  ;;  %v1278_v60 = vand.u32 4294901760, %v1277_v11 }
 0x2fe   : > { %v980_v11 = vadd.s32 256, %v4051_v4 }
 0x2ff   : > { %1928 = vmatpush.msrb.mxu2 %v4359_v28  ;;  %2528 = vmatpush.msrb.mxu0 %v1681_v3  ;;  %6234 = vst [vmem:[#allocation7_spill] sm:$0xff] %v4598_v7  ;;  %v4605_v28 = vsel %vm1000_vm0, 1.0, %v6054_v19  ;;  %v4608_v3 = vsel %vm1025_vm9, 1.0, %v6054_v19  ;;  %v5999_v32 = vand.u32 4294901760, %v4598_v7  ;;  %vm1003_vm0 = vcmp.eq.s32.totalorder %v4093_v35, %v4118_v50  ;;  %vm6250_vm9 = vmmov %vm6242_vm2 }
 0x300   : > { %1708 = vmatpush.msra.mxu1 %v1707_v26  ;;  %3294 = vmatpush.msra.mxu3 %v1707_v26  ;;  %6235 = vst [vmem:[#allocation8_spill] sm:$0xff] %v4608_v3  ;;  %v4724_v35 = vsel %vm1003_vm0, 1.0, %v6054_v19  ;;  %vm6265_vm0 = vmmov %vm6260_vm1 }
 0x301   : > { %1931 = vmatpush.msrb.mxu2 %v4378_v39  ;;  %2532 = vmatpush.msrb.mxu0 %v1687_v62  ;;  %v1105_v39 = vsel %vm6238_vm3, %v4605_v28, 0  ;;  %v1180_v62 = vsel %vm6239_vm4, %v4608_v3, 0  ;;  %v1485_v61 = vsub.f32 %v4598_v7, %v5999_v32  ;;  %vm6254_vm3 = vmmov %vm6242_vm2 }
 0x302   : > { %1714 = vmatpush.msra.mxu1 %v1713_v49  ;;  %3295 = vmatpush.msra.mxu3 %v1713_v49  ;;  %v1114_v23 = vsel %vm6254_vm3, %v4724_v35, 0  ;;  %vm6255_vm4 = vmmov %vm6242_vm2 }
 0x303   : > { %1279 = vmatmul.f32.gmra.mxu0 %v1278_v60  ;;  %1479 = vmatmul.f32.gmra.mxu2 %v1478_v8  ;;  %vm6268_vm3 = vmmov %vm6265_vm0 }
 0x304   : > { %3131 = vmatmul.msk.f32.vlgmr.msra.gmra.mxu1 %vm6236_vm5, %v4449_v5  ;;  %3156 = vmatmul.msk.f32.vlgmr.msra.gmra.mxu3 %vm6237_vm13, %v4457_v34  ;;  %vm6251_vm5 = vmmov %vm6242_vm2  ;;  %vm1028_vm13 = vcmp.eq.s32.totalorder %v979_v30, %v4118_v50 }
 0x305   : > { %1934 = vmatpush.msrb.mxu2 %v4393_v41  ;;  %2199 = vmatpush.msrb.mxu3 %v4266_v22  ;;  %v4642_v41 = vsub.f32 %v1180_v62, %v1180_v62  ;;  %v4727_v26 = vsel %vm1028_vm13, 1.0, %v6054_v19  ;;  %v956_v62 = vadd.s32 64, %v4051_v4  ;;  %vm6267_vm13 = vmmov %vm6265_vm0 }
 0x306   : > { %2536 = vmatpush.msrb.mxu0 %v1693_v17  ;;  %2755 = vmatpush.msrb.mxu1 %v4266_v22  ;;  %v4640_v22 = vsub.f32 %v1105_v39, %v1105_v39  ;;  %v4651_v17 = vsel %vm1001_vm12, 1.0, %v6054_v19  ;;  %6253 = vst [vmem:[#allocation14_spill] sm:$0xff] %v4727_v26  ;;  %v1189_v39 = vsel %vm6255_vm4, %v4727_v26, 0  ;;  %vm1004_vm12 = vcmp.eq.s32.totalorder %v4090_v25, %v4118_v50 }
 0x307   : > { %1937 = vmatpush.msrb.mxu2 %v4505_v57  ;;  %2201 = vmatpush.msrb.mxu3 %v4311_v33  ;;  %6240 = vst [vmem:[#allocation9_spill] sm:$0xff] %v4642_v41  ;;  %v4654_v57 = vsel %vm1026_vm6, 1.0, %v6054_v19  ;;  %v1108_v9 = vsel %vm6242_vm2, %v4651_v17, 0  ;;  %vm6256_vm6 = vmmov %vm6242_vm2  ;;  %v4752_v25 = vsub.f32 %v1189_v39, %v1189_v39  ;;  %v982_v39 = vadd.s32 272, %v4051_v4 }
 0x308   : > { %2540 = vmatpush.msrb.mxu0 %v1699_v0  ;;  %2757 = vmatpush.msrb.mxu1 %v4311_v33  ;;  %6241 = vst [vmem:[#allocation10_spill] sm:$0xff] %v4654_v57  ;;  %v1286_v33 = vand.u32 4294901760, %v1285_v37  ;;  %v1486_v0 = vand.u32 4294901760, %v1485_v61  ;;  %v6010_v53 = vand.u32 4294901760, %v4640_v22  ;;  %v1183_v21 = vsel %vm6243_vm15, %v4654_v57, 0 }
 0x309   : > { %1940 = vmatpush.msrb.mxu2 %v4551_v31  ;;  %2203 = vmatpush.msrb.mxu3 %v4354_v55  ;;  %v4683_v31 = vsub.f32 %v1108_v9, %v1108_v9  ;;  %v4685_v48 = vsub.f32 %v1183_v21, %v1183_v21  ;;  %vm1029_vm15 = vcmp.eq.s32.totalorder %v980_v11, %v4118_v50  ;;  %v981_v9 = vadd.s32 264, %v4051_v4 }
 0x30a   : > { %2544 = vmatpush.msrb.mxu0 %v1705_v14  ;;  %2759 = vmatpush.msrb.mxu1 %v4354_v55  ;;  %v5998_v55 = vand.u32 4294901760, %v4642_v41  ;;  %6257 = vst [vmem:[#allocation15_spill] sm:$0xff] %v4752_v25  ;;  %v4758_v43 = vsel %vm1029_vm15, 1.0, %v6054_v19  ;;  %v5994_v30 = vand.u32 4294901760, %v4752_v25  ;;  %vm1031_vm4 = vcmp.eq.s32.totalorder %v982_v39, %v4118_v50  ;;  %vm6274_vm15 = vmmov %vm6265_vm0 }
 0x30b   : > { %1943 = vmatpush.msrb.mxu2 %v4541_v58  ;;  %2205 = vmatpush.msrb.mxu3 %v4371_v36  ;;  %6246 = vst [vmem:[#allocation11_spill] sm:$0xff] %v4685_v48  ;;  %v6009_v56 = vand.u32 4294901760, %v4683_v31  ;;  %v5997_v13 = vand.u32 4294901760, %v4685_v48  ;;  %v958_v39 = vadd.s32 80, %v4051_v4 }
 0x30c   : > { %2548 = vmatpush.msrb.mxu0 %v1711_v10  ;;  %2761 = vmatpush.msrb.mxu1 %v4371_v36  ;;  %v1293_v36 = vsub.f32 %v4640_v22, %v6010_v53  ;;  %v1493_v58 = vsub.f32 %v4642_v41, %v5998_v55  ;;  %6258 = vst [vmem:[#allocation16_spill] sm:$0xff] %v4758_v43  ;;  %v984_v55 = vadd.s32 288, %v4051_v4  ;;  %v986_v53 = vadd.s32 304, %v4051_v4 }
 0x30d   : > { %1287 = vmatmul.f32.gmra.mxu0 %v1286_v33  ;;  %1487 = vmatmul.f32.gmra.mxu2 %v1486_v0  ;;  %v4750_v33 = vsub.f32 %v1114_v23, %v1114_v23  ;;  %v4755_v0 = vsel %vm1004_vm12, 1.0, %v6054_v19  ;;  %vm6271_vm12 = vmmov %vm6265_vm0 }
 0x30e   : > { %3132 = vmatmul.msk.f32.gmra.mxu1 %vm6244_vm7, %v4513_v45  ;;  %3157 = vmatmul.msk.f32.gmra.mxu3 %vm6245_vm10, %v4516_v2  ;;  %v1294_v10 = vand.u32 4294901760, %v1293_v36  ;;  %v1494_v14 = vand.u32 4294901760, %v1493_v58  ;;  %vm1005_vm7 = vcmp.eq.s32.totalorder %v956_v62, %v4118_v50  ;;  %vm6259_vm10 = vmmov %vm6242_vm2 }
 0x30f   : > { %2207 = vmatpush.msrb.mxu3 %v4390_v38  ;;  %2763 = vmatpush.msrb.mxu1 %v4390_v38  ;;  %v4693_v38 = vsel %vm1027_vm14, 1.0, %v6054_v19  ;;  %v6005_v58 = vand.u32 4294901760, %v4750_v33  ;;  %vm6261_vm14 = vmmov %vm6260_vm1 }
 0x310   : > { %6247 = vst [vmem:[#allocation12_spill] sm:$0xff] %v4693_v38  ;;  %v1186_v42 = vsel %vm6249_vm8, %v4693_v38, 0  ;;  %vm1030_vm8 = vcmp.eq.s32.totalorder %v981_v9, %v4118_v50 }
 0x311   : > { %2209 = vmatpush.msrb.mxu3 %v4500_v54  ;;  %2765 = vmatpush.msrb.mxu1 %v4500_v54  ;;  %v1111_v54 = vsel %vm6248_vm11, %v4690_v63, 0  ;;  %v4721_v20 = vsub.f32 %v1186_v42, %v1186_v42  ;;  %vm6262_vm11 = vmmov %vm6260_vm1  ;;  %v1317_v42 = vsub.f32 %v4750_v33, %v6005_v58  ;;  %v960_v58 = vadd.s32 96, %v4051_v4 }
 0x312   : > { %v4719_v47 = vsub.f32 %v1111_v54, %v1111_v54  ;;  %v4773_v54 = vsel %vm1005_vm7, 1.0, %v6054_v19  ;;  %vm1007_vm7 = vcmp.eq.s32.totalorder %v958_v39, %v4118_v50  ;;  %v959_v39 = vadd.s32 88, %v4051_v4 }
 0x313   : > { %2211 = vmatpush.msrb.mxu3 %v4543_v46  ;;  %2767 = vmatpush.msrb.mxu1 %v4543_v46  ;;  %v1501_v46 = vsub.f32 %v4685_v48, %v5997_v13  ;;  %6252 = vst [vmem:[#allocation13_spill] sm:$0xff] %v4721_v20  ;;  %v5995_v8 = vand.u32 4294901760, %v4721_v20  ;;  %v1120_v23 = vsel %vm6265_vm0, %v4773_v54, 0  ;;  %v1318_v62 = vand.u32 4294901760, %v1317_v42 }
 0x314   : > { %v6007_v60 = vand.u32 4294901760, %v4719_v47 }
 0x315   : > { %2213 = vmatpush.msrb.mxu3 %v4518_v40  ;;  %2769 = vmatpush.msrb.mxu1 %v4518_v40  ;;  %v1301_v40 = vsub.f32 %v4683_v31, %v6009_v56  ;;  %v1502_v49 = vand.u32 4294901760, %v1501_v46  ;;  %v1509_v61 = vsub.f32 %v4721_v20, %v5995_v8 }
 0x316   : > { %1295 = vmatmul.f32.gmra.mxu0 %v1294_v10  ;;  %1495 = vmatmul.f32.gmra.mxu2 %v1494_v14  ;;  %v1309_v37 = vsub.f32 %v4719_v47, %v6007_v60  ;;  %v1117_v10 = vsel %vm6259_vm10, %v4755_v0, 0  ;;  %v1192_v14 = vsel %vm6260_vm1, %v4758_v43, 0  ;;  %vm6277_vm1 = vmmov %vm6265_vm0 }
 0x317   : > { %3133 = vmatmul.msk.f32.gmra.mxu1 %vm6250_vm9, %v4560_v51  ;;  %3158 = vmatmul.msk.f32.gmra.mxu3 %vm6251_vm5, %v4568_v29  ;;  %v1302_v12 = vand.u32 4294901760, %v1301_v40  ;;  %v1510_v36 = vand.u32 4294901760, %v1509_v61  ;;  %v1517_v40 = vsub.f32 %v4752_v25, %v5994_v30  ;;  %v4782_v46 = vsub.f32 %v1117_v10, %v1117_v10  ;;  %vm6266_vm9 = vmmov %vm6265_vm0 }
 0x318   : > { %v1310_v21 = vand.u32 4294901760, %v1309_v37  ;;  %v4784_v11 = vsub.f32 %v1192_v14, %v1192_v14 }
 0x319   : > { %v1518_v37 = vand.u32 4294901760, %v1517_v40  ;;  %v6004_v61 = vand.u32 4294901760, %v4782_v46 }
 0x31a   : > { %6263 = vst [vmem:[#allocation17_spill] sm:$0xff] %v4784_v11  ;;  %v5996_v9 = vand.u32 4294901760, %v4784_v11 }
 0x31b   : > { %v1325_v10 = vsub.f32 %v4782_v46, %v6004_v61 }
 0x31c   : > { %v1525_v14 = vsub.f32 %v4784_v11, %v5996_v9 }
 0x31e   : > { %1303 = vmatmul.f32.gmra.mxu0 %v1302_v12  ;;  %1503 = vmatmul.f32.gmra.mxu2 %v1502_v49  ;;  %v4787_v12 = vsel %vm1030_vm8, 1.0, %v6054_v19  ;;  %v957_v49 = vadd.s32 72, %v4051_v4  ;;  %v1526_v30 = vand.u32 4294901760, %v1525_v14  ;;  %vm6279_vm8 = vmmov %vm6265_vm0 }
 0x31f   : > { %3134 = vmatmul.msk.f32.gmra.mxu1 %vm6256_vm6, %v4605_v28  ;;  %3159 = vmatmul.msk.f32.gmra.mxu3 %vm6242_vm2, %v4608_v3  ;;  %6264 = vst [vmem:[#allocation18_spill] sm:$0xff] %v4787_v12  ;;  %vm6272_vm6 = vmmov %vm6265_vm0  ;;  %v967_v3 = vadd.s32 152, %v4051_v4 }
 0x320   : > { %vm1006_vm5 = vcmp.eq.s32.totalorder %v957_v49, %v4118_v50  ;;  %v4817_v49 = vsel %vm1031_vm4, 1.0, %v6054_v19  ;;  %vm6273_vm2 = vmmov %vm6265_vm0 }
 0x321   : > { %v4814_v40 = vsel %vm1006_vm5, 1.0, %v6054_v19  ;;  %6270 = vst [vmem:[#allocation20_spill] sm:$0xff] %v4817_v49  ;;  %v1198_v9 = vsel %vm6272_vm6, %v4817_v49, 0  ;;  %vm6282_vm5 = vmmov %vm6265_vm0 }
 0x322   : > { %v4841_v14 = vsub.f32 %v1198_v9, %v1198_v9  ;;  %vm6285_vm4 = vmmov %vm6265_vm0 }
 0x324   : > { %6275 = vst [vmem:[#allocation21_spill] sm:$0xff] %v4841_v14  ;;  %v6008_v16 = vand.u32 4294901760, %v4841_v14 }
 0x326   : > { %1311 = vmatmul.f32.gmra.mxu0 %v1310_v21  ;;  %1511 = vmatmul.f32.gmra.mxu2 %v1510_v36  ;;  %v1195_v21 = vsel %vm6266_vm9, %v4787_v12, 0  ;;  %v4802_v36 = vsub.f32 %v1120_v23, %v1120_v23  ;;  %vm1033_vm9 = vcmp.eq.s32.totalorder %v984_v55, %v4118_v50 }
 0x327   : > { %3135 = vmatmul.msk.f32.gmra.mxu1 %vm6261_vm14, %v4651_v17  ;;  %3160 = vmatmul.msk.f32.gmra.mxu3 %vm6262_vm11, %v4654_v57  ;;  %v4811_v42 = vsub.f32 %v1195_v21, %v1195_v21  ;;  %v1123_v21 = vsel %vm6271_vm12, %v4814_v40, 0  ;;  %vm6278_vm14 = vmmov %vm6265_vm0  ;;  %vm1008_vm11 = vcmp.eq.s32.totalorder %v959_v39, %v4118_v50  ;;  %vm1009_vm12 = vcmp.eq.s32.totalorder %v960_v58, %v4118_v50 }
 0x328   : > { %v6003_v23 = vand.u32 4294901760, %v4802_v36  ;;  %v4831_v13 = vsub.f32 %v1123_v21, %v1123_v21  ;;  %v4874_v39 = vsel %vm1008_vm11, 1.0, %v6054_v19  ;;  %v4904_v56 = vsel %vm1009_vm12, 1.0, %v6054_v19  ;;  %vm6294_vm11 = vmmov %vm6265_vm0 }
 0x329   : > { %6269 = vst [vmem:[#allocation19_spill] sm:$0xff] %v4811_v42  ;;  %v6002_v8 = vand.u32 4294901760, %v4811_v42  ;;  %v961_v58 = vadd.s32 104, %v4051_v4 }
 0x32e   : > { %1319 = vmatmul.f32.gmra.mxu0 %v1318_v62  ;;  %1519 = vmatmul.f32.gmra.mxu2 %v1518_v37  ;;  %v983_v62 = vadd.s32 280, %v4051_v4  ;;  %v1326_v37 = vand.u32 4294901760, %v1325_v10  ;;  %v1333_v10 = vsub.f32 %v4802_v36, %v6003_v23  ;;  %v4877_v23 = vsel %vm1033_vm9, 1.0, %v6054_v19  ;;  %vm6296_vm9 = vmmov %vm6265_vm0 }
 0x32f   : > { %3136 = vmatmul.msk.f32.gmra.mxu1 %vm6267_vm13, %v4690_v63  ;;  %3161 = vmatmul.msk.f32.gmra.mxu3 %vm6268_vm3, %v4693_v38  ;;  %6281 = vst [vmem:[#allocation24_spill] sm:$0xff] %v4877_v23  ;;  %vm6283_vm13 = vmmov %vm6265_vm0 }
 0x330   : > { %vm1032_vm10 = vcmp.eq.s32.totalorder %v983_v62, %v4118_v50  ;;  %v6006_v62 = vand.u32 4294901760, %v4831_v13  ;;  %v1334_v32 = vand.u32 4294901760, %v1333_v10  ;;  %vm6284_vm3 = vmmov %vm6265_vm0 }
 0x331   : > { %v4847_v21 = vsel %vm1032_vm10, 1.0, %v6054_v19  ;;  %vm6290_vm10 = vmmov %vm6265_vm0 }
 0x332   : > { %6276 = vst [vmem:[#allocation22_spill] sm:$0xff] %v4847_v21  ;;  %v1341_v10 = vsub.f32 %v4831_v13, %v6006_v62  ;;  %v985_v62 = vadd.s32 296, %v4051_v4 }
 0x334   : > { %v1342_v61 = vand.u32 4294901760, %v1341_v10  ;;  %vm1034_vm6 = vcmp.eq.s32.totalorder %v985_v62, %v4118_v50 }
 0x336   : > { %1327 = vmatmul.f32.gmra.mxu0 %v1326_v37  ;;  %1527 = vmatmul.f32.gmra.mxu2 %v1526_v30  ;;  %v1533_v30 = vsub.f32 %v4811_v42, %v6002_v8  ;;  %v4844_v37 = vsel %vm1007_vm7, 1.0, %v6054_v19  ;;  %v1201_v8 = vsel %vm6278_vm14, %v4847_v21, 0  ;;  %vm1010_vm7 = vcmp.eq.s32.totalorder %v961_v58, %v4118_v50 }
 0x337   : > { %3137 = vmatmul.msk.f32.gmra.mxu1 %vm6273_vm2, %v4724_v35  ;;  %3162 = vmatmul.msk.f32.gmra.mxu3 %vm6274_vm15, %v4727_v26  ;;  %v1126_v9 = vsel %vm6277_vm1, %v4844_v37, 0  ;;  %vm6288_vm2 = vmmov %vm6265_vm0  ;;  %vm1035_vm14 = vcmp.eq.s32.totalorder %v986_v53, %v4118_v50  ;;  %v4934_v58 = vsel %vm1010_vm7, 1.0, %v6054_v19 }
 0x338   : > { %v1534_v59 = vand.u32 4294901760, %v1533_v30  ;;  %v1541_v30 = vsub.f32 %v4841_v14, %v6008_v16  ;;  %vm6289_vm15 = vmmov %vm6265_vm0  ;;  %v4937_v18 = vsel %vm1035_vm14, 1.0, %v6054_v19 }
 0x339   : > { %vm6291_vm1 = vmmov %vm6265_vm0  ;;  %6293 = vst [vmem:[#allocation28_spill] sm:$0xff] %v4937_v18 }
 0x33a   : > { %v1542_v55 = vand.u32 4294901760, %v1541_v30  ;;  %vm6305_vm7 = vmmov %vm6265_vm0 }
 0x33b   : > { %vm6307_vm14 = vmmov %vm6265_vm0 }
 0x33e   : > { %1335 = vmatmul.f32.gmra.mxu0 %v1334_v32  ;;  %1535 = vmatmul.f32.gmra.mxu2 %v1534_v59  ;;  %v4869_v32 = vsub.f32 %v1126_v9, %v1126_v9  ;;  %v4871_v59 = vsub.f32 %v1201_v8, %v1201_v8  ;;  %v1129_v8 = vsel %vm6282_vm5, %v4874_v39, 0  ;;  %v1204_v9 = vsel %vm6283_vm13, %v4877_v23, 0 }
 0x33f   : > { %3138 = vmatmul.msk.f32.gmra.mxu1 %vm6279_vm8, %v4755_v0  ;;  %3163 = vmatmul.msk.f32.gmra.mxu3 %vm6265_vm0, %v4758_v43  ;;  %v4891_v10 = vsub.f32 %v1129_v8, %v1129_v8  ;;  %v4907_v8 = vsel %vm1034_vm6, 1.0, %v6054_v19  ;;  %vm6295_vm8 = vmmov %vm6265_vm0 }
 0x340   : > { %6280 = vst [vmem:[#allocation23_spill] sm:$0xff] %v4871_v59  ;;  %v6012_v60 = vand.u32 4294901760, %v4869_v32  ;;  %v6014_v16 = vand.u32 4294901760, %v4871_v59  ;;  %vm6301_vm6 = vmmov %vm6265_vm0 }
 0x341   : > { %6287 = vst [vmem:[#allocation26_spill] sm:$0xff] %v4907_v8  ;;  %v6020_v62 = vand.u32 4294901760, %v4891_v10 }
 0x342   : > { %v1349_v30 = vsub.f32 %v4869_v32, %v6012_v60 }
 0x344   : > { %v1350_v52 = vand.u32 4294901760, %v1349_v30  ;;  %v1357_v30 = vsub.f32 %v4891_v10, %v6020_v62  ;;  %v987_v62 = vadd.s32 312, %v4051_v4 }
 0x346   : > { %1343 = vmatmul.f32.gmra.mxu0 %v1342_v61  ;;  %1543 = vmatmul.f32.gmra.mxu2 %v1542_v55  ;;  %v1549_v61 = vsub.f32 %v4871_v59, %v6014_v16  ;;  %v4901_v55 = vsub.f32 %v1204_v9, %v1204_v9  ;;  %v1132_v9 = vsel %vm6288_vm2, %v4904_v56, 0  ;;  %v1207_v16 = vsel %vm6289_vm15, %v4907_v8, 0  ;;  %vm6302_vm2 = vmmov %vm6265_vm0 }
 0x347   : > { %3139 = vmatmul.msk.f32.gmra.mxu1 %vm6284_vm3, %v4773_v54  ;;  %3164 = vmatmul.msk.f32.gmra.mxu3 %vm6285_vm4, %v4787_v12  ;;  %v962_v59 = vadd.s32 112, %v4051_v4  ;;  %vm1036_vm13 = vcmp.eq.s32.totalorder %v987_v62, %v4118_v50  ;;  %vm6299_vm3 = vmmov %vm6265_vm0 }
 0x348   : > { %6286 = vst [vmem:[#allocation25_spill] sm:$0xff] %v4901_v55  ;;  %v1550_v60 = vand.u32 4294901760, %v1549_v61  ;;  %v6023_v44 = vand.u32 4294901760, %v4901_v55  ;;  %vm6300_vm4 = vmmov %vm6265_vm0 }
 0x349   : > { %vm1011_vm5 = vcmp.eq.s32.totalorder %v962_v59, %v4118_v50  ;;  %v963_v59 = vadd.s32 120, %v4051_v4 }
 0x34a   : > { %v1557_v61 = vsub.f32 %v4901_v55, %v6023_v44  ;;  %v4964_v55 = vsel %vm1011_vm5, 1.0, %v6054_v19  ;;  %vm6312_vm5 = vmmov %vm6265_vm0 }
 0x34b   : > { %vm1012_vm12 = vcmp.eq.s32.totalorder %v963_v59, %v4118_v50 }
 0x34c   : > { %v1558_v53 = vand.u32 4294901760, %v1557_v61  ;;  %v4994_v59 = vsel %vm1012_vm12, 1.0, %v6054_v19  ;;  %vm6318_vm12 = vmmov %vm6265_vm0 }
 0x34e   : > { %1351 = vmatmul.f32.gmra.mxu0 %v1350_v52  ;;  %1551 = vmatmul.f32.gmra.mxu2 %v1550_v60  ;;  %v4929_v52 = vsub.f32 %v1132_v9, %v1132_v9  ;;  %v4931_v60 = vsub.f32 %v1207_v16, %v1207_v16  ;;  %v1135_v16 = vsel %vm6294_vm11, %v4934_v58, 0  ;;  %v1210_v9 = vsel %vm6295_vm8, %v4937_v18, 0  ;;  %vm6308_vm11 = vmmov %vm6265_vm0 }
 0x34f   : > { %3140 = vmatmul.msk.f32.gmra.mxu1 %vm6290_vm10, %v4814_v40  ;;  %3165 = vmatmul.msk.f32.gmra.mxu3 %vm6291_vm1, %v4817_v49  ;;  %v1358_v49 = vand.u32 4294901760, %v1357_v30  ;;  %v4951_v30 = vsub.f32 %v1135_v16, %v1135_v16  ;;  %v4967_v16 = vsel %vm1036_vm13, 1.0, %v6054_v19  ;;  %vm6306_vm10 = vmmov %vm6265_vm0 }
 0x350   : > { %6292 = vst [vmem:[#allocation27_spill] sm:$0xff] %v4931_v60  ;;  %v6030_v12 = vand.u32 4294901760, %v4929_v52  ;;  %v6033_v44 = vand.u32 4294901760, %v4931_v60  ;;  %vm6313_vm13 = vmmov %vm6265_vm0 }
 0x351   : > { %6298 = vst [vmem:[#allocation30_spill] sm:$0xff] %v4967_v16  ;;  %v6040_v62 = vand.u32 4294901760, %v4951_v30 }
 0x352   : > { %v1365_v61 = vsub.f32 %v4929_v52, %v6030_v12 }
 0x354   : > { %v1366_v14 = vand.u32 4294901760, %v1365_v61  ;;  %v1373_v61 = vsub.f32 %v4951_v30, %v6040_v62  ;;  %v989_v62 = vadd.s32 328, %v4051_v4 }
 0x356   : > { %1359 = vmatmul.f32.gmra.mxu0 %v1358_v49  ;;  %1559 = vmatmul.f32.gmra.mxu2 %v1558_v53  ;;  %v1565_v49 = vsub.f32 %v4931_v60, %v6033_v44  ;;  %v4961_v53 = vsub.f32 %v1210_v9, %v1210_v9  ;;  %v1138_v9 = vsel %vm6299_vm3, %v4964_v55, 0  ;;  %v1213_v44 = vsel %vm6300_vm4, %v4967_v16, 0 }
 0x357   : > { %3141 = vmatmul.msk.f32.gmra.mxu1 %vm6265_vm0, %v4844_v37  ;;  %3166 = vmatmul.msk.f32.gmra.mxu3 %vm6296_vm9, %v4847_v21  ;;  %v988_v21 = vadd.s32 320, %v4051_v4  ;;  %v1374_v42 = vand.u32 4294901760, %v1373_v61  ;;  %vm1038_vm8 = vcmp.eq.s32.totalorder %v989_v62, %v4118_v50  ;;  %v965_v62 = vadd.s32 136, %v4051_v4  ;;  %vm6311_vm9 = vmmov %vm6265_vm0 }
 0x358   : > { %6297 = vst [vmem:[#allocation29_spill] sm:$0xff] %v4961_v53  ;;  %v1566_v12 = vand.u32 4294901760, %v1565_v49  ;;  %v6043_v43 = vand.u32 4294901760, %v4961_v53 }
 0x359   : > { %vm1037_vm15 = vcmp.eq.s32.totalorder %v988_v21, %v4118_v50  ;;  %vm1014_vm3 = vcmp.eq.s32.totalorder %v965_v62, %v4118_v50  ;;  %v966_v62 = vadd.s32 144, %v4051_v4 }
 0x35a   : > { %v1573_v49 = vsub.f32 %v4961_v53, %v6043_v43  ;;  %v4997_v60 = vsel %vm1037_vm15, 1.0, %v6054_v19  ;;  %v5027_v53 = vsel %vm1038_vm8, 1.0, %v6054_v19  ;;  %vm6320_vm15 = vmmov %vm6265_vm0 }
 0x35b   : > { %6304 = vst [vmem:[#allocation32_spill] sm:$0xff] %v4997_v60  ;;  %vm6328_vm8 = vmmov %vm6265_vm0 }
 0x35c   : > { %v1574_v21 = vand.u32 4294901760, %v1573_v49  ;;  %6310 = vst [vmem:[#allocation34_spill] sm:$0xff] %v5027_v53 }
 0x35e   : > { %1367 = vmatmul.f32.gmra.mxu0 %v1366_v14  ;;  %1567 = vmatmul.f32.gmra.mxu2 %v1566_v12  ;;  %v4989_v14 = vsub.f32 %v1138_v9, %v1138_v9  ;;  %v4991_v12 = vsub.f32 %v1213_v44, %v1213_v44  ;;  %v1141_v44 = vsel %vm6305_vm7, %v4994_v59, 0  ;;  %v1216_v9 = vsel %vm6306_vm10, %v4997_v60, 0  ;;  %vm6321_vm7 = vmmov %vm6265_vm0 }
 0x35f   : > { %3142 = vmatmul.msk.f32.gmra.mxu1 %vm6301_vm6, %v4874_v39  ;;  %3167 = vmatmul.msk.f32.gmra.mxu3 %vm6302_vm2, %v4877_v23  ;;  %v964_v23 = vadd.s32 128, %v4051_v4  ;;  %v5012_v61 = vsub.f32 %v1141_v44, %v1141_v44  ;;  %vm6319_vm6 = vmmov %vm6265_vm0  ;;  %vm1015_vm2 = vcmp.eq.s32.totalorder %v966_v62, %v4118_v50 }
 0x360   : > { %6303 = vst [vmem:[#allocation31_spill] sm:$0xff] %v4991_v12  ;;  %v6050_v26 = vand.u32 4294901760, %v4989_v14  ;;  %v6053_v43 = vand.u32 4294901760, %v4991_v12 }
 0x361   : > { %vm1013_vm1 = vcmp.eq.s32.totalorder %v964_v23, %v4118_v50  ;;  %v6062_v44 = vand.u32 4294901760, %v5012_v61 }
 0x362   : > { %v1381_v49 = vsub.f32 %v4989_v14, %v6050_v26  ;;  %v5024_v23 = vsel %vm1013_vm1, 1.0, %v6054_v19  ;;  %vm6325_vm1 = vmmov %vm6265_vm0 }
 0x364   : > { %v1382_v11 = vand.u32 4294901760, %v1381_v49  ;;  %v1389_v49 = vsub.f32 %v5012_v61, %v6062_v44 }
 0x366   : > { %1375 = vmatmul.f32.gmra.mxu0 %v1374_v42  ;;  %1575 = vmatmul.f32.gmra.mxu2 %v1574_v21  ;;  %v1581_v42 = vsub.f32 %v4991_v12, %v6053_v43  ;;  %v5021_v21 = vsub.f32 %v1216_v9, %v1216_v9  ;;  %v1144_v9 = vsel %vm6265_vm0, %v5024_v23, 0  ;;  %v1219_v43 = vsel %vm6311_vm9, %v5027_v53, 0 }
 0x367   : > { %3143 = vmatmul.msk.f32.gmra.mxu1 %vm6307_vm14, %v4904_v56  ;;  %3168 = vmatmul.msk.f32.gmra.mxu3 %vm6308_vm11, %v4907_v8  ;;  %v990_v8 = vadd.s32 336, %v4051_v4  ;;  %v5041_v19 = vsub.f32 %v1144_v9, %v1144_v9  ;;  %v1390_v25 = vand.u32 4294901760, %v1389_v49  ;;  %vm6326_vm14 = vmmov %vm6265_vm0 }
 0x368   : > { %6309 = vst [vmem:[#allocation33_spill] sm:$0xff] %v5021_v21  ;;  %v1582_v26 = vand.u32 4294901760, %v1581_v42  ;;  %v6065_v38 = vand.u32 4294901760, %v5021_v21  ;;  %v6315_v42 = vmov 0.0   ;;  %vm6327_vm11 = vmmov %vm6265_vm0  ;;  %vm1016_vm0 = vcmp.eq.s32.totalorder %v967_v3, %v4118_v50 }
 0x369   : > { %vm1039_vm4 = vcmp.eq.s32.totalorder %v990_v8, %v4118_v50  ;;  %v5054_v12 = vsel %vm1014_vm3, 1.0, %v6315_v42  ;;  %v6074_v8 = vand.u32 4294901760, %v5041_v19  ;;  %vm6338_vm3 = vmmov %vm6325_vm1 }
 0x36a   : > { %6316 = vst [vmem:[#allocation36_spill] sm:$0xff] %v5054_v12  ;;  %v5057_v9 = vsel %vm1039_vm4, 1.0, %v6315_v42  ;;  %vm6339_vm4 = vmmov %vm6325_vm1 }
 0x36b   : > { %6317 = vst [vmem:[#allocation37_spill] sm:$0xff] %v5057_v9 }
 0x36e   : > { %1383 = vmatmul.f32.gmra.mxu0 %v1382_v11  ;;  %1583 = vmatmul.f32.gmra.mxu2 %v1582_v26  ;;  %v1589_v26 = vsub.f32 %v5021_v21, %v6065_v38  ;;  %v5051_v11 = vsub.f32 %v1219_v43, %v1219_v43  ;;  %v1147_v43 = vsel %vm6318_vm12, %v5054_v12, 0  ;;  %v1222_v38 = vsel %vm6319_vm6, %v5057_v9, 0 }
 0x36f   : > { %3144 = vmatmul.msk.f32.gmra.mxu1 %vm6312_vm5, %v4934_v58  ;;  %3169 = vmatmul.msk.f32.gmra.mxu3 %vm6313_vm13, %v4937_v18  ;;  %v991_v18 = vadd.s32 344, %v4051_v4  ;;  %v5083_v62 = vsub.f32 %v1222_v38, %v1222_v38  ;;  %v5086_v21 = vsel %vm1015_vm2, 1.0, %v6315_v42  ;;  %vm6336_vm5 = vmmov %vm6325_vm1 }
 0x370   : > { %6314 = vst [vmem:[#allocation35_spill] sm:$0xff] %v5051_v11  ;;  %v1590_v44 = vand.u32 4294901760, %v1589_v26  ;;  %v6077_v57 = vand.u32 4294901760, %v5051_v11  ;;  %v1397_v26 = vsub.f32 %v5041_v19, %v6074_v8  ;;  %v992_v8 = vadd.s32 352, %v4051_v4  ;;  %vm6337_vm13 = vmmov %vm6325_vm1 }
 0x371   : > { %vm1040_vm10 = vcmp.eq.s32.totalorder %v991_v18, %v4118_v50  ;;  %6322 = vst [vmem:[#allocation38_spill] sm:$0xff] %v5083_v62  ;;  %v1150_v38 = vsel %vm6325_vm1, %v5086_v21, 0  ;;  %vm6348_vm2 = vmmov %vm6325_vm1 }
 0x372   : > { %6323 = vst [vmem:[#allocation39_spill] sm:$0xff] %v5086_v21  ;;  %v1398_v20 = vand.u32 4294901760, %v1397_v26  ;;  %v5103_v26 = vsub.f32 %v1150_v38, %v1150_v38  ;;  %vm1041_vm9 = vcmp.eq.s32.totalorder %v992_v8, %v4118_v50  ;;  %v5120_v38 = vsel %vm1016_vm0, 1.0, %v6315_v42  ;;  %vm6360_vm0 = vmmov %vm6348_vm2 }
 0x373   : > { %6334 = vst [vmem:[#allocation45_spill] sm:$0xff] %v5120_v38  ;;  %v5123_v3 = vsel %vm1041_vm9, 1.0, %v6315_v42  ;;  %vm6361_vm9 = vmmov %vm6360_vm0 }
 0x374   : > { %6329 = vst [vmem:[#allocation41_spill] sm:$0xff] %v5103_v26 }
 0x375   : > { %6335 = vst [vmem:[#allocation46_spill] sm:$0xff] %v5123_v3 }
 0x376   : > { %1391 = vmatmul.f32.gmra.mxu0 %v1390_v25  ;;  %1591 = vmatmul.f32.gmra.mxu2 %v1590_v44  ;;  %v1597_v25 = vsub.f32 %v5051_v11, %v6077_v57  ;;  %v5081_v44 = vsub.f32 %v1147_v43, %v1147_v43 }
 0x377   : > { %3145 = vmatmul.msk.f32.gmra.mxu1 %vm6320_vm15, %v4964_v55  ;;  %3170 = vmatmul.msk.f32.gmra.mxu3 %vm6321_vm7, %v4967_v16  ;;  %v5072_v49 = vpop.f32.mrf.mxu0  ;;  %v5089_v16 = vsel %vm1040_vm10, 1.0, %v6315_v42  ;;  %vm6349_vm15 = vmmov %vm6325_vm1 }
 0x378   : > { %6324 = vst [vmem:[#allocation40_spill] sm:$0xff] %v5089_v16  ;;  %v1598_v18 = vand.u32 4294901760, %v1597_v25  ;;  %v6086_v48 = vand.u32 4294901760, %v5081_v44  ;;  %v1225_v11 = vsel %vm6326_vm14, %v5089_v16, 0  ;;  %vm6350_vm7 = vmmov %vm6325_vm1 }
 0x379   : > { %v5115_v29 = vsub.f32 %v1225_v11, %v1225_v11  ;;  %v1153_v11 = vsel %vm6336_vm5, %v5120_v38, 0  ;;  %vm6351_vm10 = vmmov %vm6325_vm1 }
 0x37a   : > { %v1405_v57 = vsub.f32 %v5081_v44, %v6086_v48  ;;  %v993_v48 = vadd.s32 360, %v4051_v4  ;;  %v5147_v27 = vsub.f32 %v1153_v11, %v1153_v11 }
 0x37b   : > { %6332 = vst [vmem:[#allocation43_spill] sm:$0xff] %v5115_v29 }
 0x37c   : > { %v1406_v2 = vand.u32 4294901760, %v1405_v57  ;;  %v6340_v57 = vand.u32 4294901760, %v5103_v26  ;;  %vm1042_vm6 = vcmp.eq.s32.totalorder %v993_v48, %v4118_v50  ;;  %6343 = vst [vmem:[#allocation48_spill] sm:$0xff] %v5147_v27  ;;  %v969_v48 = vadd.s32 168, %v4051_v4 }
 0x37d   : > { %v1472_v43 = vpop.f32.mrf.mxu2  ;;  %v6107_v11 = vand.u32 4294901760, %v5147_v27 }
 0x37e   : > { %1399 = vmatmul.f32.gmra.mxu0 %v1398_v20  ;;  %1599 = vmatmul.f32.gmra.mxu2 %v1598_v18  ;;  %v6331_v20 = vand.u32 4294901760, %v5083_v62  ;;  %vm1018_vm1 = vcmp.eq.s32.totalorder %v969_v48, %v4118_v50 }
 0x37f   : > { %3146 = vmatmul.msk.f32.gmra.mxu1 %vm6327_vm11, %v4994_v59  ;;  %3171 = vmatmul.msk.f32.gmra.mxu3 %vm6328_vm8, %v4997_v60  ;;  %v968_v60 = vadd.s32 160, %v4051_v4  ;;  %v5188_v48 = vsel %vm1018_vm1, 1.0, %v6315_v42  ;;  %vm6358_vm11 = vmmov %vm6348_vm2 }
 0x380   : > { %v5107_v25 = vpop.f32.mrf.mxu0  ;;  %v1605_v18 = vsub.f32 %v5083_v62, %v6331_v20  ;;  %v1228_v62 = vsel %vm6337_vm13, %v5123_v3, 0  ;;  %vm6359_vm8 = vmmov %vm6348_vm2 }
 0x381   : > { %6330 = vst [vmem:[#allocation42_spill] sm:$0xff] %v5107_v25  ;;  %v5117_v41 = vpop.f32.mrf.mxu1  ;;  %vm1017_vm12 = vcmp.eq.s32.totalorder %v968_v60, %v4118_v50  ;;  %v5149_v24 = vsub.f32 %v1228_v62, %v1228_v62  ;;  %vm6378_vm1 = vmmov %vm6360_vm0 }
 0x382   : > { %6333 = vst [vmem:[#allocation44_spill] sm:$0xff] %v5117_v41  ;;  %v1606_v7 = vand.u32 4294901760, %v1605_v18  ;;  %v1413_v18 = vsub.f32 %v5103_v26, %v6340_v57  ;;  %v5154_v25 = vsel %vm1017_vm12, 1.0, %v6315_v42  ;;  %v5157_v57 = vsel %vm1042_vm6, 1.0, %v6315_v42  ;;  %vm6370_vm12 = vmmov %vm6360_vm0 }
 0x383   : > { %6344 = vst [vmem:[#allocation49_spill] sm:$0xff] %v5149_v24  ;;  %v6110_v62 = vand.u32 4294901760, %v5149_v24  ;;  %vm6371_vm6 = vmmov %vm6360_vm0 }
 0x384   : > { %6346 = vst [vmem:[#allocation51_spill] sm:$0xff] %v5157_v57 }
 0x386   : > { %1407 = vmatmul.f32.gmra.mxu0 %v1406_v2  ;;  %1607 = vmatmul.f32.gmra.mxu2 %v1606_v7  ;;  %v1480_v34 = vpop.f32.mrf.mxu2  ;;  %v6342_v2 = vand.u32 4294901760, %v5115_v29 }
 0x387   : > { %3147 = vmatmul.msk.f32.gmra.mxu1 %vm6338_vm3, %v5024_v23  ;;  %3172 = vmatmul.msk.f32.gmra.mxu3 %vm6339_vm4, %v5027_v53  ;;  %v1817_v8 = vpop.f32.mrf.mxu3  ;;  %vm6368_vm3 = vmmov %vm6360_vm0 }
 0x388   : > { %v5142_v20 = vadd.f32 %v1817_v8, %v1472_v43  ;;  %v1613_v7 = vsub.f32 %v5115_v29, %v6342_v2  ;;  %v994_v43 = vadd.s32 368, %v4051_v4  ;;  %v1414_v8 = vand.u32 4294901760, %v1413_v18  ;;  %vm6369_vm4 = vmmov %vm6360_vm0 }
 0x389   : > { %v1156_v29 = vsel %vm6348_vm2, %v5154_v25, 0 }
 0x38a   : > { %6341 = vst [vmem:[#allocation47_spill] sm:$0xff] %v5142_v20  ;;  %v5151_v53 = vpop.f32.mrf.mxu0  ;;  %v1614_v2 = vand.u32 4294901760, %v1613_v7  ;;  %v1231_v20 = vsel %vm6349_vm15, %v5157_v57, 0  ;;  %vm1043_vm14 = vcmp.eq.s32.totalorder %v994_v43, %v4118_v50  ;;  %v1421_v7 = vsub.f32 %v5147_v27, %v6107_v11 }
 0x38b   : > { %6345 = vst [vmem:[#allocation50_spill] sm:$0xff] %v5151_v53  ;;  %v5159_v60 = vpop.f32.mrf.mxu1  ;;  %v5183_v53 = vsub.f32 %v1231_v20, %v1231_v20  ;;  %v5191_v43 = vsel %vm1043_vm14, 1.0, %v6315_v42  ;;  %v970_v11 = vadd.s32 176, %v4051_v4  ;;  %v995_v27 = vadd.s32 376, %v4051_v4  ;;  %vm6379_vm14 = vmmov %vm6360_vm0 }
 0x38c   : > { %6347 = vst [vmem:[#allocation52_spill] sm:$0xff] %v5159_v60 }
 0x38d   : > { %6353 = vst [vmem:[#allocation54_spill] sm:$0xff] %v5183_v53  ;;  %vm1019_vm5 = vcmp.eq.s32.totalorder %v970_v11, %v4118_v50  ;;  %vm1044_vm13 = vcmp.eq.s32.totalorder %v995_v27, %v4118_v50 }
 0x38e   : > { %1415 = vmatmul.f32.gmra.mxu0 %v1414_v8  ;;  %1615 = vmatmul.f32.gmra.mxu2 %v1614_v2  ;;  %v1621_v8 = vsub.f32 %v5149_v24, %v6110_v62  ;;  %v5181_v2 = vsub.f32 %v1156_v29, %v1156_v29  ;;  %6355 = vst [vmem:[#allocation56_spill] sm:$0xff] %v5191_v43  ;;  %v1422_v29 = vand.u32 4294901760, %v1421_v7  ;;  %v5225_v11 = vsel %vm1044_vm13, 1.0, %v6315_v42  ;;  %vm6386_vm13 = vmmov %vm6360_vm0 }
 0x38f   : > { %3148 = vmatmul.msk.f32.gmra.mxu1 %vm6350_vm7, %v5054_v12  ;;  %3173 = vmatmul.msk.f32.gmra.mxu3 %vm6351_vm10, %v5057_v9  ;;  %6364 = vst [vmem:[#allocation61_spill] sm:$0xff] %v5225_v11  ;;  %vm6376_vm7 = vmmov %vm6360_vm0 }
 0x390   : > { %v1488_v18 = vpop.f32.mrf.mxu2  ;;  %6352 = vst [vmem:[#allocation53_spill] sm:$0xff] %v5181_v2  ;;  %v1622_v20 = vand.u32 4294901760, %v1621_v8  ;;  %v6117_v24 = vand.u32 4294901760, %v5181_v2  ;;  %vm6377_vm10 = vmmov %vm6360_vm0 }
 0x391   : > { %v1821_v60 = vpop.f32.mrf.mxu3 }
 0x392   : > { %v5185_v12 = vadd.f32 %v1821_v60, %v1480_v34  ;;  %v6118_v34 = vand.u32 4294901760, %v5183_v53  ;;  %v1159_v60 = vsel %vm6358_vm11, %v5188_v48, 0  ;;  %v1429_v7 = vsub.f32 %v5181_v2, %v6117_v24 }
 0x393   : > { %v5193_v9 = vpop.f32.mrf.mxu0  ;;  %v971_v24 = vadd.s32 184, %v4051_v4 }
 0x394   : > { %6354 = vst [vmem:[#allocation55_spill] sm:$0xff] %v5185_v12  ;;  %v5197_v62 = vpop.f32.mrf.mxu1  ;;  %v1234_v12 = vsel %vm6359_vm8, %v5191_v43, 0  ;;  %v1629_v8 = vsub.f32 %v5183_v53, %v6118_v34  ;;  %v996_v34 = vadd.s32 384, %v4051_v4  ;;  %vm6382_vm8 = vmmov %vm6360_vm0 }
 0x395   : > { %6356 = vst [vmem:[#allocation57_spill] sm:$0xff] %v5193_v9  ;;  %vm1020_vm2 = vcmp.eq.s32.totalorder %v971_v24, %v4118_v50 }
 0x396   : > { %6357 = vst [vmem:[#allocation58_spill] sm:$0xff] %v5197_v62  ;;  %1423 = vmatmul.f32.gmra.mxu0 %v1422_v29  ;;  %1623 = vmatmul.f32.gmra.mxu2 %v1622_v20  ;;  %v5217_v29 = vsub.f32 %v1159_v60, %v1159_v60  ;;  %v5219_v20 = vsub.f32 %v1234_v12, %v1234_v12  ;;  %v1430_v12 = vand.u32 4294901760, %v1429_v7  ;;  %v1630_v53 = vand.u32 4294901760, %v1629_v8 }
 0x397   : > { %3149 = vmatmul.msk.f32.gmra.mxu1 %vm6360_vm0, %v5086_v21  ;;  %3174 = vmatmul.msk.f32.gmra.mxu3 %vm6361_vm9, %v5089_v16  ;;  %v5222_v16 = vsel %vm1019_vm5, 1.0, %v6315_v42  ;;  %vm1045_vm15 = vcmp.eq.s32.totalorder %v996_v34, %v4118_v50  ;;  %vm6383_vm9 = vmmov %vm6360_vm0 }
 0x398   : > { %6362 = vst [vmem:[#allocation59_spill] sm:$0xff] %v5217_v29  ;;  %v6127_v2 = vand.u32 4294901760, %v5217_v29  ;;  %v6130_v26 = vand.u32 4294901760, %v5219_v20  ;;  %v1162_v41 = vsel %vm6368_vm3, %v5222_v16, 0  ;;  %v5261_v24 = vsel %vm1045_vm15, 1.0, %v6315_v42  ;;  %vm6385_vm5 = vmmov %vm6360_vm0 }
 0x399   : > { %6363 = vst [vmem:[#allocation60_spill] sm:$0xff] %v5219_v20  ;;  %v1496_v9 = vpop.f32.mrf.mxu2  ;;  %v5253_v8 = vsub.f32 %v1162_v41, %v1162_v41  ;;  %vm6388_vm3 = vmmov %vm6360_vm0 }
 0x39a   : > { %v1825_v62 = vpop.f32.mrf.mxu3  ;;  %v1637_v7 = vsub.f32 %v5219_v20, %v6130_v26  ;;  %6373 = vst [vmem:[#allocation66_spill] sm:$0xff] %v5261_v24  ;;  %vm6397_vm15 = vmmov %vm6360_vm0 }
 0x39b   : > { %v5227_v27 = vadd.f32 %v1825_v62, %v1488_v18  ;;  %v5229_v21 = vpop.f32.mrf.mxu0  ;;  %v1237_v62 = vsel %vm6369_vm4, %v5225_v11, 0  ;;  %v1437_v18 = vsub.f32 %v5217_v29, %v6127_v2  ;;  %v972_v2 = vadd.s32 192, %v4051_v4  ;;  %vm6389_vm4 = vmmov %vm6360_vm0 }
 0x39c   : > { %6366 = vst [vmem:[#allocation63_spill] sm:$0xff] %v5229_v21  ;;  %v5233_v60 = vpop.f32.mrf.mxu1  ;;  %v1638_v26 = vand.u32 4294901760, %v1637_v7 }
 0x39d   : > { %6365 = vst [vmem:[#allocation62_spill] sm:$0xff] %v5227_v27  ;;  %v1438_v41 = vand.u32 4294901760, %v1437_v18  ;;  %vm1021_vm11 = vcmp.eq.s32.totalorder %v972_v2, %v4118_v50 }
 0x39e   : > { %6367 = vst [vmem:[#allocation64_spill] sm:$0xff] %v5233_v60  ;;  %1431 = vmatmul.f32.gmra.mxu0 %v1430_v12  ;;  %1631 = vmatmul.f32.gmra.mxu2 %v1630_v53  ;;  %v5255_v53 = vsub.f32 %v1237_v62, %v1237_v62  ;;  %v6137_v62 = vand.u32 4294901760, %v5253_v8 }
 0x39f   : > { %3150 = vmatmul.msk.f32.gmra.mxu1 %vm6370_vm12, %v5120_v38  ;;  %3175 = vmatmul.msk.f32.gmra.mxu3 %vm6371_vm6, %v5123_v3  ;;  %v5258_v3 = vsel %vm1020_vm2, 1.0, %v6315_v42  ;;  %v1240_v38 = vsel %vm6377_vm10, %v5261_v24, 0  ;;  %vm6391_vm12 = vmmov %vm6360_vm0 }
 0x3a0   : > { %6372 = vst [vmem:[#allocation65_spill] sm:$0xff] %v5255_v53  ;;  %v6138_v20 = vand.u32 4294901760, %v5255_v53  ;;  %v1165_v60 = vsel %vm6376_vm7, %v5258_v3, 0  ;;  %v1445_v4 = vsub.f32 %v5253_v8, %v6137_v62  ;;  %v5289_v18 = vsub.f32 %v1240_v38, %v1240_v38  ;;  %vm6392_vm6 = vmmov %vm6360_vm0 }
 0x3a1   : > { %v1504_v12 = vpop.f32.mrf.mxu2  ;;  %vm6395_vm2 = vmmov %vm6360_vm0 }
 0x3a2   : > { %v1829_v27 = vpop.f32.mrf.mxu3  ;;  %6380 = vst [vmem:[#allocation69_spill] sm:$0xff] %v5289_v18  ;;  %v1446_v62 = vand.u32 4294901760, %v1445_v4  ;;  %vm6399_vm7 = vmmov %vm6360_vm0 }
 0x3a3   : > { %v5263_v34 = vadd.f32 %v1829_v27, %v1496_v9  ;;  %v5265_v21 = vpop.f32.mrf.mxu0  ;;  %v1645_v9 = vsub.f32 %v5255_v53, %v6138_v20  ;;  %v5287_v27 = vsub.f32 %v1165_v60, %v1165_v60  ;;  %v6143_v60 = vand.u32 4294901760, %v5289_v18  ;;  %vm6401_vm10 = vmmov %vm6360_vm0 }
 0x3a4   : > { %6375 = vst [vmem:[#allocation68_spill] sm:$0xff] %v5265_v21  ;;  %v5268_v29 = vpop.f32.mrf.mxu1 }
 0x3a5   : > { %6374 = vst [vmem:[#allocation67_spill] sm:$0xff] %v5263_v34  ;;  %v1646_v34 = vand.u32 4294901760, %v1645_v9  ;;  %v6145_v21 = vand.u32 4294901760, %v5287_v27 }
 0x3a6   : > { %1439 = vmatmul.f32.gmra.mxu0 %v1438_v41  ;;  %1639 = vmatmul.f32.gmra.mxu2 %v1638_v26  ;;  %v5292_v41 = vsel %vm1021_vm11, 1.0, %v6315_v42  ;;  %vm6407_vm11 = vmmov %vm6360_vm0 }
 0x3a7   : > { %3151 = vmatmul.msk.f32.gmra.mxu1 %vm6378_vm1, %v5154_v25  ;;  %3176 = vmatmul.msk.f32.gmra.mxu3 %vm6379_vm14, %v5157_v57  ;;  %v1168_v38 = vsel %vm6382_vm8, %v5292_v41, 0  ;;  %v1453_v42 = vsub.f32 %v5287_v27, %v6145_v21  ;;  %vm6403_vm1 = vmmov %vm6360_vm0 }
 0x3a8   : > { %v5314_v4 = vsub.f32 %v1168_v38, %v1168_v38  ;;  %vm6405_vm14 = vmmov %vm6360_vm0 }
 0x3a9   : > { %v1512_v26 = vpop.f32.mrf.mxu2  ;;  %v1454_v53 = vand.u32 4294901760, %v1453_v42  ;;  %vm6409_vm8 = vmmov %vm6360_vm0 }
 0x3aa   : > { %v1833_v7 = vpop.f32.mrf.mxu3 }
 0x3ab   : > { %v5294_v57 = vadd.f32 %v1833_v7, %v1504_v12  ;;  %v5296_v50 = vpop.f32.mrf.mxu0  ;;  %v1653_v12 = vsub.f32 %v5289_v18, %v6143_v60 }
 0x3ac   : > { %v5298_v2 = vpop.f32.mrf.mxu1 }
 0x3ad   : > { %6381 = vst [vmem:[#allocation70_spill] sm:$0xff] %v5294_v57  ;;  %v6144_v57 = vand.u32 4294901760, %v5314_v4 }
 0x3ae   : > { %1447 = vmatmul.f32.gmra.mxu0 %v1446_v62  ;;  %1647 = vmatmul.f32.gmra.mxu2 %v1646_v34 }
 0x3af   : > { %3152 = vmatmul.msk.f32.gmra.mxu1 %vm6360_vm0, %v5188_v48  ;;  %3177 = vmatmul.msk.f32.gmra.mxu3 %vm6383_vm9, %v5191_v43  ;;  %v1654_v43 = vand.u32 4294901760, %v1653_v12  ;;  %vm6412_vm9 = vmmov %vm6360_vm0 }
 0x3b1   : > { %v1520_v9 = vpop.f32.mrf.mxu2 }
 0x3b2   : > { %v1837_v7 = vpop.f32.mrf.mxu3 }
 0x3b3   : > { %v5316_v62 = vadd.f32 %v1837_v7, %v1512_v26  ;;  %v5318_v34 = vpop.f32.mrf.mxu0  ;;  %v1461_v26 = vsub.f32 %v5314_v4, %v6144_v57 }
 0x3b4   : > { %v5320_v20 = vpop.f32.mrf.mxu1 }
 0x3b5   : > { %6384 = vst [vmem:[#allocation71_spill] sm:$0xff] %v5316_v62 }
 0x3b6   : > { %1455 = vmatmul.f32.gmra.mxu0 %v1454_v53  ;;  %1655 = vmatmul.f32.gmra.mxu2 %v1654_v43  ;;  %v1462_v53 = vand.u32 4294901760, %v1461_v26  ;;  %v6393_v26 = vand.u32 4294901760, %v4491_v15 }
 0x3b7   : > { %3153 = vmatmul.msk.f32.gmra.mxu1 %vm6385_vm5, %v5222_v16  ;;  %3178 = vmatmul.msk.f32.gmra.mxu3 %vm6386_vm13, %v5225_v11  ;;  %vm6414_vm5 = vmmov %vm6360_vm0 }
 0x3b8   : > { %vm6416_vm13 = vmmov %vm6360_vm0 }
 0x3b9   : > { %v1528_v38 = vpop.f32.mrf.mxu2 }
 0x3ba   : > { %v1841_v7 = vpop.f32.mrf.mxu3 }
 0x3bb   : > { %v5330_v60 = vadd.f32 %v1841_v7, %v1520_v9  ;;  %v5332_v42 = vpop.f32.mrf.mxu0 }
 0x3bc   : > { %v5334_v12 = vpop.f32.mrf.mxu1 }
 0x3bd   : > { %6387 = vst [vmem:[#allocation72_spill] sm:$0xff] %v5330_v60 }
 0x3be   : > { %1463 = vmatmul.f32.gmra.mxu0 %v1462_v53  ;;  %1946 = vmatmul.f32.vlgmr.msrb.gmra.mxu2 %v4491_v15 }
 0x3bf   : > { %3154 = vmatmul.msk.f32.gmra.mxu1 %vm6388_vm3, %v5258_v3  ;;  %3179 = vmatmul.msk.f32.gmra.mxu3 %vm6389_vm4, %v5261_v24  ;;  %vm6418_vm3 = vmmov %vm6360_vm0 }
 0x3c0   : > { %vm6420_vm4 = vmmov %vm6360_vm0 }
 0x3c1   : > { %v1536_v43 = vpop.f32.mrf.mxu2 }
 0x3c2   : > { %v1845_v57 = vpop.f32.mrf.mxu3 }
 0x3c3   : > { %v5341_v21 = vadd.f32 %v1845_v57, %v1528_v38  ;;  %v5343_v9 = vpop.f32.mrf.mxu0 }
 0x3c4   : > { %v5345_v7 = vpop.f32.mrf.mxu1 }
 0x3c5   : > { %6390 = vst [vmem:[#allocation73_spill] sm:$0xff] %v5341_v21  ;;  %v6396_v21 = vand.u32 4294901760, %v4545_v6 }
 0x3c6   : > { %1951 = vmatmul.f32.gmra.mxu2 %v4545_v6  ;;  %3180 = vmatmul.msk.f32.vlgmr.msrb.gmra.mxu0 %vm6391_vm12, %v4449_v5  ;;  %vm6422_vm12 = vmmov %vm6360_vm0 }
 0x3c7   : > { %3155 = vmatmul.msk.f32.gmra.mxu1 %vm6392_vm6, %v5292_v41  ;;  %2217 = vmatmul.f32.vlgmr.msrb.gmra.mxu3 %v6393_v26  ;;  %vm6424_vm6 = vmmov %vm6360_vm0 }
 0x3c9   : > { %v1544_v53 = vpop.f32.mrf.mxu2 }
 0x3ca   : > { %v1849_v24 = vpop.f32.mrf.mxu3 }
 0x3cb   : > { %v5354_v60 = vadd.f32 %v1849_v24, %v1536_v43  ;;  %v5356_v57 = vpop.f32.mrf.mxu0 }
 0x3cc   : > { %v5358_v38 = vpop.f32.mrf.mxu1 }
 0x3cd   : > { %6394 = vst [vmem:[#allocation74_spill] sm:$0xff] %v5354_v60  ;;  %v6400_v60 = vand.u32 4294901760, %v4596_v1 }
 0x3ce   : > { %1956 = vmatmul.f32.gmra.mxu2 %v4596_v1  ;;  %3181 = vmatmul.msk.f32.gmra.mxu0 %vm6395_vm2, %v4513_v45  ;;  %vm6426_vm2 = vmmov %vm6360_vm0 }
 0x3cf   : > { %2223 = vmatmul.f32.gmra.mxu3 %v6396_v21  ;;  %3229 = vmatmul.msk.f32.vlgmr.msrb.gmra.mxu1 %vm6397_vm15, %v4449_v5  ;;  %vm6428_vm15 = vmmov %vm6360_vm0 }
 0x3d1   : > { %v1552_v15 = vpop.f32.mrf.mxu2 }
 0x3d2   : > { %v1853_v26 = vpop.f32.mrf.mxu3 }
 0x3d3   : > { %v5367_v11 = vadd.f32 %v1853_v26, %v1544_v53  ;;  %v5369_v24 = vpop.f32.mrf.mxu0 }
 0x3d4   : > { %v5371_v43 = vpop.f32.mrf.mxu1 }
 0x3d5   : > { %6398 = vst [vmem:[#allocation75_spill] sm:$0xff] %v5367_v11  ;;  %v6404_v11 = vand.u32 4294901760, %v4640_v22 }
 0x3d6   : > { %1961 = vmatmul.f32.gmra.mxu2 %v4640_v22  ;;  %3182 = vmatmul.msk.f32.gmra.mxu0 %vm6399_vm7, %v4560_v51  ;;  %vm6430_vm7 = vmmov %vm6360_vm0 }
 0x3d7   : > { %2229 = vmatmul.f32.gmra.mxu3 %v6400_v60  ;;  %3230 = vmatmul.msk.f32.gmra.mxu1 %vm6401_vm10, %v4513_v45  ;;  %vm6432_vm10 = vmmov %vm6360_vm0 }
 0x3d9   : > { %v1560_v5 = vpop.f32.mrf.mxu2 }
 0x3da   : > { %v1857_v6 = vpop.f32.mrf.mxu3 }
 0x3db   : > { %v5380_v21 = vadd.f32 %v1857_v6, %v1552_v15  ;;  %v5382_v53 = vpop.f32.mrf.mxu0 }
 0x3dc   : > { %v5384_v26 = vpop.f32.mrf.mxu1 }
 0x3dd   : > { %6402 = vst [vmem:[#allocation76_spill] sm:$0xff] %v5380_v21  ;;  %v6408_v21 = vand.u32 4294901760, %v4683_v31 }
 0x3de   : > { %1966 = vmatmul.f32.gmra.mxu2 %v4683_v31  ;;  %3183 = vmatmul.msk.f32.gmra.mxu0 %vm6403_vm1, %v4605_v28  ;;  %vm6434_vm1 = vmmov %vm6360_vm0 }
 0x3df   : > { %2235 = vmatmul.f32.gmra.mxu3 %v6404_v11  ;;  %3231 = vmatmul.msk.f32.gmra.mxu1 %vm6405_vm14, %v4560_v51  ;;  %vm6436_vm14 = vmmov %vm6360_vm0 }
 0x3e1   : > { %v1568_v45 = vpop.f32.mrf.mxu2 }
 0x3e2   : > { %v1861_v1 = vpop.f32.mrf.mxu3 }
 0x3e3   : > { %v5393_v60 = vadd.f32 %v1861_v1, %v1560_v5  ;;  %v5395_v15 = vpop.f32.mrf.mxu0 }
 0x3e4   : > { %v5397_v6 = vpop.f32.mrf.mxu1 }
 0x3e5   : > { %6406 = vst [vmem:[#allocation77_spill] sm:$0xff] %v5393_v60  ;;  %v6411_v60 = vand.u32 4294901760, %v4719_v47 }
 0x3e6   : > { %1971 = vmatmul.f32.gmra.mxu2 %v4719_v47  ;;  %3184 = vmatmul.msk.f32.gmra.mxu0 %vm6407_vm11, %v4651_v17  ;;  %vm6438_vm11 = vmmov %vm6360_vm0 }
 0x3e7   : > { %2241 = vmatmul.f32.gmra.mxu3 %v6408_v21  ;;  %3232 = vmatmul.msk.f32.gmra.mxu1 %vm6409_vm8, %v4605_v28  ;;  %vm6440_vm8 = vmmov %vm6360_vm0 }
 0x3e9   : > { %v1576_v51 = vpop.f32.mrf.mxu2 }
 0x3ea   : > { %v1865_v22 = vpop.f32.mrf.mxu3 }
 0x3eb   : > { %v5406_v11 = vadd.f32 %v1865_v22, %v1568_v45  ;;  %v5408_v5 = vpop.f32.mrf.mxu0 }
 0x3ec   : > { %v5410_v1 = vpop.f32.mrf.mxu1 }
 0x3ed   : > { %6410 = vst [vmem:[#allocation78_spill] sm:$0xff] %v5406_v11  ;;  %v6415_v11 = vand.u32 4294901760, %v4750_v33 }
 0x3ee   : > { %1976 = vmatmul.f32.gmra.mxu2 %v4750_v33  ;;  %3185 = vmatmul.msk.f32.gmra.mxu0 %vm6360_vm0, %v4690_v63 }
 0x3ef   : > { %2247 = vmatmul.f32.gmra.mxu3 %v6411_v60  ;;  %3233 = vmatmul.msk.f32.gmra.mxu1 %vm6412_vm9, %v4651_v17  ;;  %vm6444_vm9 = vmmov %vm6360_vm0 }
 0x3f1   : > { %v1584_v28 = vpop.f32.mrf.mxu2 }
 0x3f2   : > { %v1869_v31 = vpop.f32.mrf.mxu3 }
 0x3f3   : > { %v5419_v21 = vadd.f32 %v1869_v31, %v1576_v51  ;;  %v5421_v45 = vpop.f32.mrf.mxu0 }
 0x3f4   : > { %v5423_v22 = vpop.f32.mrf.mxu1 }
 0x3f5   : > { %6413 = vst [vmem:[#allocation79_spill] sm:$0xff] %v5419_v21  ;;  %v6419_v21 = vand.u32 4294901760, %v4782_v46 }
 0x3f6   : > { %1981 = vmatmul.f32.gmra.mxu2 %v4782_v46  ;;  %3186 = vmatmul.msk.f32.gmra.mxu0 %vm6414_vm5, %v4724_v35  ;;  %vm6448_vm5 = vmmov %vm6360_vm0 }
 0x3f7   : > { %2253 = vmatmul.f32.gmra.mxu3 %v6415_v11  ;;  %3234 = vmatmul.msk.f32.gmra.mxu1 %vm6416_vm13, %v4690_v63  ;;  %vm6450_vm13 = vmmov %vm6360_vm0 }
 0x3f9   : > { %v1592_v17 = vpop.f32.mrf.mxu2 }
 0x3fa   : > { %v1873_v47 = vpop.f32.mrf.mxu3 }
 0x3fb   : > { %v5432_v60 = vadd.f32 %v1873_v47, %v1584_v28  ;;  %v5434_v51 = vpop.f32.mrf.mxu0 }
 0x3fc   : > { %v5436_v31 = vpop.f32.mrf.mxu1 }
 0x3fd   : > { %6417 = vst [vmem:[#allocation80_spill] sm:$0xff] %v5432_v60  ;;  %v6423_v60 = vand.u32 4294901760, %v4802_v36 }
 0x3fe   : > { %1986 = vmatmul.f32.gmra.mxu2 %v4802_v36  ;;  %3187 = vmatmul.msk.f32.gmra.mxu0 %vm6418_vm3, %v4755_v0  ;;  %vm6454_vm3 = vmmov %vm6360_vm0 }
 0x3ff   : > { %2259 = vmatmul.f32.gmra.mxu3 %v6419_v21  ;;  %3235 = vmatmul.msk.f32.gmra.mxu1 %vm6420_vm4, %v4724_v35  ;;  %vm6456_vm4 = vmmov %vm6360_vm0 }
 0x401   : > { %v1600_v63 = vpop.f32.mrf.mxu2 }
 0x402   : > { %v1877_v33 = vpop.f32.mrf.mxu3 }
 0x403   : > { %v5445_v11 = vadd.f32 %v1877_v33, %v1592_v17  ;;  %v5447_v28 = vpop.f32.mrf.mxu0 }
 0x404   : > { %v5449_v47 = vpop.f32.mrf.mxu1 }
 0x405   : > { %6421 = vst [vmem:[#allocation81_spill] sm:$0xff] %v5445_v11  ;;  %v6427_v11 = vand.u32 4294901760, %v4831_v13 }
 0x406   : > { %1991 = vmatmul.f32.gmra.mxu2 %v4831_v13  ;;  %3188 = vmatmul.msk.f32.gmra.mxu0 %vm6422_vm12, %v4773_v54  ;;  %vm6459_vm12 = vmmov %vm6360_vm0 }
 0x407   : > { %2265 = vmatmul.f32.gmra.mxu3 %v6423_v60  ;;  %3236 = vmatmul.msk.f32.gmra.mxu1 %vm6424_vm6, %v4755_v0  ;;  %vm6462_vm6 = vmmov %vm6360_vm0 }
 0x409   : > { %v1608_v35 = vpop.f32.mrf.mxu2 }
 0x40a   : > { %v1881_v46 = vpop.f32.mrf.mxu3 }
 0x40b   : > { %v5458_v21 = vadd.f32 %v1881_v46, %v1600_v63  ;;  %v5460_v17 = vpop.f32.mrf.mxu0 }
 0x40c   : > { %v5462_v33 = vpop.f32.mrf.mxu1 }
 0x40d   : > { %6425 = vst [vmem:[#allocation82_spill] sm:$0xff] %v5458_v21  ;;  %v6431_v21 = vand.u32 4294901760, %v4869_v32 }
 0x40e   : > { %1996 = vmatmul.f32.gmra.mxu2 %v4869_v32  ;;  %3189 = vmatmul.msk.f32.gmra.mxu0 %vm6426_vm2, %v4814_v40  ;;  %vm6465_vm2 = vmmov %vm6360_vm0 }
 0x40f   : > { %2271 = vmatmul.f32.gmra.mxu3 %v6427_v11  ;;  %3237 = vmatmul.msk.f32.gmra.mxu1 %vm6428_vm15, %v4773_v54  ;;  %vm6469_vm15 = vmmov %vm6360_vm0 }
 0x411   : > { %v1616_v0 = vpop.f32.mrf.mxu2 }
 0x412   : > { %v1885_v36 = vpop.f32.mrf.mxu3 }
 0x413   : > { %v5471_v60 = vadd.f32 %v1885_v36, %v1608_v35  ;;  %v5473_v63 = vpop.f32.mrf.mxu0 }
 0x414   : > { %v5475_v46 = vpop.f32.mrf.mxu1 }
 0x415   : > { %6429 = vst [vmem:[#allocation83_spill] sm:$0xff] %v5471_v60  ;;  %v6435_v60 = vand.u32 4294901760, %v4891_v10 }
 0x416   : > { %2001 = vmatmul.f32.gmra.mxu2 %v4891_v10  ;;  %3190 = vmatmul.msk.f32.gmra.mxu0 %vm6430_vm7, %v4844_v37  ;;  %vm3016_vm7 = vcmask 244736  }
 0x417   : > { %2277 = vmatmul.f32.gmra.mxu3 %v6431_v21  ;;  %3238 = vmatmul.msk.f32.gmra.mxu1 %vm6432_vm10, %v4814_v40  ;;  %vm6472_vm10 = vmmov %vm6360_vm0 }
 0x419   : > { %v1624_v13 = vpop.f32.mrf.mxu2 }
 0x41a   : > { %v1889_v54 = vpop.f32.mrf.mxu3 }
 0x41b   : > { %v5484_v11 = vadd.f32 %v1889_v54, %v1616_v0  ;;  %v5486_v35 = vpop.f32.mrf.mxu0 }
 0x41c   : > { %v5488_v36 = vpop.f32.mrf.mxu1 }
 0x41d   : > { %6433 = vst [vmem:[#allocation84_spill] sm:$0xff] %v5484_v11  ;;  %v6439_v11 = vand.u32 4294901760, %v4929_v52 }
 0x41e   : > { %2006 = vmatmul.f32.gmra.mxu2 %v4929_v52  ;;  %3191 = vmatmul.msk.f32.gmra.mxu0 %vm6434_vm1, %v4874_v39  ;;  %vm6476_vm1 = vmmov %vm6360_vm0 }
 0x41f   : > { %2283 = vmatmul.f32.gmra.mxu3 %v6435_v60  ;;  %3239 = vmatmul.msk.f32.gmra.mxu1 %vm6436_vm14, %v4844_v37  ;;  %vm6479_vm14 = vmmov %vm6360_vm0 }
 0x421   : > { %v1632_v40 = vpop.f32.mrf.mxu2 }
 0x422   : > { %v1893_v32 = vpop.f32.mrf.mxu3 }
 0x423   : > { %v5497_v21 = vadd.f32 %v1893_v32, %v1624_v13  ;;  %v5499_v0 = vpop.f32.mrf.mxu0 }
 0x424   : > { %v5501_v54 = vpop.f32.mrf.mxu1 }
 0x425   : > { %6437 = vst [vmem:[#allocation85_spill] sm:$0xff] %v5497_v21  ;;  %v6443_v21 = vand.u32 4294901760, %v4951_v30 }
 0x426   : > { %2011 = vmatmul.f32.gmra.mxu2 %v4951_v30  ;;  %3192 = vmatmul.msk.f32.gmra.mxu0 %vm6438_vm11, %v4904_v56  ;;  %v6449_v30 = vand.u32 4294901760, %v4989_v14  ;;  %vm6483_vm11 = vmmov %vm6360_vm0 }
 0x427   : > { %2289 = vmatmul.f32.gmra.mxu3 %v6439_v11  ;;  %3240 = vmatmul.msk.f32.gmra.mxu1 %vm6440_vm8, %v4874_v39  ;;  %vm6485_vm8 = vmmov %vm6360_vm0 }
 0x429   : > { %v1640_v37 = vpop.f32.mrf.mxu2 }
 0x42a   : > { %v1897_v10 = vpop.f32.mrf.mxu3 }
 0x42b   : > { %v5510_v60 = vadd.f32 %v1897_v10, %v1632_v40  ;;  %v5512_v13 = vpop.f32.mrf.mxu0 }
 0x42c   : > { %6442 = vst [vmem:[#allocation87_spill] sm:$0xff] %v5512_v13  ;;  %v5514_v32 = vpop.f32.mrf.mxu1  ;;  %v6477_v13 = vld [vmem:[#allocation53_spill] sm:$0xff] }
 0x42d   : > { %6441 = vst [vmem:[#allocation86_spill] sm:$0xff] %v5510_v60  ;;  %v6455_v60 = vand.u32 4294901760, %v5012_v61 }
 0x42e   : > { %2016 = vmatmul.f32.gmra.mxu2 %v4989_v14  ;;  %3193 = vmatmul.msk.f32.gmra.mxu0 %vm6360_vm0, %v4934_v58 }
 0x42f   : > { %2295 = vmatmul.f32.gmra.mxu3 %v6443_v21  ;;  %3241 = vmatmul.msk.f32.gmra.mxu1 %vm6444_vm9, %v4904_v56  ;;  %vm6488_vm9 = vmmov %vm6360_vm0 }
 0x431   : > { %v1648_v39 = vpop.f32.mrf.mxu2 }
 0x432   : > { %v1901_v52 = vpop.f32.mrf.mxu3 }
 0x433   : > { %v5523_v11 = vadd.f32 %v1901_v52, %v1640_v37  ;;  %v5525_v40 = vpop.f32.mrf.mxu0 }
 0x434   : > { %6446 = vst [vmem:[#allocation89_spill] sm:$0xff] %v5525_v40  ;;  %v5527_v10 = vpop.f32.mrf.mxu1 }
 0x435   : > { %6445 = vst [vmem:[#allocation88_spill] sm:$0xff] %v5523_v11 }
 0x436   : > { %6447 = vst [vmem:[#allocation90_spill] sm:$0xff] %v5527_v10  ;;  %2021 = vmatmul.f32.gmra.mxu2 %v5012_v61  ;;  %3194 = vmatmul.msk.f32.gmra.mxu0 %vm6448_vm5, %v4964_v55  ;;  %v6460_v61 = vld [vmem:[#allocation44_spill] sm:$0xff]  ;;  %vm6491_vm5 = vmmov %vm6360_vm0 }
 0x437   : > { %2301 = vmatmul.f32.gmra.mxu3 %v6449_v30  ;;  %3242 = vmatmul.msk.f32.gmra.mxu1 %vm6450_vm13, %v4934_v58  ;;  %vm6492_vm13 = vmmov %vm6360_vm0 }
 0x439   : > { %v1656_v56 = vpop.f32.mrf.mxu2 }
 0x43a   : > { %v1905_v21 = vpop.f32.mrf.mxu3 }
 0x43b   : > { %v5536_v37 = vadd.f32 %v1905_v21, %v1648_v39  ;;  %v5538_v52 = vpop.f32.mrf.mxu0 }
 0x43c   : > { %6452 = vst [vmem:[#allocation92_spill] sm:$0xff] %v5538_v52  ;;  %v5540_v11 = vpop.f32.mrf.mxu1  ;;  %v6463_v52 = vld [vmem:[#allocation41_spill] sm:$0xff] }
 0x43d   : > { %6451 = vst [vmem:[#allocation91_spill] sm:$0xff] %v5536_v37 }
 0x43e   : > { %6453 = vst [vmem:[#allocation93_spill] sm:$0xff] %v5540_v11  ;;  %2026 = vmatmul.f32.gmra.mxu2 %v5041_v19  ;;  %3195 = vmatmul.msk.f32.gmra.mxu0 %vm6454_vm3, %v4994_v59  ;;  %v6464_v11 = vld [vmem:[#allocation36_spill] sm:$0xff]  ;;  %vm6494_vm3 = vmmov %vm6360_vm0 }
 0x43f   : > { %2307 = vmatmul.f32.gmra.mxu3 %v6455_v60  ;;  %3243 = vmatmul.msk.f32.gmra.mxu1 %vm6456_vm4, %v4964_v55  ;;  %v1718_v60 = vadd.f32 %v6460_v61, %v5072_v49  ;;  %v6461_v55 = vand.u32 4294901760, %v5041_v19  ;;  %v6466_v49 = vld [vmem:[#allocation42_spill] sm:$0xff]  ;;  %v6467_v19 = vld [vmem:[#allocation52_spill] sm:$0xff]  ;;  %vm6495_vm4 = vmmov %vm6360_vm0 }
 0x440   : > { %v1722_v61 = vadd.f32 %v6467_v19, %v6466_v49  ;;  %v6473_v49 = vld [vmem:[#allocation50_spill] sm:$0xff] }
 0x441   : > { %v1947_v58 = vpop.f32.mrf.mxu2  ;;  %v6474_v19 = vld [vmem:[#allocation58_spill] sm:$0xff] }
 0x442   : > { %v1909_v14 = vpop.f32.mrf.mxu3 }
 0x443   : > { %v5551_v39 = vadd.f32 %v1909_v14, %v1656_v56  ;;  %v2551_v30 = vpop.f32.mrf.mxu0  ;;  %v1948_v56 = vadd.f32 %v1947_v58, %v1718_v60 }
 0x444   : > { %v5553_v21 = vpop.f32.mrf.mxu1 }
 0x445   : > { %6457 = vst [vmem:[#allocation94_spill] sm:$0xff] %v5551_v39 }
 0x446   : > { %6458 = vst [vmem:[#allocation95_spill] sm:$0xff] %v5553_v21  ;;  %2031 = vmatmul.f32.gmra.mxu2 %v5081_v44  ;;  %3196 = vmatmul.msk.f32.gmra.mxu0 %vm6459_vm12, %v5024_v23  ;;  %vm6497_vm12 = vmmov %vm6360_vm0 }
 0x447   : > { %2313 = vmatmul.f32.gmra.mxu3 %v6461_v55  ;;  %3244 = vmatmul.msk.f32.gmra.mxu1 %vm6462_vm6, %v4994_v59  ;;  %v6468_v59 = vand.u32 4294901760, %v5081_v44  ;;  %vm6499_vm6 = vmmov %vm6360_vm0 }
 0x449   : > { %v1952_v14 = vpop.f32.mrf.mxu2 }
 0x44a   : > { %v2218_v39 = vpop.f32.mrf.mxu3 }
 0x44b   : > { %v2219_v37 = vadd.f32 %v2218_v39, %v1948_v56  ;;  %v2555_v18 = vpop.f32.mrf.mxu0  ;;  %v6470_v56 = vld [vmem:[#allocation48_spill] sm:$0xff] }
 0x44c   : > { %v2772_v62 = vpop.f32.mrf.mxu1 }
 0x44d   : > { %v2552_v21 = vadd.f32 %v2551_v30, %v2219_v37  ;;  %v1953_v37 = vadd.f32 %v1952_v14, %v1722_v61  ;;  %v6475_v14 = vand.u32 4294901760, %v6463_v52 }
 0x44e   : > { %2036 = vmatmul.f32.gmra.mxu2 %v6463_v52  ;;  %3197 = vmatmul.msk.f32.gmra.mxu0 %vm6465_vm2, %v6464_v11  ;;  %v6480_v52 = vld [vmem:[#allocation57_spill] sm:$0xff]  ;;  %vm6501_vm2 = vmmov %vm6360_vm0 }
 0x44f   : > { %v2773_v55 = vadd.f32 %v2772_v62, %v2552_v21  ;;  %2319 = vmatmul.f32.gmra.mxu3 %v6468_v59  ;;  %3245 = vmatmul.msk.f32.gmra.mxu1 %vm6469_vm15, %v5024_v23  ;;  %v6471_v23 = vld [vmem:[#allocation39_spill] sm:$0xff]  ;;  %v1726_v59 = vadd.f32 %v6474_v19, %v6473_v49  ;;  %vm6504_vm15 = vmmov %vm6360_vm0 }
 0x451   : > { %v2967_v58 = vmin.f32 %v2773_v55, 1.0  ;;  %v1957_v39 = vpop.f32.mrf.mxu2 }
 0x452   : > { %v2224_v30 = vpop.f32.mrf.mxu3  ;;  %v1958_v61 = vadd.f32 %v1957_v39, %v1726_v59 }
 0x453   : > { %3017 = vst.msk [vmem:[%s5576_s20] sm:$0xff] %vm3016_vm7, %v2967_v58  ;;  %v2225_v62 = vadd.f32 %v2224_v30, %v1953_v37  ;;  %v2559_v44 = vpop.f32.mrf.mxu0 }
 0x454   : > { %v2776_v21 = vpop.f32.mrf.mxu1 }
 0x455   : > { %v2556_v60 = vadd.f32 %v2555_v18, %v2225_v62 }
 0x456   : > { %2041 = vmatmul.f32.gmra.mxu2 %v6470_v56  ;;  %3198 = vmatmul.msk.f32.gmra.mxu0 %vm6472_vm10, %v6471_v23  ;;  %vm6506_vm10 = vmmov %vm6360_vm0 }
 0x457   : > { %v2777_v40 = vadd.f32 %v2776_v21, %v2556_v60  ;;  %2325 = vmatmul.f32.gmra.mxu3 %v6475_v14  ;;  %3246 = vmatmul.msk.f32.gmra.mxu1 %vm6476_vm1, %v6464_v11  ;;  %v6478_v21 = vld [vmem:[#allocation45_spill] sm:$0xff]  ;;  %v6481_v60 = vld [vmem:[#allocation64_spill] sm:$0xff]  ;;  %vm6509_vm1 = vmmov %vm6360_vm0 }
 0x458   : > { %v1730_v49 = vadd.f32 %v6481_v60, %v6480_v52 }
 0x459   : > { %v2968_v55 = vmin.f32 %v2777_v40, 1.0  ;;  %v1962_v37 = vpop.f32.mrf.mxu2  ;;  %v6482_v40 = vand.u32 4294901760, %v6470_v56 }
 0x45a   : > { %v2230_v58 = vpop.f32.mrf.mxu3  ;;  %v1963_v39 = vadd.f32 %v1962_v37, %v1730_v49  ;;  %v6487_v37 = vand.u32 4294901760, %v6477_v13 }
 0x45b   : > { %3018 = vst.msk [vmem:[%s5576_s20 + $0x8] sm:$0xff] %vm3016_vm7, %v2968_v55  ;;  %v2231_v18 = vadd.f32 %v2230_v58, %v1958_v61  ;;  %v2563_v30 = vpop.f32.mrf.mxu0 }
 0x45c   : > { %v2780_v62 = vpop.f32.mrf.mxu1 }
 0x45d   : > { %v2560_v10 = vadd.f32 %v2559_v44, %v2231_v18  ;;  %v6484_v18 = vld [vmem:[#allocation59_spill] sm:$0xff] }
 0x45e   : > { %2046 = vmatmul.f32.gmra.mxu2 %v6477_v13  ;;  %3199 = vmatmul.msk.f32.gmra.mxu0 %vm6479_vm14, %v6478_v21  ;;  %vm6511_vm14 = vmmov %vm6360_vm0 }
 0x45f   : > { %v2781_v11 = vadd.f32 %v2780_v62, %v2560_v10  ;;  %2331 = vmatmul.f32.gmra.mxu3 %v6482_v40  ;;  %3247 = vmatmul.msk.f32.gmra.mxu1 %vm6483_vm11, %v6471_v23  ;;  %v6486_v10 = vld [vmem:[#allocation63_spill] sm:$0xff]  ;;  %vm6514_vm11 = vmmov %vm6360_vm0 }
 0x460   : > { %v1734_v56 = vadd.f32 %v5268_v29, %v6486_v10  ;;  %v6489_v29 = vld [vmem:[#allocation68_spill] sm:$0xff] }
 0x461   : > { %v2969_v19 = vmin.f32 %v2781_v11, 1.0  ;;  %v1967_v59 = vpop.f32.mrf.mxu2  ;;  %v1738_v13 = vadd.f32 %v5298_v2, %v6489_v29  ;;  %v1742_v2 = vadd.f32 %v5320_v20, %v5296_v50  ;;  %v1746_v20 = vadd.f32 %v5334_v12, %v5318_v34 }
 0x462   : > { %v2236_v14 = vpop.f32.mrf.mxu3  ;;  %v1968_v62 = vadd.f32 %v1967_v59, %v1734_v56  ;;  %v6500_v34 = vand.u32 4294901760, %v5314_v4 }
 0x463   : > { %3019 = vst.msk [vmem:[%s5576_s20 + $0x10] sm:$0xff] %vm3016_vm7, %v2969_v19  ;;  %v2237_v44 = vadd.f32 %v2236_v14, %v1963_v39  ;;  %v2567_v61 = vpop.f32.mrf.mxu0  ;;  %v6490_v19 = vand.u32 4294901760, %v6484_v18 }
 0x464   : > { %v2784_v55 = vpop.f32.mrf.mxu1 }
 0x465   : > { %v2564_v58 = vadd.f32 %v2563_v30, %v2237_v44 }
 0x466   : > { %2051 = vmatmul.f32.gmra.mxu2 %v6484_v18  ;;  %3200 = vmatmul.msk.f32.gmra.mxu0 %vm6485_vm8, %v5154_v25  ;;  %v6493_v18 = vand.u32 4294901760, %v5253_v8  ;;  %vm6516_vm8 = vmmov %vm6360_vm0 }
 0x467   : > { %v2785_v23 = vadd.f32 %v2784_v55, %v2564_v58  ;;  %2337 = vmatmul.f32.gmra.mxu3 %v6487_v37  ;;  %3248 = vmatmul.msk.f32.gmra.mxu1 %vm6360_vm0, %v6478_v21 }
 0x469   : > { %v2970_v52 = vmin.f32 %v2785_v23, 1.0  ;;  %v1972_v60 = vpop.f32.mrf.mxu2 }
 0x46a   : > { %v2242_v49 = vpop.f32.mrf.mxu3  ;;  %v1973_v59 = vadd.f32 %v1972_v60, %v1738_v13 }
 0x46b   : > { %3020 = vst.msk [vmem:[%s5576_s20 + $0x18] sm:$0xff] %vm3016_vm7, %v2970_v52  ;;  %v2243_v30 = vadd.f32 %v2242_v49, %v1968_v62  ;;  %v2571_v11 = vpop.f32.mrf.mxu0 }
 0x46c   : > { %v2788_v40 = vpop.f32.mrf.mxu1 }
 0x46d   : > { %v2568_v39 = vadd.f32 %v2567_v61, %v2243_v30 }
 0x46e   : > { %2056 = vmatmul.f32.gmra.mxu2 %v5253_v8  ;;  %3201 = vmatmul.msk.f32.gmra.mxu0 %vm6488_vm9, %v5188_v48  ;;  %v6496_v8 = vand.u32 4294901760, %v5287_v27  ;;  %vm6520_vm9 = vmmov %vm6360_vm0 }
 0x46f   : > { %v2789_v21 = vadd.f32 %v2788_v40, %v2568_v39  ;;  %2343 = vmatmul.f32.gmra.mxu3 %v6490_v19  ;;  %3249 = vmatmul.msk.f32.gmra.mxu1 %vm6491_vm5, %v5154_v25  ;;  %vm6523_vm5 = vmmov %vm6360_vm0 }
 0x471   : > { %v2971_v14 = vmin.f32 %v2789_v21, 1.0  ;;  %v1977_v44 = vpop.f32.mrf.mxu2 }
 0x472   : > { %v2248_v55 = vpop.f32.mrf.mxu3  ;;  %v1978_v23 = vadd.f32 %v1977_v44, %v1742_v2 }
 0x473   : > { %3021 = vst.msk [vmem:[%s5576_s20 + $0x20] sm:$0xff] %vm3016_vm7, %v2971_v14  ;;  %v2249_v61 = vadd.f32 %v2248_v55, %v1973_v59  ;;  %v2575_v58 = vpop.f32.mrf.mxu0  ;;  %v6498_v14 = vld [vmem:[#allocation3_spill] sm:$0xff] }
 0x474   : > { %v2792_v10 = vpop.f32.mrf.mxu1 }
 0x475   : > { %v2572_v56 = vadd.f32 %v2571_v11, %v2249_v61 }
 0x476   : > { %2061 = vmatmul.f32.gmra.mxu2 %v5287_v27  ;;  %3202 = vmatmul.msk.f32.gmra.mxu0 %vm6492_vm13, %v5222_v16  ;;  %v1750_v27 = vadd.f32 %v5345_v7, %v5332_v42  ;;  %v6503_v42 = vld [vmem:[#allocation2_spill] sm:$0xff]  ;;  %v6505_v7 = vand.u32 4294901760, %v6498_v14  ;;  %vm6525_vm13 = vmmov %vm6360_vm0 }
 0x477   : > { %v2793_v25 = vadd.f32 %v2792_v10, %v2572_v56  ;;  %2349 = vmatmul.f32.gmra.mxu3 %v6493_v18  ;;  %3250 = vmatmul.msk.f32.gmra.mxu1 %vm6494_vm3, %v5188_v48  ;;  %vm6528_vm3 = vmmov %vm6360_vm0 }
 0x479   : > { %v2972_v37 = vmin.f32 %v2793_v25, 1.0  ;;  %v1982_v62 = vpop.f32.mrf.mxu2  ;;  %v6502_v25 = vld [vmem:[#allocation5_spill] sm:$0xff] }
 0x47a   : > { %v2254_v52 = vpop.f32.mrf.mxu3  ;;  %v1983_v50 = vadd.f32 %v1982_v62, %v1746_v20  ;;  %v6510_v20 = vand.u32 4294901760, %v6502_v25 }
 0x47b   : > { %3022 = vst.msk [vmem:[%s5576_s20 + $0x28] sm:$0xff] %vm3016_vm7, %v2972_v37  ;;  %v2255_v60 = vadd.f32 %v2254_v52, %v1978_v23  ;;  %v2579_v49 = vpop.f32.mrf.mxu0 }
 0x47c   : > { %v2796_v30 = vpop.f32.mrf.mxu1 }
 0x47d   : > { %v2576_v11 = vadd.f32 %v2575_v58, %v2255_v60 }
 0x47e   : > { %2066 = vmatmul.f32.gmra.mxu2 %v5314_v4  ;;  %3203 = vmatmul.msk.f32.gmra.mxu0 %vm6495_vm4, %v5258_v3  ;;  %v1754_v4 = vadd.f32 %v5358_v38, %v5343_v9  ;;  %v6508_v9 = vld [vmem:[#allocation4_spill] sm:$0xff]  ;;  %v1758_v38 = vadd.f32 %v5371_v43, %v5356_v57  ;;  %v6513_v57 = vld [vmem:[#allocation6_spill] sm:$0xff]  ;;  %v1762_v43 = vadd.f32 %v5384_v26, %v5369_v24  ;;  %vm6530_vm4 = vmmov %vm6360_vm0 }
 0x47f   : > { %v2797_v48 = vadd.f32 %v2796_v30, %v2576_v11  ;;  %2355 = vmatmul.f32.gmra.mxu3 %v6496_v8  ;;  %3251 = vmatmul.msk.f32.gmra.mxu1 %vm6497_vm12, %v5222_v16  ;;  %v6507_v11 = vld [vmem:[#allocation7_spill] sm:$0xff]  ;;  %v6518_v24 = vld [vmem:[#allocation8_spill] sm:$0xff]  ;;  %v1766_v26 = vadd.f32 %v5397_v6, %v5382_v53  ;;  %v6522_v53 = vld [vmem:[#allocation10_spill] sm:$0xff]  ;;  %v1770_v6 = vadd.f32 %v5410_v1, %v5395_v15 }
 0x480   : > { %v6527_v15 = vld [vmem:[#allocation12_spill] sm:$0xff]  ;;  %v1774_v1 = vadd.f32 %v5423_v22, %v5408_v5  ;;  %v6532_v5 = vld [vmem:[#allocation14_spill] sm:$0xff]  ;;  %vm6533_vm12 = vmmov %vm6360_vm0  ;;  %v1778_v22 = vadd.f32 %v5436_v31, %v5421_v45  ;;  %v1782_v31 = vadd.f32 %v5449_v47, %v5434_v51  ;;  %v1786_v47 = vadd.f32 %v5462_v33, %v5447_v28 }
 0x481   : > { %v2973_v40 = vmin.f32 %v2797_v48, 1.0  ;;  %v1987_v39 = vpop.f32.mrf.mxu2  ;;  %v6537_v45 = vld [vmem:[#allocation16_spill] sm:$0xff]  ;;  %v6542_v51 = vld [vmem:[#allocation18_spill] sm:$0xff]  ;;  %v1790_v33 = vadd.f32 %v5475_v46, %v5460_v17  ;;  %v1794_v46 = vadd.f32 %v5488_v36, %v5473_v63  ;;  %v1798_v36 = vadd.f32 %v5501_v54, %v5486_v35 }
 0x482   : > { %v2260_v29 = vpop.f32.mrf.mxu3  ;;  %v1988_v12 = vadd.f32 %v1987_v39, %v1750_v27  ;;  %v6547_v28 = vld [vmem:[#allocation20_spill] sm:$0xff]  ;;  %v6552_v17 = vld [vmem:[#allocation22_spill] sm:$0xff]  ;;  %v1802_v54 = vadd.f32 %v5514_v32, %v5499_v0  ;;  %v6568_v32 = vld [vmem:[#allocation87_spill] sm:$0xff] }
 0x483   : > { %3023 = vst.msk [vmem:[%s5576_s20 + $0x30] sm:$0xff] %vm3016_vm7, %v2973_v40  ;;  %v2261_v13 = vadd.f32 %v2260_v29, %v1983_v50  ;;  %v2583_v21 = vpop.f32.mrf.mxu0  ;;  %v6556_v63 = vld [vmem:[#allocation24_spill] sm:$0xff]  ;;  %v6561_v35 = vld [vmem:[#allocation26_spill] sm:$0xff] }
 0x484   : > { %v2800_v19 = vpop.f32.mrf.mxu1  ;;  %v6566_v0 = vld [vmem:[#allocation28_spill] sm:$0xff] }
 0x485   : > { %v2580_v59 = vadd.f32 %v2579_v49, %v2261_v13 }
 0x486   : > { %2071 = vmatmul.f32.gmra.mxu2 %v6498_v14  ;;  %3204 = vmatmul.msk.f32.gmra.mxu0 %vm6499_vm6, %v5292_v41  ;;  %v6515_v14 = vand.u32 4294901760, %v6507_v11  ;;  %vm6535_vm6 = vmmov %vm6360_vm0 }
 0x487   : > { %v2801_v16 = vadd.f32 %v2800_v19, %v2580_v59  ;;  %2361 = vmatmul.f32.gmra.mxu3 %v6500_v34  ;;  %3252 = vmatmul.msk.f32.gmra.mxu1 %vm6501_vm2, %v5258_v3  ;;  %v6512_v19 = vld [vmem:[#allocation9_spill] sm:$0xff]  ;;  %vm6538_vm2 = vmmov %vm6360_vm0 }
 0x489   : > { %v2974_v44 = vmin.f32 %v2801_v16, 1.0  ;;  %v1992_v55 = vpop.f32.mrf.mxu2 }
 0x48a   : > { %v2266_v61 = vpop.f32.mrf.mxu3  ;;  %v1993_v18 = vadd.f32 %v1992_v55, %v1754_v4 }
 0x48b   : > { %3024 = vst.msk [vmem:[%s5576_s20 + $0x38] sm:$0xff] %vm3016_vm7, %v2974_v44  ;;  %v2267_v58 = vadd.f32 %v2266_v61, %v1988_v12  ;;  %v2587_v10 = vpop.f32.mrf.mxu0 }
 0x48c   : > { %v2804_v56 = vpop.f32.mrf.mxu1 }
 0x48d   : > { %v2584_v2 = vadd.f32 %v2583_v21, %v2267_v58 }
 0x48e   : > { %2076 = vmatmul.f32.gmra.mxu2 %v6502_v25  ;;  %3205 = vmatmul.msk.f32.gmra.mxu0 %vm6504_vm15, %v6503_v42  ;;  %vm6540_vm15 = vmmov %vm6360_vm0 }
 0x48f   : > { %v2805_v3 = vadd.f32 %v2804_v56, %v2584_v2  ;;  %2367 = vmatmul.f32.gmra.mxu3 %v6505_v7  ;;  %3253 = vmatmul.msk.f32.gmra.mxu1 %vm6506_vm10, %v5292_v41  ;;  %v6519_v2 = vand.u32 4294901760, %v6512_v19  ;;  %vm6543_vm10 = vmmov %vm6360_vm0 }
 0x491   : > { %v2975_v23 = vmin.f32 %v2805_v3, 1.0  ;;  %v1997_v37 = vpop.f32.mrf.mxu2 }
 0x492   : > { %v2272_v62 = vpop.f32.mrf.mxu3  ;;  %v1998_v48 = vadd.f32 %v1997_v37, %v1758_v38 }
 0x493   : > { %3025 = vst.msk [vmem:[%s5576_s20 + $0x40] sm:$0xff] %vm3016_vm7, %v2975_v23  ;;  %v2273_v52 = vadd.f32 %v2272_v62, %v1993_v18  ;;  %v2591_v60 = vpop.f32.mrf.mxu0  ;;  %v6521_v62 = vld [vmem:[#allocation13_spill] sm:$0xff] }
 0x494   : > { %v2808_v49 = vpop.f32.mrf.mxu1 }
 0x495   : > { %v2588_v30 = vadd.f32 %v2587_v10, %v2273_v52  ;;  %v6517_v10 = vld [vmem:[#allocation11_spill] sm:$0xff] }
 0x496   : > { %2081 = vmatmul.f32.gmra.mxu2 %v6507_v11  ;;  %3206 = vmatmul.msk.f32.gmra.mxu0 %vm6509_vm1, %v6508_v9  ;;  %vm6545_vm1 = vmmov %vm6360_vm0 }
 0x497   : > { %v2809_v41 = vadd.f32 %v2808_v49, %v2588_v30  ;;  %2373 = vmatmul.f32.gmra.mxu3 %v6510_v20  ;;  %3254 = vmatmul.msk.f32.gmra.mxu1 %vm6511_vm14, %v6503_v42  ;;  %vm6548_vm14 = vmmov %vm6360_vm0 }
 0x499   : > { %v2976_v8 = vmin.f32 %v2809_v41, 1.0  ;;  %v2002_v50 = vpop.f32.mrf.mxu2 }
 0x49a   : > { %v2278_v40 = vpop.f32.mrf.mxu3  ;;  %v2003_v27 = vadd.f32 %v2002_v50, %v1762_v43 }
 0x49b   : > { %3026 = vst.msk [vmem:[%s5576_s20 + $0x48] sm:$0xff] %vm3016_vm7, %v2976_v8  ;;  %v2279_v39 = vadd.f32 %v2278_v40, %v1998_v48  ;;  %v2595_v29 = vpop.f32.mrf.mxu0  ;;  %v6526_v8 = vld [vmem:[#allocation15_spill] sm:$0xff]  ;;  %v6529_v40 = vand.u32 4294901760, %v6521_v62 }
 0x49c   : > { %v2812_v13 = vpop.f32.mrf.mxu1 }
 0x49d   : > { %v2592_v21 = vadd.f32 %v2591_v60, %v2279_v39  ;;  %v6524_v60 = vand.u32 4294901760, %v6517_v10 }
 0x49e   : > { %2086 = vmatmul.f32.gmra.mxu2 %v6512_v19  ;;  %3207 = vmatmul.msk.f32.gmra.mxu0 %vm6514_vm11, %v6513_v57  ;;  %vm6550_vm11 = vmmov %vm6360_vm0 }
 0x49f   : > { %v2813_v59 = vadd.f32 %v2812_v13, %v2592_v21  ;;  %2379 = vmatmul.f32.gmra.mxu3 %v6515_v14  ;;  %3255 = vmatmul.msk.f32.gmra.mxu1 %vm6516_vm8, %v6508_v9  ;;  %v6531_v14 = vld [vmem:[#allocation17_spill] sm:$0xff]  ;;  %vm6553_vm8 = vmmov %vm6360_vm0 }
 0x4a1   : > { %v2977_v16 = vmin.f32 %v2813_v59, 1.0  ;;  %v2007_v34 = vpop.f32.mrf.mxu2 }
 0x4a2   : > { %v2284_v12 = vpop.f32.mrf.mxu3  ;;  %v2008_v25 = vadd.f32 %v2007_v34, %v1766_v26  ;;  %v6536_v26 = vld [vmem:[#allocation19_spill] sm:$0xff] }
 0x4a3   : > { %3027 = vst.msk [vmem:[%s5576_s20 + $0x50] sm:$0xff] %vm3016_vm7, %v2977_v16  ;;  %v2285_v44 = vadd.f32 %v2284_v12, %v2003_v27  ;;  %v2599_v55 = vpop.f32.mrf.mxu0  ;;  %v6534_v16 = vand.u32 4294901760, %v6526_v8 }
 0x4a4   : > { %v2816_v61 = vpop.f32.mrf.mxu1 }
 0x4a5   : > { %v2596_v58 = vadd.f32 %v2595_v29, %v2285_v44 }
 0x4a6   : > { %2091 = vmatmul.f32.gmra.mxu2 %v6517_v10  ;;  %3208 = vmatmul.msk.f32.gmra.mxu0 %vm6360_vm0, %v6518_v24 }
 0x4a7   : > { %v2817_v56 = vadd.f32 %v2816_v61, %v2596_v58  ;;  %2385 = vmatmul.f32.gmra.mxu3 %v6519_v2  ;;  %3256 = vmatmul.msk.f32.gmra.mxu1 %vm6520_vm9, %v6513_v57  ;;  %v6539_v2 = vand.u32 4294901760, %v6531_v14  ;;  %vm6557_vm9 = vmmov %vm6360_vm0 }
 0x4a9   : > { %v2978_v42 = vmin.f32 %v2817_v56, 1.0  ;;  %v2012_v4 = vpop.f32.mrf.mxu2 }
 0x4aa   : > { %v2290_v3 = vpop.f32.mrf.mxu3  ;;  %v2013_v49 = vadd.f32 %v2012_v4, %v1770_v6  ;;  %v6544_v6 = vand.u32 4294901760, %v6536_v26 }
 0x4ab   : > { %3028 = vst.msk [vmem:[%s5576_s20 + $0x58] sm:$0xff] %vm3016_vm7, %v2978_v42  ;;  %v2291_v7 = vadd.f32 %v2290_v3, %v2008_v25  ;;  %v2603_v18 = vpop.f32.mrf.mxu0 }
 0x4ac   : > { %v2820_v23 = vpop.f32.mrf.mxu1 }
 0x4ad   : > { %v2600_v37 = vadd.f32 %v2599_v55, %v2291_v7 }
 0x4ae   : > { %2096 = vmatmul.f32.gmra.mxu2 %v6521_v62  ;;  %3209 = vmatmul.msk.f32.gmra.mxu0 %vm6523_vm5, %v6522_v53  ;;  %v6541_v62 = vld [vmem:[#allocation21_spill] sm:$0xff]  ;;  %vm6559_vm5 = vmmov %vm6360_vm0 }
 0x4af   : > { %v2821_v52 = vadd.f32 %v2820_v23, %v2600_v37  ;;  %2391 = vmatmul.f32.gmra.mxu3 %v6524_v60  ;;  %3257 = vmatmul.msk.f32.gmra.mxu1 %vm6525_vm13, %v6518_v24  ;;  %vm6562_vm13 = vmmov %vm6360_vm0 }
 0x4b1   : > { %v2979_v30 = vmin.f32 %v2821_v52, 1.0  ;;  %v2017_v11 = vpop.f32.mrf.mxu2 }
 0x4b2   : > { %v2296_v9 = vpop.f32.mrf.mxu3  ;;  %v2018_v39 = vadd.f32 %v2017_v11, %v1774_v1 }
 0x4b3   : > { %3029 = vst.msk [vmem:[%s5576_s20 + $0x60] sm:$0xff] %vm3016_vm7, %v2979_v30  ;;  %v2297_v38 = vadd.f32 %v2296_v9, %v2013_v49  ;;  %v2607_v41 = vpop.f32.mrf.mxu0 }
 0x4b4   : > { %v2824_v20 = vpop.f32.mrf.mxu1 }
 0x4b5   : > { %v2604_v48 = vadd.f32 %v2603_v18, %v2297_v38 }
 0x4b6   : > { %2101 = vmatmul.f32.gmra.mxu2 %v6526_v8  ;;  %3210 = vmatmul.msk.f32.gmra.mxu0 %vm6528_vm3, %v6527_v15  ;;  %v6549_v8 = vand.u32 4294901760, %v6541_v62  ;;  %vm6564_vm3 = vmmov %vm6360_vm0 }
 0x4b7   : > { %v2825_v50 = vadd.f32 %v2824_v20, %v2604_v48  ;;  %2397 = vmatmul.f32.gmra.mxu3 %v6529_v40  ;;  %3258 = vmatmul.msk.f32.gmra.mxu1 %vm6530_vm4, %v6522_v53  ;;  %v6546_v20 = vld [vmem:[#allocation23_spill] sm:$0xff]  ;;  %vm6567_vm4 = vmmov %vm6360_vm0 }
 0x4b9   : > { %v2980_v29 = vmin.f32 %v2825_v50, 1.0  ;;  %v2022_v13 = vpop.f32.mrf.mxu2 }
 0x4ba   : > { %v2302_v21 = vpop.f32.mrf.mxu3  ;;  %v2023_v34 = vadd.f32 %v2022_v13, %v1778_v22 }
 0x4bb   : > { %3030 = vst.msk [vmem:[%s5576_s20 + $0x68] sm:$0xff] %vm3016_vm7, %v2980_v29  ;;  %v2303_v19 = vadd.f32 %v2302_v21, %v2018_v39  ;;  %v2611_v57 = vpop.f32.mrf.mxu0 }
 0x4bc   : > { %v2828_v43 = vpop.f32.mrf.mxu1 }
 0x4bd   : > { %v2608_v59 = vadd.f32 %v2607_v41, %v2303_v19  ;;  %v6551_v19 = vld [vmem:[#allocation25_spill] sm:$0xff] }
 0x4be   : > { %2106 = vmatmul.f32.gmra.mxu2 %v6531_v14  ;;  %3211 = vmatmul.msk.f32.gmra.mxu0 %vm6533_vm12, %v6532_v5  ;;  %vm6571_vm12 = vmmov %vm6360_vm0 }
 0x4bf   : > { %v2829_v27 = vadd.f32 %v2828_v43, %v2608_v59  ;;  %2403 = vmatmul.f32.gmra.mxu3 %v6534_v16  ;;  %3259 = vmatmul.msk.f32.gmra.mxu1 %vm6535_vm6, %v6527_v15  ;;  %v6554_v43 = vand.u32 4294901760, %v6546_v20  ;;  %vm6574_vm6 = vmmov %vm6360_vm0 }
 0x4c1   : > { %v2981_v12 = vmin.f32 %v2829_v27, 1.0  ;;  %v2027_v44 = vpop.f32.mrf.mxu2 }
 0x4c2   : > { %v2308_v55 = vpop.f32.mrf.mxu3  ;;  %v2028_v25 = vadd.f32 %v2027_v44, %v1782_v31  ;;  %v6555_v44 = vld [vmem:[#allocation27_spill] sm:$0xff] }
 0x4c3   : > { %3031 = vst.msk [vmem:[%s5576_s20 + $0x70] sm:$0xff] %vm3016_vm7, %v2981_v12  ;;  %v2309_v61 = vadd.f32 %v2308_v55, %v2023_v34  ;;  %v2615_v58 = vpop.f32.mrf.mxu0 }
 0x4c4   : > { %v2832_v10 = vpop.f32.mrf.mxu1 }
 0x4c5   : > { %v2612_v24 = vadd.f32 %v2611_v57, %v2309_v61  ;;  %v6558_v61 = vand.u32 4294901760, %v6551_v19 }
 0x4c6   : > { %2111 = vmatmul.f32.gmra.mxu2 %v6536_v26  ;;  %3212 = vmatmul.msk.f32.gmra.mxu0 %vm6538_vm2, %v6537_v45  ;;  %vm6578_vm2 = vmmov %vm6360_vm0 }
 0x4c7   : > { %v2833_v56 = vadd.f32 %v2832_v10, %v2612_v24  ;;  %2409 = vmatmul.f32.gmra.mxu3 %v6539_v2  ;;  %3260 = vmatmul.msk.f32.gmra.mxu1 %vm6540_vm15, %v6532_v5  ;;  %vm6581_vm15 = vmmov %vm6360_vm0 }
 0x4c9   : > { %v2982_v42 = vmin.f32 %v2833_v56, 1.0  ;;  %v2032_v4 = vpop.f32.mrf.mxu2 }
 0x4ca   : > { %v2314_v3 = vpop.f32.mrf.mxu3  ;;  %v2033_v52 = vadd.f32 %v2032_v4, %v1786_v47  ;;  %v6563_v4 = vand.u32 4294901760, %v6555_v44 }
 0x4cb   : > { %3032 = vst.msk [vmem:[%s5576_s20 + $0x78] sm:$0xff] %vm3016_vm7, %v2982_v42  ;;  %v2315_v7 = vadd.f32 %v2314_v3, %v2028_v25  ;;  %v2619_v18 = vpop.f32.mrf.mxu0  ;;  %v6560_v25 = vld [vmem:[#allocation29_spill] sm:$0xff] }
 0x4cc   : > { %v2836_v23 = vpop.f32.mrf.mxu1 }
 0x4cd   : > { %v2616_v37 = vadd.f32 %v2615_v58, %v2315_v7 }
 0x4ce   : > { %2116 = vmatmul.f32.gmra.mxu2 %v6541_v62  ;;  %3213 = vmatmul.msk.f32.gmra.mxu0 %vm6543_vm10, %v6542_v51  ;;  %vm6585_vm10 = vmmov %vm6360_vm0 }
 0x4cf   : > { %v2837_v53 = vadd.f32 %v2836_v23, %v2616_v37  ;;  %2415 = vmatmul.f32.gmra.mxu3 %v6544_v6  ;;  %3261 = vmatmul.msk.f32.gmra.mxu1 %vm6545_vm1, %v6537_v45  ;;  %v6569_v6 = vld [vmem:[#allocation90_spill] sm:$0xff]  ;;  %vm6588_vm1 = vmmov %vm6360_vm0 }
 0x4d1   : > { %v2983_v60 = vmin.f32 %v2837_v53, 1.0  ;;  %v2037_v49 = vpop.f32.mrf.mxu2  ;;  %v6565_v53 = vld [vmem:[#allocation31_spill] sm:$0xff] }
 0x4d2   : > { %v2320_v30 = vpop.f32.mrf.mxu3  ;;  %v2038_v15 = vadd.f32 %v2037_v49, %v1790_v33  ;;  %v6570_v49 = vand.u32 4294901760, %v6560_v25 }
 0x4d3   : > { %3033 = vst.msk [vmem:[%s5576_s20 + $0x80] sm:$0xff] %vm3016_vm7, %v2983_v60  ;;  %v2321_v11 = vadd.f32 %v2320_v30, %v2033_v52  ;;  %v2623_v9 = vpop.f32.mrf.mxu0  ;;  %v1806_v52 = vadd.f32 %v6569_v6, %v6568_v32 }
 0x4d4   : > { %v2840_v38 = vpop.f32.mrf.mxu1 }
 0x4d5   : > { %v2620_v41 = vadd.f32 %v2619_v18, %v2321_v11 }
 0x4d6   : > { %2121 = vmatmul.f32.gmra.mxu2 %v6546_v20  ;;  %3214 = vmatmul.msk.f32.gmra.mxu0 %vm6548_vm14, %v6547_v28  ;;  %vm6590_vm14 = vmmov %vm6360_vm0 }
 0x4d7   : > { %v2841_v48 = vadd.f32 %v2840_v38, %v2620_v41  ;;  %2421 = vmatmul.f32.gmra.mxu3 %v6549_v8  ;;  %3262 = vmatmul.msk.f32.gmra.mxu1 %vm6550_vm11, %v6542_v51  ;;  %v6573_v8 = vld [vmem:[#allocation30_spill] sm:$0xff]  ;;  %vm6594_vm11 = vmmov %vm6360_vm0 }
 0x4d9   : > { %v2984_v1 = vmin.f32 %v2841_v48, 1.0  ;;  %v2042_v50 = vpop.f32.mrf.mxu2  ;;  %v6572_v48 = vld [vmem:[#allocation33_spill] sm:$0xff] }
 0x4da   : > { %v2326_v40 = vpop.f32.mrf.mxu3  ;;  %v2043_v59 = vadd.f32 %v2042_v50, %v1794_v46 }
 0x4db   : > { %3034 = vst.msk [vmem:[%s5576_s20 + $0x88] sm:$0xff] %vm3016_vm7, %v2984_v1  ;;  %v2327_v39 = vadd.f32 %v2326_v40, %v2038_v15  ;;  %v2627_v29 = vpop.f32.mrf.mxu0  ;;  %v6575_v15 = vld [vmem:[#allocation89_spill] sm:$0xff] }
 0x4dc   : > { %v2844_v13 = vpop.f32.mrf.mxu1  ;;  %v6576_v1 = vld [vmem:[#allocation93_spill] sm:$0xff] }
 0x4dd   : > { %v2624_v21 = vadd.f32 %v2623_v9, %v2327_v39  ;;  %v1810_v50 = vadd.f32 %v6576_v1, %v6575_v15  ;;  %v6577_v39 = vand.u32 4294901760, %v6565_v53 }
 0x4de   : > { %2126 = vmatmul.f32.gmra.mxu2 %v6551_v19  ;;  %3215 = vmatmul.msk.f32.gmra.mxu0 %vm6553_vm8, %v6552_v17  ;;  %vm6596_vm8 = vmmov %vm6360_vm0 }
 0x4df   : > { %v2845_v57 = vadd.f32 %v2844_v13, %v2624_v21  ;;  %2427 = vmatmul.f32.gmra.mxu3 %v6554_v43  ;;  %3263 = vmatmul.msk.f32.gmra.mxu1 %vm6360_vm0, %v6547_v28 }
 0x4e1   : > { %v2985_v14 = vmin.f32 %v2845_v57, 1.0  ;;  %v2047_v5 = vpop.f32.mrf.mxu2 }
 0x4e2   : > { %v2332_v22 = vpop.f32.mrf.mxu3  ;;  %v2048_v58 = vadd.f32 %v2047_v5, %v1798_v36  ;;  %v6582_v5 = vld [vmem:[#allocation92_spill] sm:$0xff] }
 0x4e3   : > { %3035 = vst.msk [vmem:[%s5576_s20 + $0x90] sm:$0xff] %vm3016_vm7, %v2985_v14  ;;  %v2333_v27 = vadd.f32 %v2332_v22, %v2043_v59  ;;  %v2631_v16 = vpop.f32.mrf.mxu0  ;;  %v6579_v59 = vld [vmem:[#allocation35_spill] sm:$0xff]  ;;  %v6580_v14 = vld [vmem:[#allocation32_spill] sm:$0xff] }
 0x4e4   : > { %v2848_v34 = vpop.f32.mrf.mxu1  ;;  %v6583_v22 = vld [vmem:[#allocation95_spill] sm:$0xff] }
 0x4e5   : > { %v2628_v12 = vadd.f32 %v2627_v29, %v2333_v27  ;;  %v1814_v27 = vadd.f32 %v6583_v22, %v6582_v5  ;;  %v6609_v22 = vld [vmem:[#allocation60_spill] sm:$0xff] }
 0x4e6   : > { %2131 = vmatmul.f32.gmra.mxu2 %v6555_v44  ;;  %3216 = vmatmul.msk.f32.gmra.mxu0 %vm6557_vm9, %v6556_v63  ;;  %vm6601_vm9 = vmmov %vm6360_vm0 }
 0x4e7   : > { %v2849_v55 = vadd.f32 %v2848_v34, %v2628_v12  ;;  %2433 = vmatmul.f32.gmra.mxu3 %v6558_v61  ;;  %3264 = vmatmul.msk.f32.gmra.mxu1 %vm6559_vm5, %v6552_v17  ;;  %v6584_v34 = vand.u32 4294901760, %v6572_v48  ;;  %vm6605_vm5 = vmmov %vm6360_vm0 }
 0x4e9   : > { %v2986_v10 = vmin.f32 %v2849_v55, 1.0  ;;  %v2052_v24 = vpop.f32.mrf.mxu2 }
 0x4ea   : > { %v2338_v26 = vpop.f32.mrf.mxu3  ;;  %v2053_v3 = vadd.f32 %v2052_v24, %v1802_v54  ;;  %v6586_v24 = vld [vmem:[#allocation38_spill] sm:$0xff] }
 0x4eb   : > { %3036 = vst.msk [vmem:[%s5576_s20 + $0x98] sm:$0xff] %vm3016_vm7, %v2986_v10  ;;  %v2339_v45 = vadd.f32 %v2338_v26, %v2048_v58  ;;  %v2635_v31 = vpop.f32.mrf.mxu0  ;;  %v6587_v26 = vld [vmem:[#allocation34_spill] sm:$0xff] }
 0x4ec   : > { %v2852_v56 = vpop.f32.mrf.mxu1 }
 0x4ed   : > { %v2632_v2 = vadd.f32 %v2631_v16, %v2339_v45 }
 0x4ee   : > { %2136 = vmatmul.f32.gmra.mxu2 %v6560_v25  ;;  %3217 = vmatmul.msk.f32.gmra.mxu0 %vm6562_vm13, %v6561_v35  ;;  %vm6607_vm13 = vmmov %vm6360_vm0 }
 0x4ef   : > { %v2853_v42 = vadd.f32 %v2852_v56, %v2632_v2  ;;  %2439 = vmatmul.f32.gmra.mxu3 %v6563_v4  ;;  %3265 = vmatmul.msk.f32.gmra.mxu1 %vm6564_vm3, %v6556_v63  ;;  %v6591_v56 = vld [vmem:[#allocation47_spill] sm:$0xff]  ;;  %vm6611_vm3 = vmmov %vm6360_vm0 }
 0x4f1   : > { %v2987_v7 = vmin.f32 %v2853_v42, 1.0  ;;  %v2057_v18 = vpop.f32.mrf.mxu2 }
 0x4f2   : > { %v2344_v23 = vpop.f32.mrf.mxu3  ;;  %v2058_v30 = vadd.f32 %v2057_v18, %v1806_v52  ;;  %v6592_v18 = vld [vmem:[#allocation43_spill] sm:$0xff] }
 0x4f3   : > { %3037 = vst.msk [vmem:[%s5576_s20 + $0xa0] sm:$0xff] %vm3016_vm7, %v2987_v7  ;;  %v2345_v37 = vadd.f32 %v2344_v23, %v2053_v3  ;;  %v2639_v62 = vpop.f32.mrf.mxu0  ;;  %v6593_v23 = vld [vmem:[#allocation37_spill] sm:$0xff] }
 0x4f4   : > { %v2856_v51 = vpop.f32.mrf.mxu1 }
 0x4f5   : > { %v2636_v47 = vadd.f32 %v2635_v31, %v2345_v37  ;;  %v6589_v31 = vand.u32 4294901760, %v6579_v59 }
 0x4f6   : > { %2141 = vmatmul.f32.gmra.mxu2 %v6565_v53  ;;  %3218 = vmatmul.msk.f32.gmra.mxu0 %vm6567_vm4, %v6566_v0  ;;  %vm6613_vm4 = vmmov %vm6360_vm0 }
 0x4f7   : > { %v2857_v60 = vadd.f32 %v2856_v51, %v2636_v47  ;;  %2445 = vmatmul.f32.gmra.mxu3 %v6570_v49  ;;  %3266 = vmatmul.msk.f32.gmra.mxu1 %vm6571_vm12, %v6561_v35  ;;  %v6597_v51 = vld [vmem:[#allocation55_spill] sm:$0xff]  ;;  %vm6617_vm12 = vmmov %vm6360_vm0 }
 0x4f9   : > { %v2988_v11 = vmin.f32 %v2857_v60, 1.0  ;;  %v2062_v9 = vpop.f32.mrf.mxu2 }
 0x4fa   : > { %v2350_v38 = vpop.f32.mrf.mxu3  ;;  %v2063_v29 = vadd.f32 %v2062_v9, %v1810_v50 }
 0x4fb   : > { %3038 = vst.msk [vmem:[%s5576_s20 + $0xa8] sm:$0xff] %vm3016_vm7, %v2988_v11  ;;  %v2351_v41 = vadd.f32 %v2350_v38, %v2058_v30  ;;  %v2643_v20 = vpop.f32.mrf.mxu0  ;;  %v6598_v30 = vld [vmem:[#allocation49_spill] sm:$0xff]  ;;  %v6599_v11 = vld [vmem:[#allocation40_spill] sm:$0xff]  ;;  %v6600_v38 = vand.u32 4294901760, %v6592_v18 }
 0x4fc   : > { %v2860_v28 = vpop.f32.mrf.mxu1 }
 0x4fd   : > { %v2640_v33 = vadd.f32 %v2639_v62, %v2351_v41  ;;  %v6595_v62 = vand.u32 4294901760, %v6586_v24  ;;  %v6602_v41 = vld [vmem:[#allocation62_spill] sm:$0xff] }
 0x4fe   : > { %2146 = vmatmul.f32.gmra.mxu2 %v6572_v48  ;;  %3219 = vmatmul.msk.f32.gmra.mxu0 %vm6574_vm6, %v6573_v8  ;;  %vm6619_vm6 = vmmov %vm6360_vm0 }
 0x4ff   : > { %v2861_v40 = vadd.f32 %v2860_v28, %v2640_v33  ;;  %2451 = vmatmul.f32.gmra.mxu3 %v6577_v39  ;;  %3267 = vmatmul.msk.f32.gmra.mxu1 %vm6578_vm2, %v6566_v0  ;;  %v6604_v39 = vld [vmem:[#allocation46_spill] sm:$0xff]  ;;  %vm6623_vm2 = vmmov %vm6360_vm0 }
 0x501   : > { %v2989_v13 = vmin.f32 %v2861_v40, 1.0  ;;  %v2067_v21 = vpop.f32.mrf.mxu2  ;;  %v6603_v40 = vld [vmem:[#allocation54_spill] sm:$0xff] }
 0x502   : > { %v2356_v19 = vpop.f32.mrf.mxu3  ;;  %v2068_v12 = vadd.f32 %v2067_v21, %v1814_v27  ;;  %v6608_v21 = vld [vmem:[#allocation67_spill] sm:$0xff] }
 0x503   : > { %3039 = vst.msk [vmem:[%s5576_s20 + $0xb0] sm:$0xff] %vm3016_vm7, %v2989_v13  ;;  %v2357_v17 = vadd.f32 %v2356_v19, %v2063_v29  ;;  %v2647_v46 = vpop.f32.mrf.mxu0  ;;  %v6606_v13 = vand.u32 4294901760, %v6598_v30  ;;  %v6610_v27 = vld [vmem:[#allocation51_spill] sm:$0xff] }
 0x504   : > { %v2864_v57 = vpop.f32.mrf.mxu1 }
 0x505   : > { %v2644_v43 = vadd.f32 %v2643_v20, %v2357_v17 }
 0x506   : > { %2151 = vmatmul.f32.gmra.mxu2 %v6579_v59  ;;  %3220 = vmatmul.msk.f32.gmra.mxu0 %vm6581_vm15, %v6580_v14  ;;  %vm6625_vm15 = vmmov %vm6360_vm0 }
 0x507   : > { %v2865_v16 = vadd.f32 %v2864_v57, %v2644_v43  ;;  %2457 = vmatmul.f32.gmra.mxu3 %v6584_v34  ;;  %3268 = vmatmul.msk.f32.gmra.mxu1 %vm6585_vm10, %v6573_v8  ;;  %v6612_v34 = vand.u32 4294901760, %v6603_v40  ;;  %vm6628_vm10 = vmmov %vm6360_vm0 }
 0x509   : > { %v2990_v44 = vmin.f32 %v2865_v16, 1.0  ;;  %v2072_v63 = vpop.f32.mrf.mxu2 }
 0x50a   : > { %v2362_v36 = vpop.f32.mrf.mxu3  ;;  %v2073_v2 = vadd.f32 %v2072_v63, %v6591_v56  ;;  %v6618_v56 = vand.u32 4294901760, %v6609_v22 }
 0x50b   : > { %3040 = vst.msk [vmem:[%s5576_s20 + $0xb8] sm:$0xff] %vm3016_vm7, %v2990_v44  ;;  %v2363_v55 = vadd.f32 %v2362_v36, %v2068_v12  ;;  %v2651_v61 = vpop.f32.mrf.mxu0  ;;  %v6614_v12 = vld [vmem:[#allocation70_spill] sm:$0xff] }
 0x50c   : > { %v2868_v58 = vpop.f32.mrf.mxu1 }
 0x50d   : > { %v2648_v10 = vadd.f32 %v2647_v46, %v2363_v55 }
 0x50e   : > { %2156 = vmatmul.f32.gmra.mxu2 %v6586_v24  ;;  %3221 = vmatmul.msk.f32.gmra.mxu0 %vm6588_vm1, %v6587_v26  ;;  %vm6630_vm1 = vmmov %vm6360_vm0 }
 0x50f   : > { %v2869_v45 = vadd.f32 %v2868_v58, %v2648_v10  ;;  %2463 = vmatmul.f32.gmra.mxu3 %v6589_v31  ;;  %3269 = vmatmul.msk.f32.gmra.mxu1 %vm6590_vm14, %v6580_v14  ;;  %vm6632_vm14 = vmmov %vm6360_vm0 }
 0x511   : > { %v2991_v25 = vmin.f32 %v2869_v45, 1.0  ;;  %v2077_v35 = vpop.f32.mrf.mxu2  ;;  %v6616_v45 = vld [vmem:[#allocation56_spill] sm:$0xff] }
 0x512   : > { %v2368_v54 = vpop.f32.mrf.mxu3  ;;  %v2078_v47 = vadd.f32 %v2077_v35, %v6597_v51 }
 0x513   : > { %3041 = vst.msk [vmem:[%s5576_s20 + $0xc0] sm:$0xff] %vm3016_vm7, %v2991_v25  ;;  %v2369_v42 = vadd.f32 %v2368_v54, %v2073_v2  ;;  %v2655_v4 = vpop.f32.mrf.mxu0  ;;  %v6620_v2 = vld [vmem:[#allocation71_spill] sm:$0xff] }
 0x514   : > { %v2872_v3 = vpop.f32.mrf.mxu1 }
 0x515   : > { %v2652_v7 = vadd.f32 %v2651_v61, %v2369_v42 }
 0x516   : > { %2161 = vmatmul.f32.gmra.mxu2 %v6592_v18  ;;  %3222 = vmatmul.msk.f32.gmra.mxu0 %vm6594_vm11, %v6593_v23 }
 0x517   : > { %v2873_v37 = vadd.f32 %v2872_v3, %v2652_v7  ;;  %2469 = vmatmul.f32.gmra.mxu3 %v6595_v62  ;;  %3270 = vmatmul.msk.f32.gmra.mxu1 %vm6596_vm8, %v6587_v26  ;;  %v6615_v26 = vld [vmem:[#allocation65_spill] sm:$0xff] }
 0x518   : > { %v6624_v51 = vand.u32 4294901760, %v6615_v26 }
 0x519   : > { %v2992_v53 = vmin.f32 %v2873_v37, 1.0  ;;  %v2082_v0 = vpop.f32.mrf.mxu2  ;;  %v6622_v37 = vld [vmem:[#allocation61_spill] sm:$0xff] }
 0x51a   : > { %v2374_v32 = vpop.f32.mrf.mxu3  ;;  %v2083_v20 = vadd.f32 %v2082_v0, %v6602_v41  ;;  %v6631_v41 = vld [vmem:[#allocation73_spill] sm:$0xff] }
 0x51b   : > { %3042 = vst.msk [vmem:[%s5576_s20 + $0xc8] sm:$0xff] %vm3016_vm7, %v2992_v53  ;;  %v2375_v6 = vadd.f32 %v2374_v32, %v2078_v47  ;;  %v2659_v52 = vpop.f32.mrf.mxu0  ;;  %v6626_v47 = vld [vmem:[#allocation72_spill] sm:$0xff] }
 0x51c   : > { %v2876_v60 = vpop.f32.mrf.mxu1 }
 0x51d   : > { %v2656_v49 = vadd.f32 %v2655_v4, %v2375_v6 }
 0x51e   : > { %2166 = vmatmul.f32.gmra.mxu2 %v6598_v30  ;;  %3223 = vmatmul.msk.f32.gmra.mxu0 %vm6360_vm0, %v6599_v11 }
 0x51f   : > { %v2877_v9 = vadd.f32 %v2876_v60, %v2656_v49  ;;  %2475 = vmatmul.f32.gmra.mxu3 %v6600_v38  ;;  %3271 = vmatmul.msk.f32.gmra.mxu1 %vm6601_vm9, %v6593_v23  ;;  %v6621_v23 = vld [vmem:[#allocation69_spill] sm:$0xff] }
 0x520   : > { %v6629_v38 = vand.u32 4294901760, %v6621_v23 }
 0x521   : > { %v2993_v28 = vmin.f32 %v2877_v9, 1.0  ;;  %v2087_v33 = vpop.f32.mrf.mxu2 }
 0x522   : > { %v2380_v48 = vpop.f32.mrf.mxu3  ;;  %v2088_v19 = vadd.f32 %v2087_v33, %v6608_v21 }
 0x523   : > { %3043 = vst.msk [vmem:[%s5576_s20 + $0xd0] sm:$0xff] %vm3016_vm7, %v2993_v28  ;;  %v2381_v8 = vadd.f32 %v2380_v48, %v2083_v20  ;;  %v2663_v15 = vpop.f32.mrf.mxu0 }
 0x524   : > { %v2880_v1 = vpop.f32.mrf.mxu1 }
 0x525   : > { %v2660_v50 = vadd.f32 %v2659_v52, %v2381_v8 }
 0x526   : > { %2171 = vmatmul.f32.gmra.mxu2 %v6603_v40  ;;  %3224 = vmatmul.msk.f32.gmra.mxu0 %vm6605_vm5, %v6604_v39 }
 0x527   : > { %v2881_v29 = vadd.f32 %v2880_v1, %v2660_v50  ;;  %2481 = vmatmul.f32.gmra.mxu3 %v6606_v13  ;;  %3272 = vmatmul.msk.f32.gmra.mxu1 %vm6607_vm13, %v6599_v11  ;;  %v6627_v11 = vld [vmem:[#allocation66_spill] sm:$0xff] }
 0x529   : > { %v2994_v17 = vmin.f32 %v2881_v29, 1.0  ;;  %v2092_v46 = vpop.f32.mrf.mxu2 }
 0x52a   : > { %v2386_v57 = vpop.f32.mrf.mxu3  ;;  %v2093_v44 = vadd.f32 %v2092_v46, %v6614_v12 }
 0x52b   : > { %3044 = vst.msk [vmem:[%s5576_s20 + $0xd8] sm:$0xff] %vm3016_vm7, %v2994_v17  ;;  %v2387_v43 = vadd.f32 %v2386_v57, %v2088_v19  ;;  %v2667_v59 = vpop.f32.mrf.mxu0 }
 0x52c   : > { %v2884_v14 = vpop.f32.mrf.mxu1 }
 0x52d   : > { %v2664_v5 = vadd.f32 %v2663_v15, %v2387_v43 }
 0x52e   : > { %2176 = vmatmul.f32.gmra.mxu2 %v6609_v22  ;;  %3225 = vmatmul.msk.f32.gmra.mxu0 %vm6611_vm3, %v6610_v27 }
 0x52f   : > { %v2885_v16 = vadd.f32 %v2884_v14, %v2664_v5  ;;  %2487 = vmatmul.f32.gmra.mxu3 %v6612_v34  ;;  %3273 = vmatmul.msk.f32.gmra.mxu1 %vm6613_vm4, %v6604_v39  ;;  %v6633_v39 = vld [vmem:[#allocation74_spill] sm:$0xff]  ;;  %v6634_v14 = vld [vmem:[#allocation75_spill] sm:$0xff] }
 0x531   : > { %v2995_v63 = vmin.f32 %v2885_v16, 1.0  ;;  %v2097_v36 = vpop.f32.mrf.mxu2 }
 0x532   : > { %v2392_v55 = vpop.f32.mrf.mxu3  ;;  %v2098_v25 = vadd.f32 %v2097_v36, %v6620_v2 }
 0x533   : > { %3045 = vst.msk [vmem:[%s5576_s20 + $0xe0] sm:$0xff] %vm3016_vm7, %v2995_v63  ;;  %v2393_v61 = vadd.f32 %v2392_v55, %v2093_v44  ;;  %v2671_v58 = vpop.f32.mrf.mxu0  ;;  %v6635_v55 = vld [vmem:[#allocation76_spill] sm:$0xff] }
 0x534   : > { %v2888_v10 = vpop.f32.mrf.mxu1 }
 0x535   : > { %v2668_v24 = vadd.f32 %v2667_v59, %v2393_v61 }
 0x536   : > { %2181 = vmatmul.f32.gmra.mxu2 %v6615_v26  ;;  %3226 = vmatmul.msk.f32.gmra.mxu0 %vm6617_vm12, %v6616_v45 }
 0x537   : > { %v2889_v31 = vadd.f32 %v2888_v10, %v2668_v24  ;;  %2493 = vmatmul.f32.gmra.mxu3 %v6618_v56  ;;  %3274 = vmatmul.msk.f32.gmra.mxu1 %vm6619_vm6, %v6610_v27 }
 0x539   : > { %v2996_v35 = vmin.f32 %v2889_v31, 1.0  ;;  %v2102_v54 = vpop.f32.mrf.mxu2 }
 0x53a   : > { %v2398_v42 = vpop.f32.mrf.mxu3  ;;  %v2103_v53 = vadd.f32 %v2102_v54, %v6626_v47 }
 0x53b   : > { %3046 = vst.msk [vmem:[%s5576_s20 + $0xe8] sm:$0xff] %vm3016_vm7, %v2996_v35  ;;  %v2399_v4 = vadd.f32 %v2398_v42, %v2098_v25  ;;  %v2675_v3 = vpop.f32.mrf.mxu0  ;;  %v6636_v25 = vld [vmem:[#allocation77_spill] sm:$0xff] }
 0x53c   : > { %v2892_v7 = vpop.f32.mrf.mxu1 }
 0x53d   : > { %v2672_v18 = vadd.f32 %v2671_v58, %v2399_v4 }
 0x53e   : > { %2186 = vmatmul.f32.gmra.mxu2 %v6621_v23  ;;  %3227 = vmatmul.msk.f32.gmra.mxu0 %vm6623_vm2, %v6622_v37 }
 0x53f   : > { %v2893_v62 = vadd.f32 %v2892_v7, %v2672_v18  ;;  %2499 = vmatmul.f32.gmra.mxu3 %v6624_v51  ;;  %3275 = vmatmul.msk.f32.gmra.mxu1 %vm6625_vm15, %v6616_v45 }
 0x541   : > { %v2997_v0 = vmin.f32 %v2893_v62, 1.0  ;;  %v2107_v32 = vpop.f32.mrf.mxu2  ;;  %v6637_v62 = vld [vmem:[#allocation78_spill] sm:$0xff] }
 0x542   : > { %v2404_v6 = vpop.f32.mrf.mxu3  ;;  %v2108_v20 = vadd.f32 %v2107_v32, %v6631_v41 }
 0x543   : > { %3047 = vst.msk [vmem:[%s5576_s20 + $0xf0] sm:$0xff] %vm3016_vm7, %v2997_v0  ;;  %v2405_v52 = vadd.f32 %v2404_v6, %v2103_v53  ;;  %v2679_v60 = vpop.f32.mrf.mxu0 }
 0x544   : > { %v2896_v49 = vpop.f32.mrf.mxu1 }
 0x545   : > { %v2676_v30 = vadd.f32 %v2675_v3, %v2405_v52 }
 0x546   : > { %3228 = vmatmul.msk.f32.gmra.mxu0 %vm6628_vm10, %v6627_v11 }
 0x547   : > { %v2897_v9 = vadd.f32 %v2896_v49, %v2676_v30  ;;  %2505 = vmatmul.f32.gmra.mxu3 %v6629_v38  ;;  %3276 = vmatmul.msk.f32.gmra.mxu1 %vm6630_vm1, %v6622_v37  ;;  %v6638_v30 = vld [vmem:[#allocation79_spill] sm:$0xff] }
 0x549   : > { %v2998_v28 = vmin.f32 %v2897_v9, 1.0  ;;  %v2112_v33 = vpop.f32.mrf.mxu2 }
 0x54a   : > { %v2410_v48 = vpop.f32.mrf.mxu3  ;;  %v2113_v29 = vadd.f32 %v2112_v33, %v6633_v39 }
 0x54b   : > { %3048 = vst.msk [vmem:[%s5576_s20 + $0xf8] sm:$0xff] %vm3016_vm7, %v2998_v28  ;;  %v2411_v8 = vadd.f32 %v2410_v48, %v2108_v20  ;;  %v2683_v15 = vpop.f32.mrf.mxu0 }
 0x54c   : > { %v2900_v1 = vpop.f32.mrf.mxu1 }
 0x54d   : > { %v2680_v50 = vadd.f32 %v2679_v60, %v2411_v8 }
 0x54f   : > { %v2901_v40 = vadd.f32 %v2900_v1, %v2680_v50  ;;  %3277 = vmatmul.msk.f32.gmra.mxu1 %vm6632_vm14, %v6627_v11 }
 0x551   : > { %v2999_v13 = vmin.f32 %v2901_v40, 1.0  ;;  %v2117_v21 = vpop.f32.mrf.mxu2 }
 0x552   : > { %v2416_v19 = vpop.f32.mrf.mxu3  ;;  %v2118_v5 = vadd.f32 %v2117_v21, %v6634_v14 }
 0x553   : > { %3049 = vst.msk [vmem:[%s5576_s20 + $0x100] sm:$0xff] %vm3016_vm7, %v2999_v13  ;;  %v2417_v17 = vadd.f32 %v2416_v19, %v2113_v29  ;;  %v2687_v46 = vpop.f32.mrf.mxu0 }
 0x554   : > { %v2904_v57 = vpop.f32.mrf.mxu1 }
 0x555   : > { %v2684_v43 = vadd.f32 %v2683_v15, %v2417_v17  ;;  %v6639_v15 = vld [vmem:[#allocation80_spill] sm:$0xff] }
 0x557   : > { %v2905_v59 = vadd.f32 %v2904_v57, %v2684_v43 }
 0x559   : > { %v3000_v22 = vmin.f32 %v2905_v59, 1.0  ;;  %v2122_v27 = vpop.f32.mrf.mxu2 }
 0x55a   : > { %v2422_v16 = vpop.f32.mrf.mxu3  ;;  %v2123_v61 = vadd.f32 %v2122_v27, %v6635_v55 }
 0x55b   : > { %3050 = vst.msk [vmem:[%s5576_s20 + $0x108] sm:$0xff] %vm3016_vm7, %v3000_v22  ;;  %v2423_v34 = vadd.f32 %v2422_v16, %v2118_v5  ;;  %v2691_v12 = vpop.f32.mrf.mxu0 }
 0x55c   : > { %v2908_v44 = vpop.f32.mrf.mxu1 }
 0x55d   : > { %v2688_v63 = vadd.f32 %v2687_v46, %v2423_v34  ;;  %v6640_v46 = vld [vmem:[#allocation81_spill] sm:$0xff] }
 0x55f   : > { %v2909_v36 = vadd.f32 %v2908_v44, %v2688_v63 }
 0x561   : > { %v3001_v58 = vmin.f32 %v2909_v36, 1.0  ;;  %v2127_v10 = vpop.f32.mrf.mxu2 }
 0x562   : > { %v2428_v24 = vpop.f32.mrf.mxu3  ;;  %v2128_v35 = vadd.f32 %v2127_v10, %v6636_v25 }
 0x563   : > { %3051 = vst.msk [vmem:[%s5576_s20 + $0x110] sm:$0xff] %vm3016_vm7, %v3001_v58  ;;  %v2429_v26 = vadd.f32 %v2428_v24, %v2123_v61  ;;  %v2695_v45 = vpop.f32.mrf.mxu0 }
 0x564   : > { %v2912_v31 = vpop.f32.mrf.mxu1 }
 0x565   : > { %v2692_v56 = vadd.f32 %v2691_v12, %v2429_v26  ;;  %v6641_v12 = vld [vmem:[#allocation82_spill] sm:$0xff] }
 0x567   : > { %v2913_v2 = vadd.f32 %v2912_v31, %v2692_v56 }
 0x569   : > { %v3002_v54 = vmin.f32 %v2913_v2, 1.0  ;;  %v2132_v42 = vpop.f32.mrf.mxu2 }
 0x56a   : > { %v2434_v4 = vpop.f32.mrf.mxu3  ;;  %v2133_v51 = vadd.f32 %v2132_v42, %v6637_v62 }
 0x56b   : > { %3052 = vst.msk [vmem:[%s5576_s20 + $0x118] sm:$0xff] %vm3016_vm7, %v3002_v54  ;;  %v2435_v3 = vadd.f32 %v2434_v4, %v2128_v35  ;;  %v2699_v7 = vpop.f32.mrf.mxu0 }
 0x56c   : > { %v2916_v18 = vpop.f32.mrf.mxu1 }
 0x56d   : > { %v2696_v23 = vadd.f32 %v2695_v45, %v2435_v3  ;;  %v6642_v45 = vld [vmem:[#allocation83_spill] sm:$0xff] }
 0x56f   : > { %v2917_v37 = vadd.f32 %v2916_v18, %v2696_v23 }
 0x571   : > { %v3003_v47 = vmin.f32 %v2917_v37, 1.0  ;;  %v2137_v53 = vpop.f32.mrf.mxu2 }
 0x572   : > { %v2440_v0 = vpop.f32.mrf.mxu3  ;;  %v2138_v11 = vadd.f32 %v2137_v53, %v6638_v30 }
 0x573   : > { %3053 = vst.msk [vmem:[%s5576_s20 + $0x120] sm:$0xff] %vm3016_vm7, %v3003_v47  ;;  %v2441_v32 = vadd.f32 %v2440_v0, %v2133_v51  ;;  %v2703_v6 = vpop.f32.mrf.mxu0 }
 0x574   : > { %v2920_v52 = vpop.f32.mrf.mxu1 }
 0x575   : > { %v2700_v60 = vadd.f32 %v2699_v7, %v2441_v32  ;;  %v6643_v7 = vld [vmem:[#allocation84_spill] sm:$0xff] }
 0x577   : > { %v2921_v49 = vadd.f32 %v2920_v52, %v2700_v60 }
 0x579   : > { %v3004_v9 = vmin.f32 %v2921_v49, 1.0  ;;  %v2142_v38 = vpop.f32.mrf.mxu2 }
 0x57a   : > { %v2446_v41 = vpop.f32.mrf.mxu3  ;;  %v2143_v1 = vadd.f32 %v2142_v38, %v6639_v15 }
 0x57b   : > { %3054 = vst.msk [vmem:[%s5576_s20 + $0x128] sm:$0xff] %vm3016_vm7, %v3004_v9  ;;  %v2447_v20 = vadd.f32 %v2446_v41, %v2138_v11  ;;  %v2707_v28 = vpop.f32.mrf.mxu0 }
 0x57c   : > { %v2924_v33 = vpop.f32.mrf.mxu1 }
 0x57d   : > { %v2704_v48 = vadd.f32 %v2703_v6, %v2447_v20  ;;  %v6644_v6 = vld [vmem:[#allocation85_spill] sm:$0xff] }
 0x57f   : > { %v2925_v8 = vadd.f32 %v2924_v33, %v2704_v48 }
 0x581   : > { %v3005_v50 = vmin.f32 %v2925_v8, 1.0  ;;  %v2147_v40 = vpop.f32.mrf.mxu2 }
 0x582   : > { %v2452_v39 = vpop.f32.mrf.mxu3  ;;  %v2148_v57 = vadd.f32 %v2147_v40, %v6640_v46 }
 0x583   : > { %3055 = vst.msk [vmem:[%s5576_s20 + $0x130] sm:$0xff] %vm3016_vm7, %v3005_v50  ;;  %v2453_v29 = vadd.f32 %v2452_v39, %v2143_v1  ;;  %v2711_v13 = vpop.f32.mrf.mxu0 }
 0x584   : > { %v2928_v21 = vpop.f32.mrf.mxu1 }
 0x585   : > { %v2708_v19 = vadd.f32 %v2707_v28, %v2453_v29  ;;  %v6645_v28 = vld [vmem:[#allocation86_spill] sm:$0xff] }
 0x587   : > { %v2929_v17 = vadd.f32 %v2928_v21, %v2708_v19 }
 0x589   : > { %v3006_v43 = vmin.f32 %v2929_v17, 1.0  ;;  %v2152_v59 = vpop.f32.mrf.mxu2 }
 0x58a   : > { %v2458_v14 = vpop.f32.mrf.mxu3  ;;  %v2153_v44 = vadd.f32 %v2152_v59, %v6641_v12 }
 0x58b   : > { %3056 = vst.msk [vmem:[%s5576_s20 + $0x138] sm:$0xff] %vm3016_vm7, %v3006_v43  ;;  %v2459_v5 = vadd.f32 %v2458_v14, %v2148_v57  ;;  %v2715_v22 = vpop.f32.mrf.mxu0 }
 0x58c   : > { %v2932_v27 = vpop.f32.mrf.mxu1 }
 0x58d   : > { %v2712_v16 = vadd.f32 %v2711_v13, %v2459_v5  ;;  %v6646_v13 = vld [vmem:[#allocation88_spill] sm:$0xff]  ;;  %v6647_v5 = vld [vmem:[#allocation91_spill] sm:$0xff] }
 0x58f   : > { %v2933_v34 = vadd.f32 %v2932_v27, %v2712_v16 }
 0x591   : > { %v3007_v63 = vmin.f32 %v2933_v34, 1.0  ;;  %v2157_v36 = vpop.f32.mrf.mxu2 }
 0x592   : > { %v2464_v55 = vpop.f32.mrf.mxu3  ;;  %v2158_v31 = vadd.f32 %v2157_v36, %v6642_v45 }
 0x593   : > { %3057 = vst.msk [vmem:[%s5576_s20 + $0x140] sm:$0xff] %vm3016_vm7, %v3007_v63  ;;  %v2465_v61 = vadd.f32 %v2464_v55, %v2153_v44  ;;  %v2719_v58 = vpop.f32.mrf.mxu0 }
 0x594   : > { %v2936_v10 = vpop.f32.mrf.mxu1 }
 0x595   : > { %v2716_v24 = vadd.f32 %v2715_v22, %v2465_v61  ;;  %v6648_v61 = vld [vmem:[#allocation94_spill] sm:$0xff] }
 0x597   : > { %v2937_v26 = vadd.f32 %v2936_v10, %v2716_v24 }
 0x599   : > { %v3008_v56 = vmin.f32 %v2937_v26, 1.0  ;;  %v2162_v2 = vpop.f32.mrf.mxu2 }
 0x59a   : > { %v2470_v25 = vpop.f32.mrf.mxu3  ;;  %v2163_v18 = vadd.f32 %v2162_v2, %v6643_v7 }
 0x59b   : > { %3058 = vst.msk [vmem:[%s5576_s20 + $0x148] sm:$0xff] %vm3016_vm7, %v3008_v56  ;;  %v2471_v35 = vadd.f32 %v2470_v25, %v2158_v31  ;;  %v2723_v54 = vpop.f32.mrf.mxu0 }
 0x59c   : > { %v2940_v42 = vpop.f32.mrf.mxu1 }
 0x59d   : > { %v2720_v4 = vadd.f32 %v2719_v58, %v2471_v35 }
 0x59f   : > { %v2941_v3 = vadd.f32 %v2940_v42, %v2720_v4 }
 0x5a1   : > { %v3009_v23 = vmin.f32 %v2941_v3, 1.0  ;;  %v2167_v37 = vpop.f32.mrf.mxu2 }
 0x5a2   : > { %v2476_v62 = vpop.f32.mrf.mxu3  ;;  %v2168_v52 = vadd.f32 %v2167_v37, %v6644_v6 }
 0x5a3   : > { %3059 = vst.msk [vmem:[%s5576_s20 + $0x150] sm:$0xff] %vm3016_vm7, %v3009_v23  ;;  %v2477_v51 = vadd.f32 %v2476_v62, %v2163_v18  ;;  %v2727_v47 = vpop.f32.mrf.mxu0 }
 0x5a4   : > { %v2944_v53 = vpop.f32.mrf.mxu1 }
 0x5a5   : > { %v2724_v0 = vadd.f32 %v2723_v54, %v2477_v51 }
 0x5a7   : > { %v2945_v32 = vadd.f32 %v2944_v53, %v2724_v0 }
 0x5a9   : > { %v3010_v60 = vmin.f32 %v2945_v32, 1.0  ;;  %v2172_v49 = vpop.f32.mrf.mxu2 }
 0x5aa   : > { %v2482_v30 = vpop.f32.mrf.mxu3  ;;  %v2173_v33 = vadd.f32 %v2172_v49, %v6645_v28 }
 0x5ab   : > { %3060 = vst.msk [vmem:[%s5576_s20 + $0x158] sm:$0xff] %vm3016_vm7, %v3010_v60  ;;  %v2483_v11 = vadd.f32 %v2482_v30, %v2168_v52  ;;  %v2731_v41 = vpop.f32.mrf.mxu0 }
 0x5ac   : > { %v2948_v9 = vpop.f32.mrf.mxu1 }
 0x5ad   : > { %v2728_v38 = vadd.f32 %v2727_v47, %v2483_v11 }
 0x5af   : > { %v2949_v20 = vadd.f32 %v2948_v9, %v2728_v38 }
 0x5b1   : > { %v3011_v48 = vmin.f32 %v2949_v20, 1.0  ;;  %v2177_v8 = vpop.f32.mrf.mxu2 }
 0x5b2   : > { %v2488_v15 = vpop.f32.mrf.mxu3  ;;  %v2178_v21 = vadd.f32 %v2177_v8, %v6646_v13 }
 0x5b3   : > { %3061 = vst.msk [vmem:[%s5576_s20 + $0x160] sm:$0xff] %vm3016_vm7, %v3011_v48  ;;  %v2489_v1 = vadd.f32 %v2488_v15, %v2173_v33  ;;  %v2735_v29 = vpop.f32.mrf.mxu0 }
 0x5b4   : > { %v2952_v50 = vpop.f32.mrf.mxu1 }
 0x5b5   : > { %v2732_v40 = vadd.f32 %v2731_v41, %v2489_v1 }
 0x5b7   : > { %v2953_v39 = vadd.f32 %v2952_v50, %v2732_v40 }
 0x5b9   : > { %v3012_v19 = vmin.f32 %v2953_v39, 1.0  ;;  %v2182_v57 = vpop.f32.mrf.mxu2 }
 0x5ba   : > { %v2494_v17 = vpop.f32.mrf.mxu3  ;;  %v2183_v22 = vadd.f32 %v2182_v57, %v6647_v5 }
 0x5bb   : > { %3062 = vst.msk [vmem:[%s5576_s20 + $0x168] sm:$0xff] %vm3016_vm7, %v3012_v19  ;;  %v2495_v46 = vadd.f32 %v2494_v17, %v2178_v21  ;;  %v2739_v16 = vpop.f32.mrf.mxu0 }
 0x5bc   : > { %v2956_v43 = vpop.f32.mrf.mxu1 }
 0x5bd   : > { %v2736_v59 = vadd.f32 %v2735_v29, %v2495_v46 }
 0x5bf   : > { %v2957_v14 = vadd.f32 %v2956_v43, %v2736_v59 }
 0x5c1   : > { %v3013_v27 = vmin.f32 %v2957_v14, 1.0  ;;  %v2187_v36 = vpop.f32.mrf.mxu2 }
 0x5c2   : > { %v2500_v34 = vpop.f32.mrf.mxu3  ;;  %v2188_v58 = vadd.f32 %v2187_v36, %v6648_v61 }
 0x5c3   : > { %3063 = vst.msk [vmem:[%s5576_s20 + $0x170] sm:$0xff] %vm3016_vm7, %v3013_v27  ;;  %v2501_v12 = vadd.f32 %v2500_v34, %v2183_v22  ;;  %v2743_v45 = vpop.f32.mrf.mxu0 }
 0x5c4   : > { %v2960_v44 = vpop.f32.mrf.mxu1 }
 0x5c5   : > { %v2740_v63 = vadd.f32 %v2739_v16, %v2501_v12 }
 0x5c7   : > { %v2961_v55 = vadd.f32 %v2960_v44, %v2740_v63 }
 0x5c9   : > { %v3014_v10 = vmin.f32 %v2961_v55, 1.0 }
 0x5ca   : > { %v2506_v24 = vpop.f32.mrf.mxu3 }
 0x5cb   : > { %3064 = vst.msk [vmem:[%s5576_s20 + $0x178] sm:$0xff] %vm3016_vm7, %v3014_v10  ;;  %v2507_v26 = vadd.f32 %v2506_v24, %v2188_v58 }
 0x5cc   : > { %v2964_v56 = vpop.f32.mrf.mxu1 }
 0x5cd   : > { %v2744_v31 = vadd.f32 %v2743_v45, %v2507_v26 }
 0x5cf   : > { %v2965_v2 = vadd.f32 %v2964_v56, %v2744_v31 }
 0x5d1   : > { %v3015_v25 = vmin.f32 %v2965_v2, 1.0 }
 0x5d3   : > { %3065 = vst.msk [vmem:[%s5576_s20 + $0x180] sm:$0xff] %vm3016_vm7, %v3015_v25 }
 0x5d4 PF: > { %s11_s6 = sadd.s32 1, %s3464_s6  }
 0x5d5   : > { %p8_p5 = scmp.ge.s32.totalorder %s11_s6, 5  }
 0x5d7   :  { %10 = sbr.rel (!%p8_p5) target bundleno = 1 (0x1), region = 54 }

</bundles_post_ra>
